<compile_context>
chip_gen: v6e
topology: v6e:2x2x1
jax: 0.10.0
libtpu: 0.0.40
codegen_flags: <defaults>
</compile_context>

<pallas_src>
import math

import jax
import jax.numpy as jnp
from jax.experimental import pallas as pl
from jax.experimental.pallas import tpu as pltpu


def _round_up(x: int, m: int) -> int:
    return ((x + m - 1) // m) * m


def _vmem_limit_bytes() -> int:
    """Generation-aware VMEM limit with headroom (96 MiB on v5e/v6e, 48 MiB on v7x)."""
    try:
        cap = int(pltpu.get_tpu_info().vmem_capacity_bytes)
    except Exception:
        cap = 64 * 1024 * 1024  # conservative fallback (v7x per-core physical VMEM)
    return int(cap * 3 // 4)


# ----------------------------------------------------------------------------
# Kernel (specialised at trace time on modality / static layout metadata)
# ----------------------------------------------------------------------------
def _make_fused_kernel(fn: int, nc: int, d: int, pad_off, pad_sz, cat_precision):
    has_num, has_cat = fn > 0, nc > 0
    fn_d = fn * d

    def kernel(*refs):
        o_ref = refs[-1]
        bias_ref = refs[-2]          # (1, T*D) fused num+cat bias slab
        pos = 0

        if has_num:
            x_ref, wn_ref = refs[pos], refs[pos + 1]
            pos += 2
            # Per-feature VPU broadcast-multiply (exact f32); statically unrolled.
            # NOTE: for D not a multiple of 128 these are masked stores into the VMEM
            # output tile; the HBM writeback of the (TB, T*D) tile stays lane-dense.
            for f in range(fn):
                lo = f * d
                tok = x_ref[:, f:f + 1] * wn_ref[f:f + 1, :]           # (TB, D)
                o_ref[:, lo:lo + d] = (tok + bias_ref[:, lo:lo + d]).astype(o_ref.dtype)

        if has_cat:
            idx_ref, emb_ref = refs[pos], refs[pos + 1]
            pos += 2
            tb = idx_ref.shape[0]
            # Per-feature gather via a (TB, card8) one-hot against the un-expanded,
            # sublane-aligned table slice.  Only (TB, card8) vregs live per feature.
            # TODO(synk): for vocabularies where V*D does not fit VMEM, switch to a
            # manual DMA row-gather from HBM instead of a resident table.
            for c in range(nc):
                po, sz = pad_off[c], pad_sz[c]                         # static ints
                hot = (idx_ref[:, c:c + 1]
                       == jax.lax.broadcasted_iota(jnp.int32, (tb, sz), 1)
                       ).astype(jnp.float32)                           # (TB, card8)
                tok = jnp.dot(hot, emb_ref[po:po + sz, :],
                              preferred_element_type=jnp.float32,
                              precision=cat_precision)                 # (TB, D)
                lo = fn_d + c * d
                o_ref[:, lo:lo + d] = (tok + bias_ref[:, lo:lo + d]).astype(o_ref.dtype)

    return kernel


# ----------------------------------------------------------------------------
# One-time parameter preparation (pure, cheap transforms outside the kernel)
# ----------------------------------------------------------------------------
def prepare_feature_tokenizer(params, cat_cardinalities, d_token):
    d = int(d_token)
    prepared = {"d": d, "fn": 0, "nc": 0}
    bias_parts = []

    if "num_weight" in params:
        w = params["num_weight"].astype(jnp.float32)                   # (Fn, D), un-expanded
        prepared["wn"] = w
        prepared["fn"] = int(w.shape[0])
        bias_parts.append(params["num_bias"].astype(jnp.float32).reshape(1, -1))

    if cat_cardinalities:
        emb = params["emb_weight"].astype(jnp.float32)                 # (V, D)
        cards = [int(c) for c in cat_cardinalities]
        pad_sz = tuple(_round_up(c, 8) for c in cards)                 # sublane-aligned slices
        pad_off, acc = [], 0
        for sz in pad_sz:
            pad_off.append(acc)
            acc += sz
        # Re-pack the table so each feature's block starts on an 8-row boundary
        # (padding rows are zero and can never be selected by an in-range code).
        blocks, src = [], 0
        for card, sz in zip(cards, pad_sz):
            blk = emb[src:src + card]
            if sz > card:
                blk = jnp.concatenate([blk, jnp.zeros((sz - card, d), jnp.float32)], axis=0)
            blocks.append(blk)
            src += card
        prepared["emb"] = jnp.concatenate(blocks, axis=0)              # (sum(card8), D)
        prepared["pad_off"] = tuple(pad_off)
        prepared["pad_sz"] = pad_sz
        prepared["nc"] = len(cards)
        bias_parts.append(params["cat_bias"].astype(jnp.float32).reshape(1, -1))

    prepared["bias"] = (jnp.concatenate(bias_parts, axis=1)
                        if len(bias_parts) > 1 else bias_parts[0])     # (1, T*D)
    return prepared


# ----------------------------------------------------------------------------
# Forward wrapper
# ----------------------------------------------------------------------------
def feature_tokenizer_forward(prepared, x_num, x_cat, *, block_b: int = 1024,
                              out_dtype=jnp.float32,
                              cat_precision=jax.lax.Precision.HIGHEST):
    """FeatureTokenizer.forward: fused num+cat tokens, output (B, T, D).

    cat_precision: HIGHEST is bit-comfortable vs. the f32 gather; on v5e with
    large-cardinality features, Precision.HIGH (3-pass) is ~1e-5-exact for the
    0/1 selector and halves MXU passes on the categorical path.
    """
    has_num = x_num is not None
    has_cat = x_cat is not None
    assert has_num or has_cat
    d = prepared["d"]
    fn = prepared["fn"] if has_num else 0
    nc = prepared["nc"] if has_cat else 0
    t_d = (fn + nc) * d
    b = (x_num if has_num else x_cat).shape[0]

    # --- VMEM budgeting & batch-tile selection -------------------------------
    vmem_limit = _vmem_limit_bytes()
    const_bytes = 4 * t_d
    if has_num:
        const_bytes += 4 * fn * d
    if has_cat:
        const_bytes += 4 * prepared["emb"].shape[0] * d
    out_isz = jnp.dtype(out_dtype).itemsize
    per_row = 2 * (t_d * out_isz                                # double-buffered output tile
                   + (fn * 4 if has_num else 0)                 # double-buffered x_num tile
                   + (nc * 4 if has_cat else 0))                # double-buffered x_cat tile
    pipeline_budget = max(1 << 20, (vmem_limit - const_bytes) // 2)
    tb = min(int(block_b), max(8, (pipeline_budget // per_row) // 8 * 8))
    if b > 8:
        # Guarantee >= 2 grid steps so "parallel" can shard across v7x's 2 TensorCores.
        tb = min(tb, _round_up(-(-b // 2), 8))
    tb = max(8, tb - tb % 8)
    if tb >= b:
        tb = b                                                   # single full-batch block
    grid = (pl.cdiv(b, tb),)

    # --- inputs & BlockSpecs --------------------------------------------------
    def const_spec(shape):
        # Constant index_map: never re-DMA'd, so single-buffer it to halve its VMEM.
        return pl.BlockSpec(shape, lambda i: (0, 0), pipeline_mode=pl.Buffered(1))

    inputs, in_specs = [], []
    if has_num:
        inputs += [x_num.astype(jnp.float32), prepared["wn"]]
        in_specs += [pl.BlockSpec((tb, fn), lambda i: (i, 0)),
                     const_spec((fn, d))]
    if has_cat:
        vp = prepared["emb"].shape[0]
        inputs += [x_cat.astype(jnp.int32), prepared["emb"]]
        in_specs += [pl.BlockSpec((tb, nc), lambda i: (i, 0)),
                     const_spec((vp, d))]
    inputs.append(prepared["bias"])
    in_specs.append(const_spec((1, t_d)))

    kernel = _make_fused_kernel(fn, nc, d,
                                prepared.get("pad_off", ()),
                                prepared.get("pad_sz", ()),
                                cat_precision)

    out2d = pl.pallas_call(
        kernel,
        out_shape=jax.ShapeDtypeStruct((b, t_d), out_dtype),
        grid=grid,
        in_specs=in_specs,
        out_specs=pl.BlockSpec((tb, t_d), lambda i: (i, 0)),
        compiler_params=pltpu.CompilerParams(
            dimension_semantics=("parallel",),
            vmem_limit_bytes=vmem_limit),
    )(*inputs)
    # Metadata-only reshape of the lane-dense (B, T*D) slab back to (B, T, D).
    return out2d.reshape(b, fn + nc, d)


# ----------------------------------------------------------------------------
# Deterministic parameter init (uniform(-1/sqrt(d), 1/sqrt(d)), as in the paper)
# ----------------------------------------------------------------------------
def init_feature_tokenizer(key, num_continuous, cat_cardinalities, d_token):
    s = 1.0 / math.sqrt(d_token)
    keys = jax.random.split(key, 4)
    params = {}
    if num_continuous:
        params["num_weight"] = jax.random.uniform(
            keys[0], (num_continuous, d_token), jnp.float32, -s, s)
        params["num_bias"] = jax.random.uniform(
            keys[1], (num_continuous, d_token), jnp.float32, -s, s)
    if cat_cardinalities:
        total = sum(cat_cardinalities)
        params["emb_weight"] = jax.random.uniform(
            keys[2], (total, d_token), jnp.float32, -s, s)
        params["cat_bias"] = jax.random.uniform(
            keys[3], (len(cat_cardinalities), d_token), jnp.float32, -s, s)
        params["cat_offsets"] = jnp.cumsum(
            jnp.array([0] + list(cat_cardinalities[:-1]), dtype=jnp.int32))
    return params


# ----------------------------------------------------------------------------
# Pure-JAX reference (mirror of the PyTorch forward) for verification
# ----------------------------------------------------------------------------
def reference_forward(params, x_num, x_cat):
    outs = []
    if x_num is not None:
        outs.append(params["num_weight"][None] * x_num[..., None] + params["num_bias"][None])
    if x_cat is not None:
        idx = x_cat + params["cat_offsets"][None]
        outs.append(params["emb_weight"][idx] + params["cat_bias"][None])
    return outs[0] if len(outs) == 1 else jnp.concatenate(outs, axis=1)


if __name__ == "__main__":
    key = jax.random.PRNGKey(0)
    B = 256                       # tiled as 2 grid steps of 128 rows (>= 2 steps for v7x)
    num_continuous = 4
    cat_cardinalities = [3, 4, 5]
    d_token = 32

    k_params, k_xnum, *k_cats = jax.random.split(key, 2 + len(cat_cardinalities))
    params = init_feature_tokenizer(k_params, num_continuous, cat_cardinalities, d_token)
    prepared = prepare_feature_tokenizer(params, cat_cardinalities, d_token)

    x_num = jax.random.normal(k_xnum, (B, num_continuous), jnp.float32)
    x_cat = jnp.concatenate(
        [jax.random.randint(k, (B, 1), 0, card, dtype=jnp.int32)
         for k, card in zip(k_cats, cat_cardinalities)],
        axis=1,
    )

    out = feature_tokenizer_forward(prepared, x_num, x_cat)
    out = jax.block_until_ready(out)

    ref = reference_forward(params, x_num, x_cat)
    assert out.shape == (B, num_continuous + len(cat_cardinalities), d_token), out.shape
    # Numerical path is bit-exact f32 VPU math; categorical path is a 0/1-selector matmul
    # at HIGHEST precision (multi-pass f32), well inside 1e-4.
    assert jnp.allclose(out, ref, atol=1e-4, rtol=1e-4), float(jnp.max(jnp.abs(out - ref)))

    print("KERNEL_OK")
</pallas_src>

<mosaic_0001>
module attributes {stable_mosaic.version = 11 : i64} {
  func.func @kernel(%arg0: i32, %arg1: memref<128x4xf32, #tpu.memory_space<vmem>>, %arg2: memref<4x32xf32, #tpu.memory_space<vmem>>, %arg3: memref<128x3xi32, #tpu.memory_space<vmem>>, %arg4: memref<24x32xf32, #tpu.memory_space<vmem>>, %arg5: memref<1x224xf32, #tpu.memory_space<vmem>>, %arg6: memref<128x224xf32, #tpu.memory_space<vmem>>) attributes {dimension_semantics = [#tpu.dimension_semantics<parallel>], iteration_bounds = array<i64: 2>, scalar_prefetch = 0 : i64, scratch_operands = 0 : i64, tpu.core_type = #tpu.core_type<tc>, window_params = [{transform_indices = @transform_0, window_bounds = array<i64: 128, 4>}, {pipeline_mode = #tpu.pipeline_mode<synchronous>, transform_indices = @transform_1, window_bounds = array<i64: 4, 32>}, {transform_indices = @transform_2, window_bounds = array<i64: 128, 3>}, {pipeline_mode = #tpu.pipeline_mode<synchronous>, transform_indices = @transform_3, window_bounds = array<i64: 24, 32>}, {pipeline_mode = #tpu.pipeline_mode<synchronous>, transform_indices = @transform_4, window_bounds = array<i64: 1, 224>}, {transform_indices = @transform_5, window_bounds = array<i64: 128, 224>}]} {
    %c0 = arith.constant 0 : index
    %c0_0 = arith.constant 0 : index
    %0 = vector.load %arg1[%c0, %c0_0] : memref<128x4xf32, #tpu.memory_space<vmem>>, vector<128x1xf32>
    %c0_1 = arith.constant 0 : index
    %c0_2 = arith.constant 0 : index
    %1 = vector.load %arg2[%c0_1, %c0_2] : memref<4x32xf32, #tpu.memory_space<vmem>>, vector<1x32xf32>
    %2 = vector.broadcast %0 : vector<128x1xf32> to vector<128x32xf32>
    %3 = vector.broadcast %1 : vector<1x32xf32> to vector<128x32xf32>
    %4 = arith.mulf %2, %3 : vector<128x32xf32>
    %c0_3 = arith.constant 0 : index
    %c0_4 = arith.constant 0 : index
    %5 = vector.load %arg5[%c0_3, %c0_4] : memref<1x224xf32, #tpu.memory_space<vmem>>, vector<1x32xf32>
    %6 = vector.broadcast %5 : vector<1x32xf32> to vector<128x32xf32>
    %7 = arith.addf %4, %6 : vector<128x32xf32>
    %c0_5 = arith.constant 0 : index
    %c0_6 = arith.constant 0 : index
    %8 = vector.load %arg6[%c0_5, %c0_6] : memref<128x224xf32, #tpu.memory_space<vmem>>, vector<128x32xf32>
    tpu.vector_store %arg6[%c0_5, %c0_6], %7 {strides = array<i32>} : memref<128x224xf32, #tpu.memory_space<vmem>>, vector<128x32xf32>,
    %c0_7 = arith.constant 0 : index
    %c1 = arith.constant 1 : index
    %9 = vector.load %arg1[%c0_7, %c1] : memref<128x4xf32, #tpu.memory_space<vmem>>, vector<128x1xf32>
    %c1_8 = arith.constant 1 : index
    %c0_9 = arith.constant 0 : index
    %10 = vector.load %arg2[%c1_8, %c0_9] : memref<4x32xf32, #tpu.memory_space<vmem>>, vector<1x32xf32>
    %11 = vector.broadcast %9 : vector<128x1xf32> to vector<128x32xf32>
    %12 = vector.broadcast %10 : vector<1x32xf32> to vector<128x32xf32>
    %13 = arith.mulf %11, %12 : vector<128x32xf32>
    %c0_10 = arith.constant 0 : index
    %c32 = arith.constant 32 : index
    %14 = vector.load %arg5[%c0_10, %c32] : memref<1x224xf32, #tpu.memory_space<vmem>>, vector<1x32xf32>
    %15 = vector.broadcast %14 : vector<1x32xf32> to vector<128x32xf32>
    %16 = arith.addf %13, %15 : vector<128x32xf32>
    %c0_11 = arith.constant 0 : index
    %c32_12 = arith.constant 32 : index
    %17 = vector.load %arg6[%c0_11, %c32_12] : memref<128x224xf32, #tpu.memory_space<vmem>>, vector<128x32xf32>
    tpu.vector_store %arg6[%c0_11, %c32_12], %16 {strides = array<i32>} : memref<128x224xf32, #tpu.memory_space<vmem>>, vector<128x32xf32>,
    %c0_13 = arith.constant 0 : index
    %c2 = arith.constant 2 : index
    %18 = vector.load %arg1[%c0_13, %c2] : memref<128x4xf32, #tpu.memory_space<vmem>>, vector<128x1xf32>
    %c2_14 = arith.constant 2 : index
    %c0_15 = arith.constant 0 : index
    %19 = vector.load %arg2[%c2_14, %c0_15] : memref<4x32xf32, #tpu.memory_space<vmem>>, vector<1x32xf32>
    %20 = vector.broadcast %18 : vector<128x1xf32> to vector<128x32xf32>
    %21 = vector.broadcast %19 : vector<1x32xf32> to vector<128x32xf32>
    %22 = arith.mulf %20, %21 : vector<128x32xf32>
    %c0_16 = arith.constant 0 : index
    %c64 = arith.constant 64 : index
    %23 = vector.load %arg5[%c0_16, %c64] : memref<1x224xf32, #tpu.memory_space<vmem>>, vector<1x32xf32>
    %24 = vector.broadcast %23 : vector<1x32xf32> to vector<128x32xf32>
    %25 = arith.addf %22, %24 : vector<128x32xf32>
    %c0_17 = arith.constant 0 : index
    %c64_18 = arith.constant 64 : index
    %26 = vector.load %arg6[%c0_17, %c64_18] : memref<128x224xf32, #tpu.memory_space<vmem>>, vector<128x32xf32>
    tpu.vector_store %arg6[%c0_17, %c64_18], %25 {strides = array<i32>} : memref<128x224xf32, #tpu.memory_space<vmem>>, vector<128x32xf32>,
    %c0_19 = arith.constant 0 : index
    %c3 = arith.constant 3 : index
    %27 = vector.load %arg1[%c0_19, %c3] : memref<128x4xf32, #tpu.memory_space<vmem>>, vector<128x1xf32>
    %c3_20 = arith.constant 3 : index
    %c0_21 = arith.constant 0 : index
    %28 = vector.load %arg2[%c3_20, %c0_21] : memref<4x32xf32, #tpu.memory_space<vmem>>, vector<1x32xf32>
    %29 = vector.broadcast %27 : vector<128x1xf32> to vector<128x32xf32>
    %30 = vector.broadcast %28 : vector<1x32xf32> to vector<128x32xf32>
    %31 = arith.mulf %29, %30 : vector<128x32xf32>
    %c0_22 = arith.constant 0 : index
    %c96 = arith.constant 96 : index
    %32 = vector.load %arg5[%c0_22, %c96] : memref<1x224xf32, #tpu.memory_space<vmem>>, vector<1x32xf32>
    %33 = vector.broadcast %32 : vector<1x32xf32> to vector<128x32xf32>
    %34 = arith.addf %31, %33 : vector<128x32xf32>
    %c0_23 = arith.constant 0 : index
    %c96_24 = arith.constant 96 : index
    %35 = vector.load %arg6[%c0_23, %c96_24] : memref<128x224xf32, #tpu.memory_space<vmem>>, vector<128x32xf32>
    tpu.vector_store %arg6[%c0_23, %c96_24], %34 {strides = array<i32>} : memref<128x224xf32, #tpu.memory_space<vmem>>, vector<128x32xf32>,
    %c0_25 = arith.constant 0 : index
    %c0_26 = arith.constant 0 : index
    %36 = vector.load %arg3[%c0_25, %c0_26] : memref<128x3xi32, #tpu.memory_space<vmem>>, vector<128x1xi32>
    %37 = tpu.iota {dimensions = array<i32: 1>} : vector<128x8xi32>
    %38 = vector.broadcast %36 : vector<128x1xi32> to vector<128x8xi32>
    %39 = arith.cmpi eq, %38, %37 : vector<128x8xi32>
    %40 = arith.extui %39 : vector<128x8xi1> to vector<128x8xi32>
    %41 = arith.sitofp %40 : vector<128x8xi32> to vector<128x8xf32>
    %c0_27 = arith.constant 0 : index
    %c0_28 = arith.constant 0 : index
    %42 = vector.load %arg4[%c0_27, %c0_28] : memref<24x32xf32, #tpu.memory_space<vmem>>, vector<8x32xf32>
    %cst = arith.constant dense<0.000000e+00> : vector<128x32xf32>
    %43 = tpu.matmul %41, %42, %cst {dimension_numbers = #tpu.dot_dimension_numbers<[1], [0], [0], [1], [0, 0, 1, 1], [], []>, precision = #tpu.contract_precision<fp32>} : vector<128x8xf32>, vector<8x32xf32>, vector<128x32xf32> -> vector<128x32xf32>
    %c0_29 = arith.constant 0 : index
    %c128 = arith.constant 128 : index
    %44 = vector.load %arg5[%c0_29, %c128] : memref<1x224xf32, #tpu.memory_space<vmem>>, vector<1x32xf32>
    %45 = vector.broadcast %44 : vector<1x32xf32> to vector<128x32xf32>
    %46 = arith.addf %43, %45 : vector<128x32xf32>
    %c0_30 = arith.constant 0 : index
    %c128_31 = arith.constant 128 : index
    %47 = vector.load %arg6[%c0_30, %c128_31] : memref<128x224xf32, #tpu.memory_space<vmem>>, vector<128x32xf32>
    tpu.vector_store %arg6[%c0_30, %c128_31], %46 {strides = array<i32>} : memref<128x224xf32, #tpu.memory_space<vmem>>, vector<128x32xf32>,
    %c0_32 = arith.constant 0 : index
    %c1_33 = arith.constant 1 : index
    %48 = vector.load %arg3[%c0_32, %c1_33] : memref<128x3xi32, #tpu.memory_space<vmem>>, vector<128x1xi32>
    %49 = tpu.iota {dimensions = array<i32: 1>} : vector<128x8xi32>
    %50 = vector.broadcast %48 : vector<128x1xi32> to vector<128x8xi32>
    %51 = arith.cmpi eq, %50, %49 : vector<128x8xi32>
    %52 = arith.extui %51 : vector<128x8xi1> to vector<128x8xi32>
    %53 = arith.sitofp %52 : vector<128x8xi32> to vector<128x8xf32>
    %c8 = arith.constant 8 : index
    %c0_34 = arith.constant 0 : index
    %54 = vector.load %arg4[%c8, %c0_34] : memref<24x32xf32, #tpu.memory_space<vmem>>, vector<8x32xf32>
    %cst_35 = arith.constant dense<0.000000e+00> : vector<128x32xf32>
    %55 = tpu.matmul %53, %54, %cst_35 {dimension_numbers = #tpu.dot_dimension_numbers<[1], [0], [0], [1], [0, 0, 1, 1], [], []>, precision = #tpu.contract_precision<fp32>} : vector<128x8xf32>, vector<8x32xf32>, vector<128x32xf32> -> vector<128x32xf32>
    %c0_36 = arith.constant 0 : index
    %c160 = arith.constant 160 : index
    %56 = vector.load %arg5[%c0_36, %c160] : memref<1x224xf32, #tpu.memory_space<vmem>>, vector<1x32xf32>
    %57 = vector.broadcast %56 : vector<1x32xf32> to vector<128x32xf32>
    %58 = arith.addf %55, %57 : vector<128x32xf32>
    %c0_37 = arith.constant 0 : index
    %c160_38 = arith.constant 160 : index
    %59 = vector.load %arg6[%c0_37, %c160_38] : memref<128x224xf32, #tpu.memory_space<vmem>>, vector<128x32xf32>
    tpu.vector_store %arg6[%c0_37, %c160_38], %58 {strides = array<i32>} : memref<128x224xf32, #tpu.memory_space<vmem>>, vector<128x32xf32>,
    %c0_39 = arith.constant 0 : index
    %c2_40 = arith.constant 2 : index
    %60 = vector.load %arg3[%c0_39, %c2_40] : memref<128x3xi32, #tpu.memory_space<vmem>>, vector<128x1xi32>
    %61 = tpu.iota {dimensions = array<i32: 1>} : vector<128x8xi32>
    %62 = vector.broadcast %60 : vector<128x1xi32> to vector<128x8xi32>
    %63 = arith.cmpi eq, %62, %61 : vector<128x8xi32>
    %64 = arith.extui %63 : vector<128x8xi1> to vector<128x8xi32>
    %65 = arith.sitofp %64 : vector<128x8xi32> to vector<128x8xf32>
    %c16 = arith.constant 16 : index
    %c0_41 = arith.constant 0 : index
    %66 = vector.load %arg4[%c16, %c0_41] : memref<24x32xf32, #tpu.memory_space<vmem>>, vector<8x32xf32>
    %cst_42 = arith.constant dense<0.000000e+00> : vector<128x32xf32>
    %67 = tpu.matmul %65, %66, %cst_42 {dimension_numbers = #tpu.dot_dimension_numbers<[1], [0], [0], [1], [0, 0, 1, 1], [], []>, precision = #tpu.contract_precision<fp32>} : vector<128x8xf32>, vector<8x32xf32>, vector<128x32xf32> -> vector<128x32xf32>
    %c0_43 = arith.constant 0 : index
    %c192 = arith.constant 192 : index
    %68 = vector.load %arg5[%c0_43, %c192] : memref<1x224xf32, #tpu.memory_space<vmem>>, vector<1x32xf32>
    %69 = vector.broadcast %68 : vector<1x32xf32> to vector<128x32xf32>
    %70 = arith.addf %67, %69 : vector<128x32xf32>
    %c0_44 = arith.constant 0 : index
    %c192_45 = arith.constant 192 : index
    %71 = vector.load %arg6[%c0_44, %c192_45] : memref<128x224xf32, #tpu.memory_space<vmem>>, vector<128x32xf32>
    tpu.vector_store %arg6[%c0_44, %c192_45], %70 {strides = array<i32>} : memref<128x224xf32, #tpu.memory_space<vmem>>, vector<128x32xf32>,
    return
  }
  func.func @transform_0(%arg0: i32) -> (i32, i32) {
    %c0_i32 = arith.constant 0 : i32
    %c0_i32_0 = arith.constant 0 : i32
    return %arg0, %c0_i32 : i32, i32
  }
  func.func @transform_1(%arg0: i32) -> (i32, i32) {
    %c0_i32 = arith.constant 0 : i32
    %c0_i32_0 = arith.constant 0 : i32
    %c0_i32_1 = arith.constant 0 : i32
    return %c0_i32, %c0_i32_0 : i32, i32
  }
  func.func @transform_2(%arg0: i32) -> (i32, i32) {
    %c0_i32 = arith.constant 0 : i32
    %c0_i32_0 = arith.constant 0 : i32
    return %arg0, %c0_i32 : i32, i32
  }
  func.func @transform_3(%arg0: i32) -> (i32, i32) {
    %c0_i32 = arith.constant 0 : i32
    %c0_i32_0 = arith.constant 0 : i32
    %c0_i32_1 = arith.constant 0 : i32
    return %c0_i32, %c0_i32_0 : i32, i32
  }
  func.func @transform_4(%arg0: i32) -> (i32, i32) {
    %c0_i32 = arith.constant 0 : i32
    %c0_i32_0 = arith.constant 0 : i32
    %c0_i32_1 = arith.constant 0 : i32
    return %c0_i32, %c0_i32_0 : i32, i32
  }
  func.func @transform_5(%arg0: i32) -> (i32, i32) {
    %c0_i32 = arith.constant 0 : i32
    %c0_i32_0 = arith.constant 0 : i32
    return %arg0, %c0_i32 : i32, i32
  }
}

</mosaic_0001>

<bundles_post_ra>
// kernel: tpu_custom_call.1
= control target key start
LH: loop header
LB: loop body
LE: loop exit
PB: predicated region body
PF: predicated region fallthrough
CT: control target
= control target key end

     0   :  { %s6177_s18 = smov 0   ;;  %s8975_s0 = inlined_call_operand.vmem [shape: f32[256,4], index: 0, kind: input, shape index: {}]   ;;  %s8976_s1 = inlined_call_operand.vmem [shape: f32[4,32], index: 1, kind: input, shape index: {}]   ;;  %s8977_s2 = inlined_call_operand.vmem [shape: s32[256,3], index: 2, kind: input, shape index: {}]   ;;  %s8978_s3 = inlined_call_operand.vmem [shape: f32[24,32], index: 3, kind: input, shape index: {}]   ;;  %s8979_s4 = inlined_call_operand.vmem [shape: f32[1,224], index: 4, kind: input, shape index: {}]   ;;  %s8980_s5 = inlined_call_operand.vmem [shape: f32[256,224], index: 5, kind: output, shape index: {}]  }
   0x1 LB: > { %s5108_s19 = sadd.s32 4294967295, %s6137_s18   ;;  %p5112_p0 = scmp.ge.s32.totalorder %s6137_s18, 1  ;;  %s6137_s18 = sphi %s6177_s18, %s15_s18  }
   0x2   : > { %p199_p1 = scmp.lt.s32.totalorder %s6137_s18, 3 }
   0x4   : > { %p200_p2 = pnand %p5112_p0, %p199_p1 }
   0x6   : > { %203 = sbr.rel (%p200_p2) target bundleno = 909 (0x38d), region = 40 }
   0xb   : > { %s5113_s20 = sshll.u32 %s5108_s19, 4  ;;  %v1192_v0 = vld [vmem:[%s8978_s3] sm:$0xff]  ;;  %v6139_v1 = vmov 0   ;;  %v6140_v24 = vmov 1   ;;  %v8990_v39 = vmov 2   ;;  %v1094_v41 = vlaneseq  ;;  %s6143_s15 = smov 96  }
   0xc   : > { %6117 = vset.pattern.permute.xlu1 %v6139_v1  ;;  %6116 = vset.pattern.permute.xlu0 %v6139_v1  ;;  %p234_p3 = scmp.lt.s32.totalorder %s5113_s20, 31  ;;  %v6190_v2 = vand.u32 4294901760, %v1192_v0  ;;  %vm1200_vm0 = vcmask 64512   ;;  %v8981_v45 = vmov 0.0   ;;  %s6144_s21 = smov 32  }
   0xd   : > { %v6380_v42 = vand.u32 127, %v1094_v41  ;;  %s6145_s24 = smov 64  }
   0xe   : > { %s9329_s20 = smov (!%p234_p3, %s5113_s20), 31  ;;  %v6195_v3 = vsub.f32 %v1192_v0, %v6190_v2  ;;  %5632 = vmatprep.subr.mxu0 %v6190_v2 }
   0xf   : > { %5633 = vmatpush3.msra.mxu0 %v6190_v2  ;;  %s5114_s23 = sshll.u32 %s9329_s20, 3  ;;  %s5325_s9 = sshll.u32 %s9329_s20, 4 }
  0x10   : > { %v6201_v4 = vand.u32 4294901760, %v6195_v3  ;;  %5684 = vmatprep.subr.mxu0 %v6195_v3  ;;  %s6209_s26 = scalar_lea.vmem %s8977_s2, %s5114_s23  ;;  %s6281_s29 = scalar_lea.vmem %s8975_s0, %s5114_s23 }
  0x11   : > { %v6212_v5 = vld [vmem:[%s6209_s26 + $0x10] sm:$0xff]  ;;  %v6215_v6 = vld [vmem:[%s6209_s26] sm:$0xff]  ;;  %v6222_v8 = vld [vmem:[%s6209_s26 + $0x18] sm:$0xff]  ;;  %s6643_s14 = scalar_lea.vmem %s8980_s5, %s5325_s9 }
  0x12   : > { %v1509_v7 = vsub.f32 %v6195_v3, %v6201_v4  ;;  %1103 = vperm.xlu1 %6117, %v6212_v5   ;;  %1097 = vperm.xlu0 %6116, %v6215_v6   ;;  %v6225_v9 = vld [vmem:[%s6209_s26 + $0x8] sm:$0xff]  ;;  %v6233_v12 = vld [vmem:[%s6209_s26 + $0x20] sm:$0xff]  ;;  %v6239_v13 = vld [vmem:[%s6209_s26 + $0x38] sm:$0xff] }
  0x13   : > { %v6230_v11 = vld [vmem:[%s6209_s26 + $0x28] sm:$0xff]  ;;  %v6242_v14 = vld [vmem:[%s6209_s26 + $0x30] sm:$0xff]  ;;  %v6250_v16 = vld [vmem:[%s6209_s26 + $0x40] sm:$0xff] }
  0x14   : > { %v1510_v10 = vand.u32 4294901760, %v1509_v7  ;;  %v6247_v15 = vld [vmem:[%s6209_s26 + $0x48] sm:$0xff]  ;;  %v6255_v17 = vld [vmem:[%s6209_s26 + $0x58] sm:$0xff]  ;;  %v6258_v18 = vld [vmem:[%s6209_s26 + $0x50] sm:$0xff] }
  0x15   : > { %v6263_v19 = vld [vmem:[%s6209_s26 + $0x68] sm:$0xff]  ;;  %v6266_v20 = vld [vmem:[%s6209_s26 + $0x60] sm:$0xff]  ;;  %v6271_v21 = vld [vmem:[%s6209_s26 + $0x78] sm:$0xff] }
  0x16   : > { %5658 = vmatprep.subr.mxu1 %v1510_v10  ;;  %1106 = vperm.xlu1 %6117, %v6222_v8   ;;  %v6274_v22 = vld [vmem:[%s6209_s26 + $0x70] sm:$0xff]  ;;  %v6286_v23 = vld [vmem:[%s6281_s29 + $0x8] sm:$0xff]  ;;  %v6291_v25 = vld [vmem:[%s6281_s29 + $0x18] sm:$0xff] }
  0x17   : > { %1100 = vperm.xlu0 %6116, %v6225_v9   ;;  %5659 = vmatpush3.msra.mxu1 %v1510_v10  ;;  %v6296_v26 = vld [vmem:[%s6281_s29 + $0x28] sm:$0xff]  ;;  %v6301_v27 = vld [vmem:[%s6281_s29 + $0x38] sm:$0xff]  ;;  %v252_v28 = vld [vmem:[%s6281_s29] sm:$0xff] }
  0x18   : > { %5710 = vmatprep.subr.mxu1 %v6190_v2  ;;  %v6317_v29 = vld [vmem:[%s6281_s29 + $0x10] sm:$0xff]  ;;  %v6322_v30 = vld [vmem:[%s6281_s29 + $0x20] sm:$0xff]  ;;  %v6337_v33 = vld [vmem:[%s6281_s29 + $0x48] sm:$0xff] }
  0x19   : > { %v6327_v31 = vld [vmem:[%s6281_s29 + $0x30] sm:$0xff]  ;;  %v6332_v32 = vld [vmem:[%s6281_s29 + $0x40] sm:$0xff]  ;;  %v6351_v36 = vld [vmem:[%s6281_s29 + $0x58] sm:$0xff] }
  0x1a   : > { %1112 = vperm.xlu1 %6117, %v6230_v11   ;;  %v6342_v34 = vld [vmem:[%s6281_s29 + $0x50] sm:$0xff]  ;;  %v6345_v35 = vld [vmem:[%s6281_s29 + $0x60] sm:$0xff]  ;;  %v6359_v38 = vld [vmem:[%s6281_s29 + $0x68] sm:$0xff] }
  0x1b   : > { %1109 = vperm.xlu0 %6116, %v6233_v12   ;;  %v6354_v37 = vld [vmem:[%s6281_s29 + $0x70] sm:$0xff]  ;;  %v6364_v40 = vld [vmem:[%s6281_s29 + $0x78] sm:$0xff] }
  0x1e   : > { %1118 = vperm.xlu1 %6117, %v6239_v13  }
  0x1f   : > { %1115 = vperm.xlu0 %6116, %v6242_v14  }
  0x22   : > { %1124 = vperm.xlu1 %6117, %v6247_v15  }
  0x23   : > { %1121 = vperm.xlu0 %6116, %v6250_v16  }
  0x26   : > { %1130 = vperm.xlu1 %6117, %v6255_v17  }
  0x27   : > { %1127 = vperm.xlu0 %6116, %v6258_v18  }
  0x2a   : > { %1136 = vperm.xlu1 %6117, %v6263_v19  }
  0x2b   : > { %1133 = vperm.xlu0 %6116, %v6266_v20  }
  0x2e   : > { %1142 = vperm.xlu1 %6117, %v6271_v21  }
  0x2f   : > { %1139 = vperm.xlu0 %6116, %v6274_v22  }
  0x32   : > { %276 = vperm.xlu1 %6117, %v6286_v23  }
  0x33   : > { %6119 = vset.pattern.permute.xlu0 %v6140_v24 }
  0x34   : > { %2376 = vperm.xlu0 %6119, %v6225_v9  }
  0x36   : > { %286 = vperm.xlu1 %6117, %v6291_v25  }
  0x38   : > { %2385 = vperm.xlu0 %6119, %v6233_v12  }
  0x3a   : > { %296 = vperm.xlu1 %6117, %v6296_v26  }
  0x3c   : > { %2391 = vperm.xlu0 %6119, %v6242_v14  }
  0x3e   : > { %306 = vperm.xlu1 %6117, %v6301_v27  }
  0x40   : > { %2397 = vperm.xlu0 %6119, %v6250_v16  }
  0x42   : > { %6118 = vset.pattern.permute.xlu1 %v6140_v24 }
  0x43   : > { %2373 = vperm.xlu1 %6118, %v6215_v6  }
  0x44   : > { %2403 = vperm.xlu0 %6119, %v6258_v18  }
  0x47   : > { %2379 = vperm.xlu1 %6118, %v6212_v5  }
  0x48   : > { %2409 = vperm.xlu0 %6119, %v6266_v20  }
  0x4b   : > { %2382 = vperm.xlu1 %6118, %v6222_v8  }
  0x4c   : > { %2415 = vperm.xlu0 %6119, %v6274_v22  }
  0x4f   : > { %2388 = vperm.xlu1 %6118, %v6230_v11  }
  0x50   : > { %6120 = vset.pattern.permute.xlu0 %v6139_v1 }
  0x51   : > { %271 = vperm.xlu0 %6120, %v252_v28  }
  0x53   : > { %2394 = vperm.xlu1 %6118, %v6239_v13  }
  0x55   : > { %281 = vperm.xlu0 %6120, %v6317_v29  }
  0x57   : > { %2400 = vperm.xlu1 %6118, %v6247_v15  }
  0x59   : > { %291 = vperm.xlu0 %6120, %v6322_v30  }
  0x5b   : > { %2406 = vperm.xlu1 %6118, %v6255_v17  }
  0x5d   : > { %301 = vperm.xlu0 %6120, %v6327_v31  }
  0x5f   : > { %2412 = vperm.xlu1 %6118, %v6263_v19  }
  0x61   : > { %311 = vperm.xlu0 %6120, %v6332_v32  }
  0x63   : > { %2418 = vperm.xlu1 %6118, %v6271_v21  }
  0x65   : > { %316 = vperm.xlu0 %6120, %v6337_v33  }
  0x67   : > { %6121 = vset.pattern.permute.xlu1 %v6139_v1 }
  0x68   : > { %321 = vperm.xlu1 %6121, %v6342_v34  }
  0x69   : > { %331 = vperm.xlu0 %6120, %v6345_v35  }
  0x6c   : > { %326 = vperm.xlu1 %6121, %v6351_v36  }
  0x6d   : > { %341 = vperm.xlu0 %6120, %v6354_v37  }
  0x70   : > { %336 = vperm.xlu1 %6121, %v6359_v38  }
  0x71   : > { %6123 = vset.pattern.permute.xlu0 %v8990_v39 }
  0x72   : > { %3720 = vperm.xlu0 %6123, %v6212_v5  }
  0x74   : > { %346 = vperm.xlu1 %6121, %v6364_v40  }
  0x76   : > { %3729 = vperm.xlu0 %6123, %v6230_v11  }
  0x78   : > { %6122 = vset.pattern.permute.xlu1 %v8990_v39 }
  0x79   : > { %3714 = vperm.xlu1 %6122, %v6215_v6  }
  0x7a   : > { %3735 = vperm.xlu0 %6123, %v6239_v13  }
  0x7d   : > { %3717 = vperm.xlu1 %6122, %v6225_v9  }
  0x7e   : > { %3741 = vperm.xlu0 %6123, %v6247_v15  }
  0x81   : > { %3723 = vperm.xlu1 %6122, %v6222_v8  }
  0x82   : > { %3747 = vperm.xlu0 %6123, %v6255_v17  }
  0x85   : > { %3726 = vperm.xlu1 %6122, %v6233_v12  }
  0x86   : > { %3753 = vperm.xlu0 %6123, %v6263_v19  }
  0x89   : > { %3732 = vperm.xlu1 %6122, %v6242_v14  }
  0x8a   : > { %3759 = vperm.xlu0 %6123, %v6271_v21  }
  0x8d   : > { %v1104_v43 = vpop.permute.xlu1 %1103  ;;  %v1098_v44 = vpop.permute.xlu0 %1097  ;;  %3738 = vperm.xlu1 %6122, %v6250_v16  }
  0x8e   : > { %6124 = vset.pattern.permute.xlu0 %v6140_v24  ;;  %vm1146_vm1 = vcmp.eq.s32.totalorder %v1104_v43, %v6380_v42  ;;  %vm1144_vm2 = vcmp.eq.s32.totalorder %v1098_v44, %v6380_v42 }
  0x8f   : > { %428 = vperm.xlu0 %6124, %v252_v28   ;;  %v6387_v46 = vsel %vm1146_vm1, 1.0, %v8981_v45  ;;  %v6390_v47 = vsel %vm1144_vm2, 1.0, %v8981_v45  ;;  %vm392_vm2 = vcmask 261120  }
  0x90   : > { %v1208_v48 = vsel %vm1200_vm0, %v6387_v46, 0  ;;  %5660 = vmatprep.mubr.msk.f32.mxu1 %vm1200_vm0, %v6390_v47  ;;  %v1202_v49 = vsel %vm1200_vm0, %v6390_v47, 0 }
  0x91   : > { %v6398_v50 = vsub.f32 %v1208_v48, %v1208_v48  ;;  %v1107_v51 = vpop.permute.xlu1 %1106  ;;  %3744 = vperm.xlu1 %6122, %v6258_v18   ;;  %v6401_v53 = vsub.f32 %v1202_v49, %v1202_v49 }
  0x92   : > { %v1101_v52 = vpop.permute.xlu0 %1100  ;;  %vm1147_vm3 = vcmp.eq.s32.totalorder %v1107_v51, %v6380_v42 }
  0x93   : > { %vm1145_vm4 = vcmp.eq.s32.totalorder %v1101_v52, %v6380_v42  ;;  %438 = vperm.xlu0 %6124, %v6317_v29   ;;  %v6407_v54 = vsel %vm1147_vm3, 1.0, %v8981_v45  ;;  %v1317_v56 = vand.u32 4294901760, %v6401_v53  ;;  %v1337_v59 = vand.u32 4294901760, %v6398_v50 }
  0x94   : > { %v6410_v55 = vsel %vm1145_vm4, 1.0, %v8981_v45  ;;  %v1211_v57 = vsel %vm1200_vm0, %v6407_v54, 0 }
  0x95   : > { %v1205_v58 = vsel %vm1200_vm0, %v6410_v55, 0  ;;  %5661 = vmatmul.mubr.msk.f32.vlgmr.msra.gmra.mxu1 %vm1200_vm0, %v6410_v55  ;;  %v6420_v60 = vsub.f32 %v1211_v57, %v1211_v57  ;;  %v1113_v62 = vpop.permute.xlu1 %1112  ;;  %3750 = vperm.xlu1 %6122, %v6266_v20   ;;  %v1318_v0 = vsub.f32 %v6401_v53, %v1317_v56  ;;  %v1338_v10 = vsub.f32 %v6398_v50, %v1337_v59 }
  0x96   : > { %v6422_v61 = vsub.f32 %v1205_v58, %v1205_v58  ;;  %5663 = vmatprep.mubr.msk.f32.mxu1 %vm1200_vm0, %v6387_v46  ;;  %v1110_v63 = vpop.permute.xlu0 %1109  ;;  %vm1149_vm5 = vcmp.eq.s32.totalorder %v1113_v62, %v6380_v42  ;;  %5711 = vmatpush3.msra.mxu1 %v6190_v2 }
  0x97   : > { %vm1148_vm6 = vcmp.eq.s32.totalorder %v1110_v63, %v6380_v42  ;;  %453 = vperm.xlu0 %6124, %v6296_v26   ;;  %v6435_v1 = vsel %vm1149_vm5, 1.0, %v8981_v45  ;;  %v1319_v6 = vand.u32 4294901760, %v1318_v0  ;;  %5762 = vmatprep.subr.mxu1 %v6190_v2  ;;  %v1347_v11 = vand.u32 4294901760, %v6420_v60 }
  0x98   : > { %v6438_v5 = vsel %vm1148_vm6, 1.0, %v8981_v45  ;;  %v1327_v7 = vand.u32 4294901760, %v6422_v61  ;;  %v1217_v8 = vsel %vm1200_vm0, %v6435_v1, 0  ;;  %v1339_v28 = vand.u32 4294901760, %v1338_v10  ;;  %v2468_v10 = vld [vmem:[%s8978_s3 + $0x8] sm:$0xff] }
  0x99   : > { %5664 = vmatmul.mubr.msk.f32.gmra.mxu1 %vm1200_vm0, %v6407_v54  ;;  %v1214_v9 = vsel %vm1200_vm0, %v6438_v5, 0  ;;  %v6452_v12 = vsub.f32 %v1217_v8, %v1217_v8  ;;  %v1119_v14 = vpop.permute.xlu1 %1118  ;;  %3756 = vperm.xlu1 %6122, %v6274_v22   ;;  %v1348_v17 = vsub.f32 %v6420_v60, %v1347_v11 }
  0x9a   : > { %v6454_v13 = vsub.f32 %v1214_v9, %v1214_v9  ;;  %5666 = vmatprep.mubr.msk.f32.mxu1 %vm1200_vm0, %v6438_v5  ;;  %v1116_v15 = vpop.permute.xlu0 %1115  ;;  %v1328_v16 = vsub.f32 %v6422_v61, %v1327_v7  ;;  %vm1151_vm7 = vcmp.eq.s32.totalorder %v1119_v14, %v6380_v42  ;;  %5634 = vmatprep.mubr.f32.mxu0 %v1319_v6 }
  0x9b   : > { %vm1150_vm8 = vcmp.eq.s32.totalorder %v1116_v15, %v6380_v42  ;;  %463 = vperm.xlu0 %6124, %v6301_v27   ;;  %v6469_v18 = vsel %vm1151_vm7, 1.0, %v8981_v45  ;;  %v1367_v27 = vand.u32 4294901760, %v6452_v12  ;;  %v1349_v49 = vand.u32 4294901760, %v1348_v17 }
  0x9c   : > { %v6472_v19 = vsel %vm1150_vm8, 1.0, %v8981_v45  ;;  %v1329_v20 = vand.u32 4294901760, %v1328_v16  ;;  %v1357_v21 = vand.u32 4294901760, %v6454_v13  ;;  %v1223_v22 = vsel %vm1200_vm0, %v6469_v18, 0 }
  0x9d   : > { %5667 = vmatmul.mubr.msk.f32.gmra.mxu1 %vm1200_vm0, %v6435_v1  ;;  %v1220_v26 = vsel %vm1200_vm0, %v6472_v19, 0  ;;  %v6482_v29 = vsub.f32 %v1223_v22, %v1223_v22  ;;  %v1125_v43 = vpop.permute.xlu1 %1124  ;;  %6125 = vset.pattern.permute.xlu1 %v6140_v24  ;;  %v1368_v51 = vsub.f32 %v6452_v12, %v1367_v27 }
  0x9e   : > { %v6484_v41 = vsub.f32 %v1220_v26, %v1220_v26  ;;  %5635 = vmatmul.mubr.f32.vlgmr.msra.gmra.mxu0 %v1329_v20  ;;  %v1122_v44 = vpop.permute.xlu0 %1121  ;;  %v1358_v48 = vsub.f32 %v6454_v13, %v1357_v21  ;;  %vm1153_vm9 = vcmp.eq.s32.totalorder %v1125_v43, %v6380_v42  ;;  %433 = vperm.xlu1 %6125, %v6286_v23  }
  0x9f   : > { %5637 = vmatprep.mubr.f32.mxu0 %v1339_v28  ;;  %vm1152_vm10 = vcmp.eq.s32.totalorder %v1122_v44, %v6380_v42  ;;  %v6497_v52 = vsel %vm1153_vm9, 1.0, %v8981_v45  ;;  %5669 = vmatprep.mubr.msk.f32.mxu1 %vm1200_vm0, %v6472_v19  ;;  %v8989_v63 = vand.u32 4294901760, %v6482_v29  ;;  %v6548_v28 = vand.u32 4294901760, %v2468_v10 }
  0xa0   : > { %v6502_v24 = vsel %vm1152_vm10, 1.0, %v8981_v45  ;;  %v1359_v57 = vand.u32 4294901760, %v1358_v48  ;;  %v1377_v58 = vand.u32 4294901760, %v6484_v41  ;;  %473 = vperm.xlu0 %6124, %v6337_v33   ;;  %v1229_v23 = vsel %vm1200_vm0, %v6497_v52, 0  ;;  %5685 = vmatpush3.msra.mxu0 %v6195_v3 }
  0xa1   : > { %5670 = vmatmul.mubr.msk.f32.gmra.mxu1 %vm1200_vm0, %v6469_v18  ;;  %v1226_v62 = vsel %vm1200_vm0, %v6502_v24, 0  ;;  %v6514_v0 = vsub.f32 %v1229_v23, %v1229_v23  ;;  %v1131_v8 = vpop.permute.xlu1 %1130  ;;  %v1369_v3 = vand.u32 4294901760, %v1368_v51  ;;  %v1388_v14 = vsub.f32 %v6482_v29, %v8989_v63  ;;  %5736 = vmatprep.subr.mxu0 %v6201_v4 }
  0xa2   : > { %v6516_v6 = vsub.f32 %v1226_v62, %v1226_v62  ;;  %5638 = vmatmul.mubr.f32.gmra.mxu0 %v1349_v49  ;;  %5672 = vmatprep.mubr.msk.f32.mxu1 %vm1200_vm0, %v6502_v24  ;;  %v1128_v33 = vpop.permute.xlu0 %1127  ;;  %v1378_v9 = vsub.f32 %v6484_v41, %v1377_v58  ;;  %vm1155_vm11 = vcmp.eq.s32.totalorder %v1131_v8, %v6380_v42 }
  0xa3   : > { %443 = vperm.xlu1 %6125, %v6291_v25   ;;  %5640 = vmatprep.mubr.f32.mxu0 %v1359_v57  ;;  %vm1154_vm12 = vcmp.eq.s32.totalorder %v1128_v33, %v6380_v42  ;;  %v6533_v15 = vsel %vm1155_vm11, 1.0, %v8981_v45  ;;  %v8985_v26 = vand.u32 4294901760, %v6514_v0  ;;  %v1389_v51 = vand.u32 4294901760, %v1388_v14 }
  0xa4   : > { %v6536_v16 = vsel %vm1154_vm12, 1.0, %v8981_v45  ;;  %v1379_v17 = vand.u32 4294901760, %v1378_v9  ;;  %v8988_v20 = vand.u32 4294901760, %v6516_v6  ;;  %483 = vperm.xlu0 %6124, %v6351_v36   ;;  %v1235_v25 = vsel %vm1200_vm0, %v6533_v15, 0 }
  0xa5   : > { %5673 = vmatmul.mubr.msk.f32.gmra.mxu1 %vm1200_vm0, %v6497_v52  ;;  %v1232_v22 = vsel %vm1200_vm0, %v6536_v16, 0  ;;  %v6550_v43 = vsub.f32 %v1235_v25, %v1235_v25  ;;  %v1137_v36 = vpop.permute.xlu1 %1136  ;;  %v1408_v57 = vsub.f32 %v6514_v0, %v8985_v26  ;;  %v6581_v14 = vsub.f32 %v2468_v10, %v6548_v28 }
  0xa6   : > { %v6552_v44 = vsub.f32 %v1232_v22, %v1232_v22  ;;  %5641 = vmatmul.mubr.f32.gmra.mxu0 %v1369_v3  ;;  %5675 = vmatprep.mubr.msk.f32.mxu1 %vm1200_vm0, %v6536_v16  ;;  %v1134_v48 = vpop.permute.xlu0 %1133  ;;  %v1398_v49 = vsub.f32 %v6516_v6, %v8988_v20  ;;  %vm1157_vm13 = vcmp.eq.s32.totalorder %v1137_v36, %v6380_v42 }
  0xa7   : > { %448 = vperm.xlu1 %6125, %v6322_v30   ;;  %5643 = vmatprep.mubr.f32.mxu0 %v1379_v17  ;;  %vm1156_vm14 = vcmp.eq.s32.totalorder %v1134_v48, %v6380_v42  ;;  %v6566_v23 = vsel %vm1157_vm13, 1.0, %v8981_v45  ;;  %v8983_v3 = vand.u32 4294901760, %v6550_v43  ;;  %v1409_v10 = vand.u32 4294901760, %v1408_v57 }
  0xa8   : > { %v6569_v62 = vsel %vm1156_vm14, 1.0, %v8981_v45  ;;  %v1399_v8 = vand.u32 4294901760, %v1398_v49  ;;  %v8984_v33 = vand.u32 4294901760, %v6552_v44  ;;  %493 = vperm.xlu0 %6124, %v6359_v38   ;;  %v1241_v30 = vsel %vm1200_vm0, %v6566_v23, 0 }
  0xa9   : > { %5676 = vmatmul.mubr.msk.f32.gmra.mxu1 %vm1200_vm0, %v6533_v15  ;;  %v1238_v9 = vsel %vm1200_vm0, %v6569_v62, 0  ;;  %v6583_v17 = vsub.f32 %v1241_v30, %v1241_v30  ;;  %v1143_v22 = vpop.permute.xlu1 %1142  ;;  %v1428_v48 = vsub.f32 %v6550_v43, %v8983_v3  ;;  %v6607_v30 = vld [vmem:[%s8976_s1] ss:$0 sm:$0xff] }
  0xaa   : > { %v6585_v25 = vsub.f32 %v1238_v9, %v1238_v9  ;;  %5644 = vmatmul.mubr.f32.gmra.mxu0 %v1389_v51  ;;  %5678 = vmatprep.mubr.msk.f32.mxu1 %vm1200_vm0, %v6569_v62  ;;  %v1140_v38 = vpop.permute.xlu0 %1139  ;;  %v1418_v36 = vsub.f32 %v6552_v44, %v8984_v33  ;;  %vm1159_vm15 = vcmp.eq.s32.totalorder %v1143_v22, %v6380_v42 }
  0xab   : > { %458 = vperm.xlu1 %6125, %v6327_v31   ;;  %5646 = vmatprep.mubr.f32.mxu0 %v1399_v8  ;;  %vm1158_vm1 = vcmp.eq.s32.totalorder %v1140_v38, %v6380_v42  ;;  %v6599_v49 = vsel %vm1159_vm15, 1.0, %v8981_v45  ;;  %v8987_v22 = vand.u32 4294901760, %v6583_v17  ;;  %v6620_v38 = vand.u32 4294901760, %v6581_v14 }
  0xac   : > { %v6602_v51 = vsel %vm1158_vm1, 1.0, %v8981_v45  ;;  %v1419_v31 = vand.u32 4294901760, %v1418_v36  ;;  %v8986_v8 = vand.u32 4294901760, %v6585_v25  ;;  %503 = vperm.xlu0 %6124, %v6364_v40   ;;  %v1247_v57 = vsel %vm1200_vm0, %v6599_v49, 0  ;;  %v6629_v40 = vld [vmem:[%s8979_s4] ss:$0 sm:$0xff] }
  0xad   : > { %5679 = vmatmul.mubr.msk.f32.gmra.mxu1 %vm1200_vm0, %v6566_v23  ;;  %v1244_v9 = vsel %vm1200_vm0, %v6602_v51, 0  ;;  %v6622_v36 = vsub.f32 %v1247_v57, %v1247_v57  ;;  %v277_v3 = vpop.permute.xlu1 %276  ;;  %v1429_v57 = vand.u32 4294901760, %v1428_v48 }
  0xae   : > { %v6624_v45 = vsub.f32 %v1244_v9, %v1244_v9  ;;  %5647 = vmatmul.mubr.f32.gmra.mxu0 %v1409_v10  ;;  %5681 = vmatprep.mubr.msk.f32.mxu1 %vm1200_vm0, %v6602_v51  ;;  %v1438_v33 = vsub.f32 %v6585_v25, %v8986_v8  ;;  %v354_v26 = vmul.f32 %v6607_v30, %v277_v3 }
  0xaf   : > { %468 = vperm.xlu1 %6125, %v6332_v32   ;;  %5649 = vmatprep.mubr.f32.mxu0 %v1419_v31  ;;  %v6638_v10 = vpop.permute.xlu0 %2376  ;;  %v1448_v8 = vsub.f32 %v6583_v17, %v8987_v22  ;;  %v1467_v32 = vand.u32 4294901760, %v6622_v36  ;;  %v2786_v31 = vsub.f32 %v6581_v14, %v6620_v38 }
  0xb0   : > { %v1439_v9 = vand.u32 4294901760, %v1438_v33  ;;  %v1457_v3 = vand.u32 4294901760, %v6624_v45  ;;  %6126 = vset.pattern.permute.xlu0 %v8990_v39  ;;  %v377_v48 = vadd.f32 %v6629_v40, %v354_v26  ;;  %vm2421_vm4 = vcmp.eq.s32.totalorder %v6638_v10, %v6380_v42 }
  0xb1   : > { %5682 = vmatmul.mubr.msk.f32.gmra.mxu1 %vm1200_vm0, %v6599_v49  ;;  %v287_v33 = vpop.permute.xlu1 %286  ;;  %v1449_v63 = vand.u32 4294901760, %v1448_v8 }
  0xb2   : > { %5650 = vmatmul.mubr.f32.gmra.mxu0 %v1429_v57  ;;  %5712 = vmatprep.mubr.f32.mxu1 %v1317_v56  ;;  %v1458_v22 = vsub.f32 %v6624_v45, %v1457_v3  ;;  %v356_v20 = vmul.f32 %v6607_v30, %v287_v33  ;;  %394 = vst.msk [vmem:[%s6643_s14 + $0x10] sm:$0xff] %vm392_vm2, %v377_v48  ;;  %v6673_v33 = vand.u32 4294901760, %v2786_v31 }
  0xb3   : > { %478 = vperm.xlu1 %6125, %v6342_v34   ;;  %5652 = vmatprep.mubr.f32.mxu0 %v1439_v9  ;;  %v6663_v26 = vpop.permute.xlu0 %2385  ;;  %v1468_v56 = vsub.f32 %v6622_v36, %v1467_v32 }
  0xb4   : > { %v1459_v57 = vand.u32 4294901760, %v1458_v22  ;;  %v379_v39 = vadd.f32 %v6629_v40, %v356_v20  ;;  %v9038_v22 = vand.u32 4294901760, %v6585_v25  ;;  %vm2424_vm6 = vcmp.eq.s32.totalorder %v6663_v26, %v6380_v42 }
  0xb5   : > { %5713 = vmatmul.mubr.f32.vlgmr.msra.gmra.mxu1 %v1327_v7  ;;  %v297_v34 = vpop.permute.xlu1 %296  ;;  %v1469_v20 = vand.u32 4294901760, %v1468_v56 }
  0xb6   : > { %5653 = vmatmul.mubr.f32.gmra.mxu0 %v1449_v63  ;;  %5715 = vmatprep.mubr.f32.mxu1 %v1337_v59  ;;  %v358_v9 = vmul.f32 %v6607_v30, %v297_v34  ;;  %396 = vst.msk [vmem:[%s6643_s14 + $0x30] sm:$0xff] %vm392_vm2, %v379_v39 }
  0xb7   : > { %488 = vperm.xlu1 %6125, %v6345_v35   ;;  %5655 = vmatprep.mubr.f32.mxu0 %v1459_v57  ;;  %v6679_v8 = vpop.permute.xlu0 %2391 }
  0xb8   : > { %5763 = vmatpush3.msra.mxu1 %v6190_v2  ;;  %v381_v7 = vadd.f32 %v6629_v40, %v358_v9  ;;  %vm2426_vm9 = vcmp.eq.s32.totalorder %v6679_v8, %v6380_v42 }
  0xb9   : > { %5716 = vmatmul.mubr.f32.gmra.mxu1 %v1347_v11  ;;  %5814 = vmatprep.subr.mxu1 %v6673_v33  ;;  %v307_v59 = vpop.permute.xlu1 %306 }
  0xba   : > { %5656 = vmatmul.mubr.f32.gmra.mxu0 %v1469_v20  ;;  %5718 = vmatprep.mubr.f32.mxu1 %v1357_v21  ;;  %v360_v35 = vmul.f32 %v6607_v30, %v307_v59  ;;  %398 = vst.msk [vmem:[%s6643_s14 + $0x50] sm:$0xff] %vm392_vm2, %v381_v7 }
  0xbb   : > { %498 = vperm.xlu1 %6125, %v6354_v37   ;;  %5686 = vmatprep.mubr.f32.mxu0 %v6401_v53  ;;  %v6693_v2 = vpop.permute.xlu0 %2397  ;;  %v9032_v53 = vmov 2  }
  0xbc   : > { %v383_v39 = vadd.f32 %v6629_v40, %v360_v35  ;;  %vm2428_vm10 = vcmp.eq.s32.totalorder %v6693_v2, %v6380_v42 }
  0xbd   : > { %5719 = vmatmul.mubr.f32.gmra.mxu1 %v1367_v27 }
  0xbe   : > { %5687 = vmatmul.mubr.f32.vlgmr.msra.gmra.mxu0 %v6422_v61  ;;  %5721 = vmatprep.mubr.f32.mxu1 %v1377_v58  ;;  %v6704_v11 = vpop.permute.xlu1 %2373  ;;  %400 = vst.msk [vmem:[%s6643_s14 + $0x70] sm:$0xff] %vm392_vm2, %v383_v39  ;;  %v9033_v61 = vand.u32 4294901760, %v6482_v29  ;;  %v9036_v58 = vand.u32 4294901760, %v6552_v44 }
  0xbf   : > { %5689 = vmatprep.mubr.f32.mxu0 %v6398_v50  ;;  %532 = vrot.lane.b32.xlu1 %v6629_v40, %s6143_s15  ;;  %v6708_v37 = vpop.permute.xlu0 %2403  ;;  %v9034_v50 = vand.u32 4294901760, %v6516_v6  ;;  %vm2420_vm3 = vcmp.eq.s32.totalorder %v6704_v11, %v6380_v42 }
  0xc0   : > { %5737 = vmatpush3.msra.mxu0 %v6201_v4  ;;  %6127 = vset.pattern.permute.xlu1 %v9032_v53  ;;  %v9035_v4 = vand.u32 4294901760, %v6514_v0  ;;  %vm2430_vm13 = vcmp.eq.s32.totalorder %v6708_v37, %v6380_v42 }
  0xc1   : > { %5722 = vmatmul.mubr.f32.gmra.mxu1 %v9033_v61  ;;  %5788 = vmatprep.subr.mxu0 %v6548_v28 }
  0xc2   : > { %5690 = vmatmul.mubr.f32.gmra.mxu0 %v6420_v60  ;;  %5724 = vmatprep.mubr.f32.mxu1 %v9034_v50  ;;  %v6721_v21 = vpop.permute.xlu1 %2379 }
  0xc3   : > { %5692 = vmatprep.mubr.f32.mxu0 %v6454_v13  ;;  %v6723_v27 = vpop.permute.xlu0 %2409  ;;  %v9037_v13 = vand.u32 4294901760, %v6550_v43  ;;  %vm2422_vm5 = vcmp.eq.s32.totalorder %v6721_v21, %v6380_v42 }
  0xc4   : > { %vm2432_vm15 = vcmp.eq.s32.totalorder %v6723_v27, %v6380_v42 }
  0xc5   : > { %5725 = vmatmul.mubr.f32.gmra.mxu1 %v9035_v4 }
  0xc6   : > { %5693 = vmatmul.mubr.f32.gmra.mxu0 %v6452_v12  ;;  %5727 = vmatprep.mubr.f32.mxu1 %v9036_v58  ;;  %v6731_v60 = vpop.permute.xlu1 %2382 }
  0xc7   : > { %5695 = vmatprep.mubr.f32.mxu0 %v6484_v41  ;;  %v6733_v63 = vpop.permute.xlu0 %2415  ;;  %v9039_v41 = vand.u32 4294901760, %v6583_v17  ;;  %vm2423_vm7 = vcmp.eq.s32.totalorder %v6731_v60, %v6380_v42 }
  0xc8   : > { %vm2434_vm1 = vcmp.eq.s32.totalorder %v6733_v63, %v6380_v42 }
  0xc9   : > { %5728 = vmatmul.mubr.f32.gmra.mxu1 %v9037_v13 }
  0xca   : > { %5696 = vmatmul.mubr.f32.gmra.mxu0 %v6482_v29  ;;  %5730 = vmatprep.mubr.f32.mxu1 %v9038_v22  ;;  %v6741_v12 = vpop.permute.xlu1 %2388 }
  0xcb   : > { %5698 = vmatprep.mubr.f32.mxu0 %v6516_v6  ;;  %vm2425_vm8 = vcmp.eq.s32.totalorder %v6741_v12, %v6380_v42 }
  0xcc   : > { %v272_v48 = vpop.permute.xlu0 %271 }
  0xcd   : > { %5731 = vmatmul.mubr.f32.gmra.mxu1 %v9039_v41  ;;  %v353_v31 = vmul.f32 %v6607_v30, %v272_v48 }
  0xce   : > { %5699 = vmatmul.mubr.f32.gmra.mxu0 %v6514_v0  ;;  %5733 = vmatprep.mubr.f32.mxu1 %v1457_v3  ;;  %v6750_v29 = vpop.permute.xlu1 %2394 }
  0xcf   : > { %5701 = vmatprep.mubr.f32.mxu0 %v6552_v44  ;;  %v376_v6 = vadd.f32 %v6629_v40, %v353_v31  ;;  %vm2427_vm11 = vcmp.eq.s32.totalorder %v6750_v29, %v6380_v42 }
  0xd0   : > { %v282_v57 = vpop.permute.xlu0 %281 }
  0xd1   : > { %5734 = vmatmul.mubr.f32.gmra.mxu1 %v1467_v32  ;;  %v355_v56 = vmul.f32 %v6607_v30, %v282_v57  ;;  %393 = vst.msk [vmem:[%s6643_s14] sm:$0xff] %vm392_vm2, %v376_v6 }
  0xd2   : > { %5702 = vmatmul.mubr.f32.gmra.mxu0 %v6550_v43  ;;  %5764 = vmatprep.mubr.msk.f32.mxu1 %vm1200_vm0, %v6390_v47  ;;  %v6762_v0 = vpop.permute.xlu1 %2400 }
  0xd3   : > { %5704 = vmatprep.mubr.f32.mxu0 %v6585_v25  ;;  %v378_v44 = vadd.f32 %v6629_v40, %v355_v56  ;;  %vm2429_vm12 = vcmp.eq.s32.totalorder %v6762_v0, %v6380_v42 }
  0xd4   : > { %v292_v3 = vpop.permute.xlu0 %291 }
  0xd5   : > { %5765 = vmatmul.mubr.msk.f32.vlgmr.msra.gmra.mxu1 %vm1200_vm0, %v6410_v55  ;;  %v357_v32 = vmul.f32 %v6607_v30, %v292_v3  ;;  %395 = vst.msk [vmem:[%s6643_s14 + $0x20] sm:$0xff] %vm392_vm2, %v378_v44 }
  0xd6   : > { %5705 = vmatmul.mubr.f32.gmra.mxu0 %v6583_v17  ;;  %5767 = vmatprep.mubr.msk.f32.mxu1 %vm1200_vm0, %v6387_v46  ;;  %v6774_v43 = vpop.permute.xlu1 %2406 }
  0xd7   : > { %5707 = vmatprep.mubr.f32.mxu0 %v6624_v45  ;;  %v380_v25 = vadd.f32 %v6629_v40, %v357_v32  ;;  %5815 = vmatpush3.msra.mxu1 %v6673_v33  ;;  %vm2431_vm14 = vcmp.eq.s32.totalorder %v6774_v43, %v6380_v42 }
  0xd8   : > { %v302_v34 = vpop.permute.xlu0 %301  ;;  %5866 = vmatprep.subr.mxu1 %v6548_v28 }
  0xd9   : > { %5768 = vmatmul.mubr.msk.f32.gmra.mxu1 %vm1200_vm0, %v6407_v54  ;;  %v359_v17 = vmul.f32 %v6607_v30, %v302_v34  ;;  %397 = vst.msk [vmem:[%s6643_s14 + $0x40] sm:$0xff] %vm392_vm2, %v380_v25 }
  0xda   : > { %5708 = vmatmul.mubr.f32.gmra.mxu0 %v6622_v36  ;;  %5770 = vmatprep.mubr.msk.f32.mxu1 %vm1200_vm0, %v6438_v5  ;;  %v6789_v45 = vpop.permute.xlu1 %2412 }
  0xdb   : > { %5738 = vmatprep.mubr.msk.f32.mxu0 %vm1200_vm0, %v6390_v47  ;;  %v382_v33 = vadd.f32 %v6629_v40, %v359_v17 }
  0xdc   : > { %v312_v9 = vpop.permute.xlu0 %311 }
  0xdd   : > { %5771 = vmatmul.mubr.msk.f32.gmra.mxu1 %vm1200_vm0, %v6435_v1  ;;  %v361_v20 = vmul.f32 %v6607_v30, %v312_v9  ;;  %399 = vst.msk [vmem:[%s6643_s14 + $0x60] sm:$0xff] %vm392_vm2, %v382_v33 }
  0xde   : > { %5739 = vmatmul.mubr.msk.f32.vlgmr.msra.gmra.mxu0 %vm1200_vm0, %v6410_v55  ;;  %5773 = vmatprep.mubr.msk.f32.mxu1 %vm1200_vm0, %v6472_v19  ;;  %v6803_v47 = vpop.permute.xlu1 %2418 }
  0xdf   : > { %5741 = vmatprep.mubr.msk.f32.mxu0 %vm1200_vm0, %v6387_v46  ;;  %v384_v36 = vadd.f32 %v6629_v40, %v361_v20  ;;  %5789 = vmatpush3.msra.mxu0 %v6548_v28 }
  0xe0   : > { %v317_v7 = vpop.permute.xlu0 %316  ;;  %5840 = vmatprep.subr.mxu0 %v6581_v14 }
  0xe1   : > { %5774 = vmatmul.mubr.msk.f32.gmra.mxu1 %vm1200_vm0, %v6469_v18  ;;  %v362_v55 = vmul.f32 %v6607_v30, %v317_v7  ;;  %401 = vst.msk [vmem:[%s6643_s14 + $0x80] sm:$0xff] %vm392_vm2, %v384_v36 }
  0xe2   : > { %5742 = vmatmul.mubr.msk.f32.gmra.mxu0 %vm1200_vm0, %v6407_v54  ;;  %5776 = vmatprep.mubr.msk.f32.mxu1 %vm1200_vm0, %v6502_v24 }
  0xe3   : > { %5744 = vmatprep.mubr.msk.f32.mxu0 %vm1200_vm0, %v6438_v5  ;;  %v385_v46 = vadd.f32 %v6629_v40, %v362_v55  ;;  %v322_v59 = vpop.permute.xlu1 %321  ;;  %v9040_v5 = vmov 0.0  }
  0xe4   : > { %v332_v35 = vpop.permute.xlu0 %331  ;;  %v363_v39 = vmul.f32 %v6607_v30, %v322_v59  ;;  %v6835_v10 = vsel %vm2420_vm3, 1.0, %v9040_v5  ;;  %v6838_v11 = vsel %vm2421_vm4, 1.0, %v9040_v5  ;;  %v6865_v22 = vsel %vm2422_vm5, 1.0, %v9040_v5 }
  0xe5   : > { %5777 = vmatmul.mubr.msk.f32.gmra.mxu1 %vm1200_vm0, %v6497_v52  ;;  %v365_v54 = vmul.f32 %v6607_v30, %v332_v35  ;;  %402 = vst.msk [vmem:[%s6643_s14 + $0x90] sm:$0xff] %vm392_vm2, %v385_v46  ;;  %v2482_v21 = vsel %vm1200_vm0, %v6838_v11, 0  ;;  %v6890_v57 = vsel %vm2423_vm7, 1.0, %v9040_v5  ;;  %v6917_v34 = vsel %vm2425_vm8, 1.0, %v9040_v5 }
  0xe6   : > { %5745 = vmatmul.mubr.msk.f32.gmra.mxu0 %vm1200_vm0, %v6435_v1  ;;  %5779 = vmatprep.mubr.msk.f32.mxu1 %vm1200_vm0, %v6536_v16  ;;  %v386_v61 = vadd.f32 %v6629_v40, %v363_v39  ;;  %v6885_v60 = vsub.f32 %v2482_v21, %v2482_v21  ;;  %v6928_v8 = vsel %vm2426_vm9, 1.0, %v9040_v5  ;;  %v6940_v33 = vsel %vm2428_vm10, 1.0, %v9040_v5 }
  0xe7   : > { %5747 = vmatprep.mubr.msk.f32.mxu0 %vm1200_vm0, %v6472_v19  ;;  %v388_v50 = vadd.f32 %v6629_v40, %v365_v54  ;;  %v327_v1 = vpop.permute.xlu1 %326  ;;  %v2479_v19 = vsel %vm1200_vm0, %v6835_v10, 0  ;;  %v6955_v20 = vsel %vm2427_vm11, 1.0, %v9040_v5  ;;  %v6990_v37 = vsel %vm2429_vm12, 1.0, %v9040_v5 }
  0xe8   : > { %v342_v4 = vpop.permute.xlu0 %341  ;;  %v364_v58 = vmul.f32 %v6607_v30, %v327_v1  ;;  %403 = vst.msk [vmem:[%s6643_s14 + $0xa0] sm:$0xff] %vm392_vm2, %v386_v61  ;;  %v6873_v31 = vsub.f32 %v2479_v19, %v2479_v19  ;;  %v6999_v61 = vsel %vm2430_vm13, 1.0, %v9040_v5  ;;  %vm2433_vm3 = vcmp.eq.s32.totalorder %v6789_v45, %v6380_v42 }
  0xe9   : > { %5780 = vmatmul.mubr.msk.f32.gmra.mxu1 %vm1200_vm0, %v6533_v15  ;;  %v367_v13 = vmul.f32 %v6607_v30, %v342_v4  ;;  %405 = vst.msk [vmem:[%s6643_s14 + $0xc0] sm:$0xff] %vm392_vm2, %v388_v50  ;;  %vm2435_vm4 = vcmp.eq.s32.totalorder %v6803_v47, %v6380_v42 }
  0xea   : > { %5748 = vmatmul.mubr.msk.f32.gmra.mxu0 %vm1200_vm0, %v6469_v18  ;;  %5782 = vmatprep.mubr.msk.f32.mxu1 %vm1200_vm0, %v6569_v62  ;;  %v387_v48 = vadd.f32 %v6629_v40, %v364_v58  ;;  %v6876_v18 = vsel %vm2424_vm6, 1.0, %v9040_v5  ;;  %v2594_v12 = vand.u32 4294901760, %v6873_v31 }
  0xeb   : > { %5750 = vmatprep.mubr.msk.f32.mxu0 %vm1200_vm0, %v6502_v24  ;;  %v390_v41 = vadd.f32 %v6629_v40, %v367_v13  ;;  %v337_v26 = vpop.permute.xlu1 %336  ;;  %v2485_v24 = vsel %vm1200_vm0, %v6865_v22, 0  ;;  %v2491_v44 = vsel %vm1200_vm0, %v6876_v18, 0  ;;  %v2506_v13 = vsel %vm1200_vm0, %v6990_v37, 0 }
  0xec   : > { %v366_v6 = vmul.f32 %v6607_v30, %v337_v26  ;;  %404 = vst.msk [vmem:[%s6643_s14 + $0xb0] sm:$0xff] %vm392_vm2, %v387_v48  ;;  %v6905_v32 = vsub.f32 %v2485_v24, %v2485_v24  ;;  %v2509_v48 = vsel %vm1200_vm0, %v6999_v61, 0  ;;  %v7031_v26 = vsel %vm2432_vm15, 1.0, %v9040_v5 }
  0xed   : > { %5783 = vmatmul.mubr.msk.f32.gmra.mxu1 %vm1200_vm0, %v6566_v23  ;;  %407 = vst.msk [vmem:[%s6643_s14 + $0xe0] sm:$0xff] %vm392_vm2, %v390_v41  ;;  %v7007_v4 = vpop.permute.xlu0 %3720  ;;  %v7026_v41 = vsel %vm2431_vm14, 1.0, %v9040_v5  ;;  %v7039_v24 = vsub.f32 %v2506_v13, %v2506_v13 }
  0xee   : > { %5751 = vmatmul.mubr.msk.f32.gmra.mxu0 %vm1200_vm0, %v6497_v52  ;;  %5785 = vmatprep.mubr.msk.f32.mxu1 %vm1200_vm0, %v6602_v51  ;;  %v389_v56 = vadd.f32 %v6629_v40, %v366_v6  ;;  %v2488_v52 = vsel %vm1200_vm0, %v6890_v57, 0  ;;  %v9001_v29 = vand.u32 4294901760, %v6905_v32  ;;  %vm3763_vm5 = vcmp.eq.s32.totalorder %v7007_v4, %v6380_v42 }
  0xef   : > { %5753 = vmatprep.mubr.msk.f32.mxu0 %vm1200_vm0, %v6536_v16  ;;  %v347_v3 = vpop.permute.xlu1 %346  ;;  %v9003_v16 = vand.u32 4294901760, %v6885_v60  ;;  %v6935_v2 = vsub.f32 %v2488_v52, %v2488_v52  ;;  %v3809_v52 = vld [vmem:[%s8978_s3 + $0x10] sm:$0xff]  ;;  %v8995_v63 = vand.u32 4294901760, %v7039_v24 }
  0xf0   : > { %v368_v25 = vmul.f32 %v6607_v30, %v347_v3  ;;  %406 = vst.msk [vmem:[%s6643_s14 + $0xd0] sm:$0xff] %vm392_vm2, %v389_v56  ;;  %v6925_v30 = vsub.f32 %v2491_v44, %v2491_v44  ;;  %v2615_v39 = vsub.f32 %v6905_v32, %v9001_v29 }
  0xf1   : > { %5786 = vmatmul.mubr.msk.f32.gmra.mxu1 %vm1200_vm0, %v6599_v49  ;;  %v2605_v36 = vsub.f32 %v6885_v60, %v9003_v16  ;;  %v8999_v46 = vand.u32 4294901760, %v6935_v2 }
  0xf2   : > { %5754 = vmatmul.mubr.msk.f32.gmra.mxu0 %vm1200_vm0, %v6533_v15  ;;  %5816 = vmatprep.mubr.msk.f32.mxu1 %vm1200_vm0, %v6835_v10  ;;  %v391_v17 = vadd.f32 %v6629_v40, %v368_v25  ;;  %v2494_v15 = vsel %vm1200_vm0, %v6917_v34, 0  ;;  %v2595_v40 = vsub.f32 %v6873_v31, %v2594_v12  ;;  %v8997_v7 = vand.u32 4294901760, %v6925_v30 }
  0xf3   : > { %5756 = vmatprep.mubr.msk.f32.mxu0 %vm1200_vm0, %v6569_v62  ;;  %v2497_v62 = vsel %vm1200_vm0, %v6928_v8, 0  ;;  %v6970_v55 = vsub.f32 %v2494_v15, %v2494_v15  ;;  %v2606_v50 = vand.u32 4294901760, %v2605_v36  ;;  %v2616_v19 = vand.u32 4294901760, %v2615_v39 }
  0xf4   : > { %v6944_v9 = vpop.permute.xlu1 %3714  ;;  %408 = vst.msk [vmem:[%s6643_s14 + $0xf0] sm:$0xff] %vm392_vm2, %v391_v17  ;;  %v6978_v0 = vsub.f32 %v2497_v62, %v2497_v62  ;;  %v2596_v35 = vand.u32 4294901760, %v2595_v40  ;;  %v2635_v27 = vsub.f32 %v6925_v30, %v8997_v7  ;;  %v7049_v25 = vsub.f32 %v2509_v48, %v2509_v48 }
  0xf5   : > { %5817 = vmatmul.mubr.msk.f32.vlgmr.msra.gmra.mxu1 %vm1200_vm0, %v6838_v11  ;;  %v8996_v58 = vand.u32 4294901760, %v6970_v55  ;;  %v2515_v62 = vsel %vm1200_vm0, %v7031_v26, 0  ;;  %v7066_v36 = vsel %vm2433_vm3, 1.0, %v9040_v5  ;;  %vm3761_vm6 = vcmp.eq.s32.totalorder %v6944_v9, %v6380_v42 }
  0xf6   : > { %5757 = vmatmul.mubr.msk.f32.gmra.mxu0 %vm1200_vm0, %v6566_v23  ;;  %5819 = vmatprep.mubr.msk.f32.mxu1 %vm1200_vm0, %v6865_v22  ;;  %v2503_v23 = vsel %vm1200_vm0, %v6940_v33, 0  ;;  %v8994_v21 = vand.u32 4294901760, %v6978_v0  ;;  %v2636_v15 = vand.u32 4294901760, %v2635_v27  ;;  %v7091_v13 = vsub.f32 %v2515_v62, %v2515_v62 }
  0xf7   : > { %5759 = vmatprep.mubr.msk.f32.mxu0 %vm1200_vm0, %v6602_v51  ;;  %5867 = vmatpush3.msra.mxu1 %v6548_v28  ;;  %v2500_v51 = vsel %vm1200_vm0, %v6955_v20, 0  ;;  %v6996_v54 = vsub.f32 %v2503_v23, %v2503_v23  ;;  %v2645_v44 = vsub.f32 %v6970_v55, %v8996_v58  ;;  %v7070_v23 = vpop.permute.xlu0 %3729  ;;  %v2518_v47 = vsel %vm1200_vm0, %v7066_v36, 0 }
  0xf8   : > { %5918 = vmatprep.subr.mxu1 %v6548_v28  ;;  %v6984_v59 = vpop.permute.xlu1 %3717  ;;  %v7003_v1 = vsub.f32 %v2500_v51, %v2500_v51  ;;  %v2655_v40 = vsub.f32 %v6978_v0, %v8994_v21  ;;  %v7076_v51 = vsel %vm2434_vm1, 1.0, %v9040_v5  ;;  %v8998_v48 = vand.u32 4294901760, %v7049_v25 }
  0xf9   : > { %5820 = vmatmul.mubr.msk.f32.gmra.mxu1 %vm1200_vm0, %v6890_v57  ;;  %v8992_v6 = vand.u32 4294901760, %v6996_v54  ;;  %v7110_v62 = vsub.f32 %v2518_v47, %v2518_v47  ;;  %v7301_v9 = vsel %vm3761_vm6, 1.0, %v9040_v5  ;;  %vm3762_vm7 = vcmp.eq.s32.totalorder %v6984_v59, %v6380_v42 }
  0xfa   : > { %5760 = vmatmul.mubr.msk.f32.gmra.mxu0 %vm1200_vm0, %v6599_v49  ;;  %5822 = vmatprep.mubr.msk.f32.mxu1 %vm1200_vm0, %v6876_v18  ;;  %v2625_v49 = vsub.f32 %v6935_v2, %v8999_v46  ;;  %v8993_v3 = vand.u32 4294901760, %v7003_v1  ;;  %v2656_v27 = vand.u32 4294901760, %v2655_v40  ;;  %v3820_v59 = vsel %vm1200_vm0, %v7301_v9, 0 }
  0xfb   : > { %5790 = vmatprep.mubr.f32.mxu0 %v2596_v35  ;;  %v2675_v45 = vsub.f32 %v6996_v54, %v8992_v6  ;;  %v7083_v35 = vand.u32 4294901760, %v3809_v52  ;;  %v7112_v40 = vpop.permute.xlu0 %3735  ;;  %v9004_v7 = vand.u32 4294901760, %v7110_v62  ;;  %vm3766_vm8 = vcmp.eq.s32.totalorder %v7070_v23, %v6380_v42 }
  0xfc   : > { %v7017_v43 = vpop.permute.xlu1 %3723  ;;  %v2626_v56 = vand.u32 4294901760, %v2625_v49  ;;  %v2665_v49 = vsub.f32 %v7003_v1, %v8993_v3  ;;  %v2685_v3 = vsub.f32 %v7039_v24, %v8995_v63  ;;  %vm3768_vm11 = vcmp.eq.s32.totalorder %v7112_v40, %v6380_v42 }
  0xfd   : > { %5823 = vmatmul.mubr.msk.f32.gmra.mxu1 %vm1200_vm0, %v6917_v34  ;;  %vm3764_vm9 = vcmp.eq.s32.totalorder %v7017_v43, %v6380_v42 }
  0xfe   : > { %5791 = vmatmul.mubr.f32.vlgmr.msra.gmra.mxu0 %v2606_v50  ;;  %5825 = vmatprep.mubr.msk.f32.mxu1 %vm1200_vm0, %v6928_v8  ;;  %v2646_v50 = vand.u32 4294901760, %v2645_v44  ;;  %v7103_v44 = vsel %vm2435_vm4, 1.0, %v9040_v5  ;;  %v2666_v6 = vand.u32 4294901760, %v2665_v49  ;;  %v9002_v49 = vand.u32 4294901760, %v7091_v13 }
  0xff   : > { %5793 = vmatprep.mubr.f32.mxu0 %v2616_v19  ;;  %5841 = vmatpush3.msra.mxu0 %v6581_v14  ;;  %v2512_v14 = vsel %vm1200_vm0, %v7026_v41, 0  ;;  %v2686_v63 = vand.u32 4294901760, %v2685_v3  ;;  %v7149_v46 = vpop.permute.xlu0 %3741 }
 0x100   : > { %5892 = vmatprep.subr.mxu0 %v6620_v38  ;;  %v7055_v17 = vpop.permute.xlu1 %3726  ;;  %v7085_v39 = vsub.f32 %v2512_v14, %v2512_v14  ;;  %v2676_v14 = vand.u32 4294901760, %v2675_v45  ;;  %v2695_v45 = vsub.f32 %v7049_v25, %v8998_v48  ;;  %vm3770_vm13 = vcmp.eq.s32.totalorder %v7149_v46, %v6380_v42 }
 0x101   : > { %5826 = vmatmul.mubr.msk.f32.gmra.mxu1 %vm1200_vm0, %v6955_v20  ;;  %vm3765_vm10 = vcmp.eq.s32.totalorder %v7055_v17, %v6380_v42  ;;  %v7356_v17 = vsel %vm3766_vm8, 1.0, %v9040_v5 }
 0x102   : > { %5794 = vmatmul.mubr.f32.gmra.mxu0 %v2626_v56  ;;  %5828 = vmatprep.mubr.msk.f32.mxu1 %vm1200_vm0, %v6940_v33  ;;  %v2521_v56 = vsel %vm1200_vm0, %v7076_v51, 0  ;;  %v9000_v21 = vand.u32 4294901760, %v7085_v39  ;;  %v2696_v48 = vand.u32 4294901760, %v2695_v45 }
 0x103   : > { %5796 = vmatprep.mubr.f32.mxu0 %v2636_v15  ;;  %v7108_v15 = vsub.f32 %v3809_v52, %v7083_v35 }
 0x104   : > { %v7097_v19 = vpop.permute.xlu1 %3732  ;;  %v2705_v58 = vsub.f32 %v7085_v39, %v9000_v21  ;;  %v2725_v21 = vsub.f32 %v7110_v62, %v9004_v7 }
 0x105   : > { %5829 = vmatmul.mubr.msk.f32.gmra.mxu1 %vm1200_vm0, %v6990_v37  ;;  %v7133_v47 = vand.u32 4294901760, %v7108_v15  ;;  %vm3767_vm12 = vcmp.eq.s32.totalorder %v7097_v19, %v6380_v42  ;;  %v3835_v19 = vsel %vm1200_vm0, %v7356_v17, 0 }
 0x106   : > { %5797 = vmatmul.mubr.f32.gmra.mxu0 %v2646_v50  ;;  %5831 = vmatprep.mubr.msk.f32.mxu1 %vm1200_vm0, %v6999_v61  ;;  %v7118_v50 = vsub.f32 %v2521_v56, %v2521_v56  ;;  %v2706_v3 = vand.u32 4294901760, %v2705_v58  ;;  %v7166_v58 = vpop.permute.xlu0 %3747 }
 0x107   : > { %5799 = vmatprep.mubr.f32.mxu0 %v2656_v27  ;;  %v2524_v27 = vsel %vm1200_vm0, %v7103_v44, 0  ;;  %9041 = vst [vmem:[#allocation2_spill] sm:$0xff] %v7133_v47  ;;  %v4127_v29 = vsub.f32 %v7108_v15, %v7133_v47  ;;  %v9044_v47 = vand.u32 4294901760, %v6885_v60  ;;  %vm3772_vm1 = vcmp.eq.s32.totalorder %v7166_v58, %v6380_v42 }
 0x108   : > { %v7124_v52 = vpop.permute.xlu1 %3738  ;;  %v7135_v56 = vsub.f32 %v2524_v27, %v2524_v27  ;;  %v2734_v27 = vand.u32 4294901760, %v7118_v50 }
 0x109   : > { %5832 = vmatmul.mubr.msk.f32.gmra.mxu1 %vm1200_vm0, %v7026_v41  ;;  %v4128_v53 = vand.u32 4294901760, %v4127_v29  ;;  %v9047_v29 = vand.u32 4294901760, %v6925_v30  ;;  %vm3769_vm14 = vcmp.eq.s32.totalorder %v7124_v52, %v6380_v42 }
 0x10a   : > { %5800 = vmatmul.mubr.f32.gmra.mxu0 %v2666_v6  ;;  %5834 = vmatprep.mubr.msk.f32.mxu1 %vm1200_vm0, %v7031_v26  ;;  %v2744_v45 = vand.u32 4294901760, %v7135_v56  ;;  %v2735_v16 = vsub.f32 %v7118_v50, %v2734_v27 }
 0x10b   : > { %5802 = vmatprep.mubr.f32.mxu0 %v2676_v14  ;;  %v2715_v14 = vsub.f32 %v7091_v13, %v9002_v49 }
 0x10c   : > { %v7143_v6 = vpop.permute.xlu1 %3744  ;;  %v2745_v7 = vsub.f32 %v7135_v56, %v2744_v45 }
 0x10d   : > { %5835 = vmatmul.mubr.msk.f32.gmra.mxu1 %vm1200_vm0, %v7066_v36  ;;  %9042 = vst [vmem:[#allocation3_spill] sm:$0xff] %v7143_v6 }
 0x10e   : > { %5803 = vmatmul.mubr.f32.gmra.mxu0 %v2686_v63  ;;  %5837 = vmatprep.mubr.msk.f32.mxu1 %vm1200_vm0, %v7076_v51  ;;  %v2716_v63 = vand.u32 4294901760, %v2715_v14  ;;  %v9045_v14 = vand.u32 4294901760, %v6905_v32 }
 0x10f   : > { %5805 = vmatprep.mubr.f32.mxu0 %v2696_v48  ;;  %v2726_v48 = vand.u32 4294901760, %v2725_v21  ;;  %v9046_v21 = vand.u32 4294901760, %v6935_v2 }
 0x110   : > { %v7161_v49 = vpop.permute.xlu1 %3750 }
 0x111   : > { %5838 = vmatmul.mubr.msk.f32.gmra.mxu1 %vm1200_vm0, %v7103_v44  ;;  %9043 = vst [vmem:[#allocation4_spill] sm:$0xff] %v7161_v49  ;;  %v2736_v49 = vand.u32 4294901760, %v2735_v16  ;;  %v9048_v16 = vand.u32 4294901760, %v6970_v55 }
 0x112   : > { %5806 = vmatmul.mubr.f32.gmra.mxu0 %v2706_v3  ;;  %5868 = vmatprep.mubr.f32.mxu1 %v2594_v12  ;;  %v2746_v12 = vand.u32 4294901760, %v2745_v7  ;;  %v7178_v3 = vpop.permute.xlu0 %3753 }
 0x113   : > { %5808 = vmatprep.mubr.f32.mxu0 %v2716_v63  ;;  %v9050_v63 = vand.u32 4294901760, %v7003_v1  ;;  %vm3774_vm4 = vcmp.eq.s32.totalorder %v7178_v3, %v6380_v42 }
 0x114   : > { %v7171_v6 = vpop.permute.xlu1 %3756 }
 0x115   : > { %5869 = vmatmul.mubr.f32.vlgmr.msra.gmra.mxu1 %v9044_v47 }
 0x116   : > { %5809 = vmatmul.mubr.f32.gmra.mxu0 %v2726_v48  ;;  %5871 = vmatprep.mubr.f32.mxu1 %v9045_v14  ;;  %v9052_v48 = vand.u32 4294901760, %v7039_v24 }
 0x117   : > { %5811 = vmatprep.mubr.f32.mxu0 %v2736_v49  ;;  %5919 = vmatpush3.msra.mxu1 %v6548_v28  ;;  %v9049_v28 = vand.u32 4294901760, %v6978_v0  ;;  %v7190_v49 = vpop.permute.xlu0 %3759 }
 0x118   : > { %5970 = vmatprep.subr.mxu1 %v4128_v53  ;;  %vm3776_vm6 = vcmp.eq.s32.totalorder %v7190_v49, %v6380_v42 }
 0x119   : > { %5872 = vmatmul.mubr.f32.gmra.mxu1 %v9046_v21  ;;  %v434_v47 = vpop.permute.xlu1 %433  ;;  %v9056_v21 = vand.u32 4294901760, %v7110_v62 }
 0x11a   : > { %5812 = vmatmul.mubr.f32.gmra.mxu0 %v2746_v12  ;;  %5874 = vmatprep.mubr.f32.mxu1 %v9047_v29 }
 0x11b   : > { %5842 = vmatprep.mubr.f32.mxu0 %v6873_v31  ;;  %v9051_v31 = vand.u32 4294901760, %v6996_v54 }
 0x11d   : > { %5875 = vmatmul.mubr.f32.gmra.mxu1 %v9048_v16 }
 0x11e   : > { %5843 = vmatmul.mubr.f32.vlgmr.msra.gmra.mxu0 %v6885_v60  ;;  %5877 = vmatprep.mubr.f32.mxu1 %v9049_v28  ;;  %v444_v7 = vpop.permute.xlu1 %443 }
 0x11f   : > { %5845 = vmatprep.mubr.f32.mxu0 %v6905_v32  ;;  %5893 = vmatpush3.msra.mxu0 %v6620_v38  ;;  %v429_v32 = vpop.permute.xlu0 %428  ;;  %v9053_v38 = vand.u32 4294901760, %v7049_v25 }
 0x120   : > { %5944 = vmatprep.subr.mxu0 %v7083_v35 }
 0x121   : > { %5878 = vmatmul.mubr.f32.gmra.mxu1 %v9050_v63 }
 0x122   : > { %5846 = vmatmul.mubr.f32.gmra.mxu0 %v6935_v2  ;;  %5880 = vmatprep.mubr.f32.mxu1 %v9051_v31  ;;  %v449_v60 = vpop.permute.xlu1 %448  ;;  %v9054_v2 = vand.u32 4294901760, %v7085_v39 }
 0x123   : > { %5848 = vmatprep.mubr.f32.mxu0 %v6925_v30  ;;  %v9055_v30 = vand.u32 4294901760, %v7091_v13 }
 0x125   : > { %5881 = vmatmul.mubr.f32.gmra.mxu1 %v9052_v48  ;;  %v7320_v48 = vsel %vm3762_vm7, 1.0, %v9040_v5  ;;  %vm615_vm7 = vcmask 523520  }
 0x126   : > { %5849 = vmatmul.mubr.f32.gmra.mxu0 %v6970_v55  ;;  %5883 = vmatprep.mubr.f32.mxu1 %v9053_v38  ;;  %v7204_v14 = vpop.permute.xlu1 %458  ;;  %v439_v55 = vpop.permute.xlu0 %438 }
 0x127   : > { %5851 = vmatprep.mubr.f32.mxu0 %v6978_v0 }
 0x129   : > { %5884 = vmatmul.mubr.f32.gmra.mxu1 %v9054_v2 }
 0x12a   : > { %5852 = vmatmul.mubr.f32.gmra.mxu0 %v7003_v1  ;;  %5886 = vmatprep.mubr.f32.mxu1 %v9055_v30  ;;  %v7212_v12 = vpop.permute.xlu1 %468  ;;  %v454_v1 = vpop.permute.xlu0 %453  ;;  %v7340_v30 = vsub.f32 %v3820_v59, %v3820_v59  ;;  %v633_v59 = vld [vmem:[%s6281_s29 + $0x8] sm:$0xff] }
 0x12b   : > { %5854 = vmatprep.mubr.f32.mxu0 %v6996_v54  ;;  %v7232_v54 = vld [vmem:[%s8976_s1 + $0x1] ss:$0 sm:$0xff] }
 0x12d   : > { %5887 = vmatmul.mubr.f32.gmra.mxu1 %v9056_v21 }
 0x12e   : > { %5855 = vmatmul.mubr.f32.gmra.mxu0 %v7039_v24  ;;  %5889 = vmatprep.mubr.f32.mxu1 %v2734_v27  ;;  %v7218_v0 = vpop.permute.xlu1 %478  ;;  %v512_v27 = vmul.f32 %v7232_v54, %v439_v55  ;;  %v7364_v55 = vsel %vm3765_vm10, 1.0, %v9040_v5 }
 0x12f   : > { %5857 = vmatprep.mubr.f32.mxu0 %v7049_v25  ;;  %v510_v25 = vmul.f32 %v7232_v54, %v429_v32 }
 0x131   : > { %5890 = vmatmul.mubr.f32.gmra.mxu1 %v2744_v45  ;;  %v513_v45 = vmul.f32 %v7232_v54, %v444_v7 }
 0x132   : > { %5858 = vmatmul.mubr.f32.gmra.mxu0 %v7085_v39  ;;  %5920 = vmatprep.mubr.msk.f32.mxu1 %vm1200_vm0, %v6835_v10  ;;  %v7224_v29 = vpop.permute.xlu1 %488  ;;  %v464_v39 = vpop.permute.xlu0 %463 }
 0x133   : > { %5860 = vmatprep.mubr.f32.mxu0 %v7091_v13  ;;  %v511_v13 = vmul.f32 %v7232_v54, %v434_v47 }
 0x135   : > { %5921 = vmatmul.mubr.msk.f32.vlgmr.msra.gmra.mxu1 %vm1200_vm0, %v6838_v11 }
 0x136   : > { %5861 = vmatmul.mubr.f32.gmra.mxu0 %v7110_v62  ;;  %5923 = vmatprep.mubr.msk.f32.mxu1 %vm1200_vm0, %v6865_v22  ;;  %v7237_v24 = vpop.permute.xlu1 %498 }
 0x137   : > { %5863 = vmatprep.mubr.f32.mxu0 %v7118_v50  ;;  %5971 = vmatpush3.msra.mxu1 %v4128_v53 }
 0x138   : > { %6022 = vmatprep.subr.mxu1 %v7083_v35 }
 0x139   : > { %5924 = vmatmul.mubr.msk.f32.gmra.mxu1 %vm1200_vm0, %v6890_v57 }
 0x13a   : > { %5864 = vmatmul.mubr.f32.gmra.mxu0 %v7135_v56  ;;  %5926 = vmatprep.mubr.msk.f32.mxu1 %vm1200_vm0, %v6876_v18  ;;  %v7248_v62 = vpop.permute.xlu1 %532  ;;  %v474_v56 = vpop.permute.xlu0 %473 }
 0x13b   : > { %5894 = vmatprep.mubr.msk.f32.mxu0 %vm1200_vm0, %v6835_v10  ;;  %v536_v53 = vadd.f32 %v7248_v62, %v511_v13  ;;  %v535_v50 = vadd.f32 %v7248_v62, %v510_v25  ;;  %v515_v10 = vmul.f32 %v7232_v54, %v454_v1  ;;  %v538_v47 = vadd.f32 %v7248_v62, %v513_v45 }
 0x13c   : > { %v537_v16 = vadd.f32 %v7248_v62, %v512_v27  ;;  %v519_v4 = vmul.f32 %v7232_v54, %v474_v56  ;;  %v3832_v13 = vsel %vm1200_vm0, %v7364_v55, 0  ;;  %v7402_v27 = vsel %vm3767_vm12, 1.0, %v9040_v5 }
 0x13d   : > { %5927 = vmatmul.mubr.msk.f32.gmra.mxu1 %vm1200_vm0, %v6917_v34  ;;  %569 = vrot.lane.b32.xlu1 %v536_v53, %s6144_s21  ;;  %v540_v28 = vadd.f32 %v7248_v62, %v515_v10  ;;  %v7394_v53 = vsel %vm3768_vm11, 1.0, %v9040_v5  ;;  %v7418_v10 = vsub.f32 %v3832_v13, %v3832_v13  ;;  %v3838_v52 = vsel %vm1200_vm0, %v7402_v27, 0 }
 0x13e   : > { %567 = vrot.lane.b32.xlu0 %v535_v50, %s6144_s21  ;;  %5895 = vmatmul.mubr.msk.f32.vlgmr.msra.gmra.mxu0 %vm1200_vm0, %v6838_v11  ;;  %v514_v11 = vmul.f32 %v7232_v54, %v449_v60  ;;  %v484_v7 = vpop.permute.xlu0 %483  ;;  %v522_v50 = vmul.f32 %v7232_v54, %v7224_v29 }
 0x13f   : > { %5929 = vmatprep.mubr.msk.f32.mxu1 %vm1200_vm0, %v6928_v8  ;;  %5897 = vmatprep.mubr.msk.f32.mxu0 %vm1200_vm0, %v6865_v22  ;;  %v517_v22 = vmul.f32 %v7232_v54, %v464_v39  ;;  %v521_v38 = vmul.f32 %v7232_v54, %v484_v7  ;;  %v7443_v7 = vsel %vm3769_vm14, 1.0, %v9040_v5 }
 0x140   : > { %5945 = vmatpush3.msra.mxu0 %v7083_v35  ;;  %v539_v63 = vadd.f32 %v7248_v62, %v514_v11  ;;  %v524_v11 = vmul.f32 %v7232_v54, %v7237_v24 }
 0x141   : > { %5930 = vmatmul.mubr.msk.f32.gmra.mxu1 %vm1200_vm0, %v6955_v20  ;;  %573 = vrot.lane.b32.xlu1 %v538_v47, %s6144_s21  ;;  %v542_v31 = vadd.f32 %v7248_v62, %v517_v22  ;;  %v546_v23 = vadd.f32 %v7248_v62, %v521_v38 }
 0x142   : > { %571 = vrot.lane.b32.xlu0 %v537_v16, %s6144_s21  ;;  %5898 = vmatmul.mubr.msk.f32.gmra.mxu0 %vm1200_vm0, %v6890_v57  ;;  %v7293_v57 = vsel %vm3763_vm5, 1.0, %v9040_v5  ;;  %v494_v32 = vpop.permute.xlu0 %493  ;;  %v7428_v16 = vsub.f32 %v3835_v19, %v3835_v19  ;;  %v549_v46 = vadd.f32 %v7248_v62, %v524_v11  ;;  %vm3775_vm5 = vcmp.eq.s32.totalorder %v7171_v6, %v6380_v42 }
 0x143   : > { %5932 = vmatprep.mubr.msk.f32.mxu1 %vm1200_vm0, %v6940_v33  ;;  %5900 = vmatprep.mubr.msk.f32.mxu0 %vm1200_vm0, %v6876_v18  ;;  %v516_v18 = vmul.f32 %v7232_v54, %v7204_v14  ;;  %v544_v14 = vadd.f32 %v7248_v62, %v519_v4  ;;  %v523_v21 = vmul.f32 %v7232_v54, %v494_v32  ;;  %v7595_v6 = vsel %vm3776_vm6, 1.0, %v9040_v5 }
 0x144   : > { %5996 = vmatprep.subr.mxu0 %v7108_v15  ;;  %9063 = vst [vmem:[#allocation7_spill] sm:$0xff] %v7595_v6 }
 0x145   : > { %5933 = vmatmul.mubr.msk.f32.gmra.mxu1 %vm1200_vm0, %v6990_v37  ;;  %577 = vrot.lane.b32.xlu1 %v540_v28, %s6144_s21  ;;  %v541_v60 = vadd.f32 %v7248_v62, %v516_v18  ;;  %v548_v40 = vadd.f32 %v7248_v62, %v523_v21  ;;  %v3841_v28 = vsel %vm1200_vm0, %v7394_v53, 0  ;;  %v9057_v18 = vld [vmem:[#allocation3_spill] sm:$0xff] }
 0x146   : > { %575 = vrot.lane.b32.xlu0 %v539_v63, %s6144_s21  ;;  %5901 = vmatmul.mubr.msk.f32.gmra.mxu0 %vm1200_vm0, %v6917_v34  ;;  %v3826_v34 = vsel %vm1200_vm0, %v7293_v57, 0  ;;  %vm3771_vm15 = vcmp.eq.s32.totalorder %v9057_v18, %v6380_v42  ;;  %v7483_v32 = vsub.f32 %v3841_v28, %v3841_v28  ;;  %v7549_v28 = vsel %vm3774_vm4, 1.0, %v9040_v5  ;;  %v635_v18 = vld [vmem:[%s6281_s29 + $0x18] sm:$0xff] }
 0x147   : > { %5935 = vmatprep.mubr.msk.f32.mxu1 %vm1200_vm0, %v6999_v61  ;;  %5903 = vmatprep.mubr.msk.f32.mxu0 %vm1200_vm0, %v6928_v8  ;;  %v518_v8 = vmul.f32 %v7232_v54, %v7212_v12  ;;  %v7344_v43 = vsub.f32 %v3826_v34, %v3826_v34  ;;  %v520_v12 = vmul.f32 %v7232_v54, %v7218_v0  ;;  %v9013_v34 = vand.u32 4294901760, %v7418_v10 }
 0x148   : > { %9061 = vst [vmem:[#allocation5_spill] sm:$0xff] %v7549_v28 }
 0x149   : > { %5936 = vmatmul.mubr.msk.f32.gmra.mxu1 %vm1200_vm0, %v7026_v41  ;;  %581 = vrot.lane.b32.xlu1 %v542_v31, %s6144_s21  ;;  %v543_v2 = vadd.f32 %v7248_v62, %v518_v8  ;;  %v545_v1 = vadd.f32 %v7248_v62, %v520_v12  ;;  %v9015_v39 = vand.u32 4294901760, %v7344_v43  ;;  %v7466_v31 = vsub.f32 %v3838_v52, %v3838_v52  ;;  %v9059_v12 = vld [vmem:[#allocation4_spill] sm:$0xff] }
 0x14a   : > { %579 = vrot.lane.b32.xlu0 %v541_v60, %s6144_s21  ;;  %5904 = vmatmul.mubr.msk.f32.gmra.mxu0 %vm1200_vm0, %v6955_v20  ;;  %v3823_v20 = vsel %vm1200_vm0, %v7320_v48, 0  ;;  %v9011_v8 = vand.u32 4294901760, %v7428_v16  ;;  %vm3773_vm3 = vcmp.eq.s32.totalorder %v9059_v12, %v6380_v42  ;;  %v7580_v12 = vsel %vm3775_vm5, 1.0, %v9040_v5 }
 0x14b   : > { %5938 = vmatprep.mubr.msk.f32.mxu1 %vm1200_vm0, %v7031_v26  ;;  %5906 = vmatprep.mubr.msk.f32.mxu0 %vm1200_vm0, %v6940_v33  ;;  %v7350_v33 = vsel %vm3764_vm9, 1.0, %v9040_v5  ;;  %v7374_v0 = vsub.f32 %v3823_v20, %v3823_v20  ;;  %v3956_v22 = vsub.f32 %v7344_v43, %v9015_v39  ;;  %v7501_v20 = vsel %vm3772_vm1, 1.0, %v9040_v5  ;;  %9062 = vst [vmem:[#allocation6_spill] sm:$0xff] %v7580_v12 }
 0x14c   : > { %v3829_v25 = vsel %vm1200_vm0, %v7350_v33, 0  ;;  %9058 = vst [vmem:[#allocation3_spill] sm:$0xff] %v7501_v20  ;;  %v9010_v13 = vand.u32 4294901760, %v7466_v31  ;;  %v7540_v52 = vsel %vm3773_vm3, 1.0, %v9040_v5 }
 0x14d   : > { %5939 = vmatmul.mubr.msk.f32.gmra.mxu1 %vm1200_vm0, %v7066_v36  ;;  %585 = vrot.lane.b32.xlu1 %v544_v14, %s6144_s21  ;;  %v9016_v29 = vand.u32 4294901760, %v7374_v0  ;;  %v7413_v56 = vsub.f32 %v3829_v25, %v3829_v25  ;;  %v7491_v14 = vsel %vm3771_vm15, 1.0, %v9040_v5  ;;  %v3976_v25 = vsub.f32 %v7418_v10, %v9013_v34  ;;  %9060 = vst [vmem:[#allocation4_spill] sm:$0xff] %v7540_v52 }
 0x14e   : > { %583 = vrot.lane.b32.xlu0 %v543_v2, %s6144_s21  ;;  %5907 = vmatmul.mubr.msk.f32.gmra.mxu0 %vm1200_vm0, %v6990_v37  ;;  %v504_v37 = vpop.permute.xlu0 %503  ;;  %v3850_v19 = vsel %vm1200_vm0, %v7491_v14, 0 }
 0x14f   : > { %5941 = vmatprep.mubr.msk.f32.mxu1 %vm1200_vm0, %v7076_v51  ;;  %5909 = vmatprep.mubr.msk.f32.mxu0 %vm1200_vm0, %v6999_v61  ;;  %v9017_v61 = vand.u32 4294901760, %v7340_v30  ;;  %v525_v45 = vmul.f32 %v7232_v54, %v504_v37  ;;  %v7449_v54 = vsel %vm3770_vm13, 1.0, %v9040_v5  ;;  %v3946_v63 = vsub.f32 %v7374_v0, %v9016_v29 }
 0x150   : > { %v9014_v4 = vand.u32 4294901760, %v7413_v56  ;;  %v3847_v38 = vsel %vm1200_vm0, %v7449_v54, 0  ;;  %v3977_v3 = vand.u32 4294901760, %v3976_v25 }
 0x151   : > { %5942 = vmatmul.mubr.msk.f32.gmra.mxu1 %vm1200_vm0, %v7103_v44  ;;  %589 = vrot.lane.b32.xlu1 %v546_v23, %s6144_s21  ;;  %v550_v24 = vadd.f32 %v7248_v62, %v525_v45  ;;  %v3947_v21 = vand.u32 4294901760, %v3946_v63  ;;  %v632_v23 = vld [vmem:[%s6281_s29] sm:$0xff]  ;;  %v634_v45 = vld [vmem:[%s6281_s29 + $0x10] sm:$0xff] }
 0x152   : > { %587 = vrot.lane.b32.xlu0 %v545_v1, %s6144_s21  ;;  %5910 = vmatmul.mubr.msk.f32.gmra.mxu0 %vm1200_vm0, %v7026_v41  ;;  %v547_v41 = vadd.f32 %v7248_v62, %v522_v50  ;;  %v3844_v62 = vsel %vm1200_vm0, %v7443_v7, 0  ;;  %v3966_v37 = vsub.f32 %v7413_v56, %v9014_v4  ;;  %v639_v4 = vld [vmem:[%s6281_s29 + $0x38] sm:$0xff] }
 0x153   : > { %5972 = vmatprep.mubr.msk.f32.mxu1 %vm1200_vm0, %v7301_v9  ;;  %5912 = vmatprep.mubr.msk.f32.mxu0 %vm1200_vm0, %v7031_v26  ;;  %v3936_v26 = vsub.f32 %v7340_v30, %v9017_v61  ;;  %v7510_v1 = vsub.f32 %v3844_v62, %v3844_v62  ;;  %v3996_v62 = vsub.f32 %v7466_v31, %v9010_v13 }
 0x154   : > { %v3967_v63 = vand.u32 4294901760, %v3966_v37 }
 0x155   : > { %v7420_v47 = vpop.f32.mrf.mxu1  ;;  %5973 = vmatmul.mubr.msk.f32.vlgmr.msra.gmra.mxu1 %vm1200_vm0, %v7320_v48  ;;  %593 = vrot.lane.b32.xlu1 %v548_v40, %s6144_s21  ;;  %v3937_v60 = vand.u32 4294901760, %v3936_v26  ;;  %v3986_v40 = vsub.f32 %v7428_v16, %v9011_v8  ;;  %v3853_v26 = vsel %vm1200_vm0, %v7501_v20, 0  ;;  %v3997_v42 = vand.u32 4294901760, %v3996_v62 }
 0x156   : > { %591 = vrot.lane.b32.xlu0 %v547_v41, %s6144_s21  ;;  %5913 = vmatmul.mubr.msk.f32.gmra.mxu0 %vm1200_vm0, %v7066_v36  ;;  %v7532_v41 = vsub.f32 %v3847_v38, %v3847_v38  ;;  %v3856_v38 = vsel %vm1200_vm0, %v7540_v52, 0  ;;  %v7587_v25 = vsub.f32 %v3853_v26, %v3853_v26 }
 0x157   : > { %5975 = vmatprep.mubr.msk.f32.mxu1 %vm1200_vm0, %v7293_v57  ;;  %v7453_v36 = vpop.f32.mrf.mxu1  ;;  %5915 = vmatprep.mubr.msk.f32.mxu0 %vm1200_vm0, %v7076_v51 }
 0x158   : > { %6023 = vmatpush3.msra.mxu1 %v7083_v35 }
 0x159   : > { %v7470_v51 = vpop.f32.mrf.mxu1  ;;  %5976 = vmatmul.mubr.msk.f32.gmra.mxu1 %vm1200_vm0, %v7350_v33  ;;  %597 = vrot.lane.b32.xlu1 %v550_v24, %s6144_s21 }
 0x15a   : > { %595 = vrot.lane.b32.xlu0 %v549_v46, %s6144_s21  ;;  %5916 = vmatmul.mubr.msk.f32.gmra.mxu0 %vm1200_vm0, %v7103_v44  ;;  %v3957_v44 = vand.u32 4294901760, %v3956_v22  ;;  %v9009_v22 = vand.u32 4294901760, %v7483_v32  ;;  %v7559_v46 = vsub.f32 %v3850_v19, %v3850_v19  ;;  %v3859_v19 = vsel %vm1200_vm0, %v7549_v28, 0 }
 0x15b   : > { %5978 = vmatprep.mubr.msk.f32.mxu1 %vm1200_vm0, %v7364_v55  ;;  %v7495_v2 = vpop.f32.mrf.mxu1  ;;  %5946 = vmatprep.mubr.f32.mxu0 %v3937_v60 }
 0x15c   : > { %6074 = vmatprep.subr.mxu1 %v7083_v35  ;;  %v4006_v37 = vsub.f32 %v7483_v32, %v9009_v22  ;;  %v9019_v49 = vand.u32 4294901760, %v7559_v46  ;;  %v3862_v22 = vsel %vm1200_vm0, %v7580_v12, 0 }
 0x15d   : > { %v7514_v58 = vpop.f32.mrf.mxu1  ;;  %5979 = vmatmul.mubr.msk.f32.gmra.mxu1 %vm1200_vm0, %v7356_v17  ;;  %656 = vperm.xlu1 %6127, %v633_v59   ;;  %v9012_v59 = vand.u32 4294901760, %v7510_v1  ;;  %v7632_v29 = vsub.f32 %v3862_v22, %v3862_v22  ;;  %v640_v22 = vld [vmem:[%s6281_s29 + $0x40] sm:$0xff] }
 0x15e   : > { %v7524_v50 = vpop.f32.mrf.mxu0  ;;  %5947 = vmatmul.mubr.f32.vlgmr.msra.gmra.mxu0 %v3947_v21  ;;  %5981 = vmatprep.mubr.msk.f32.mxu1 %vm1200_vm0, %v7402_v27  ;;  %v4007_v62 = vand.u32 4294901760, %v4006_v37 }
 0x15f   : > { %v7542_v11 = vpop.f32.mrf.mxu1  ;;  %5949 = vmatprep.mubr.f32.mxu0 %v3957_v44  ;;  %651 = vperm.xlu0 %6126, %v632_v23   ;;  %v636_v44 = vld [vmem:[%s6281_s29 + $0x20] sm:$0xff]  ;;  %v3987_v23 = vand.u32 4294901760, %v3986_v40  ;;  %v9018_v40 = vand.u32 4294901760, %v7532_v41  ;;  %v4016_v5 = vsub.f32 %v7510_v1, %v9012_v59  ;;  %v3865_v59 = vsel %vm1200_vm0, %v7595_v6, 0 }
 0x160   : > { %v7555_v24 = vpop.f32.mrf.mxu0  ;;  %5997 = vmatpush3.msra.mxu0 %v7108_v15 }
 0x161   : > { %v7561_v60 = vpop.f32.mrf.mxu1  ;;  %5982 = vmatmul.mubr.msk.f32.gmra.mxu1 %vm1200_vm0, %v7394_v53  ;;  %661 = vperm.xlu1 %6127, %v634_v45   ;;  %v4017_v37 = vand.u32 4294901760, %v4016_v5 }
 0x162   : > { %v7571_v15 = vpop.f32.mrf.mxu0  ;;  %5950 = vmatmul.mubr.f32.gmra.mxu0 %v3967_v63  ;;  %5984 = vmatprep.mubr.msk.f32.mxu1 %vm1200_vm0, %v7443_v7  ;;  %v637_v63 = vld [vmem:[%s6281_s29 + $0x28] sm:$0xff] }
 0x163   : > { %v7582_v21 = vpop.f32.mrf.mxu1  ;;  %5952 = vmatprep.mubr.f32.mxu0 %v3977_v3  ;;  %666 = vperm.xlu0 %6126, %v635_v18   ;;  %v9064_v18 = vld [vmem:[#allocation2_spill] sm:$0xff]  ;;  %v7602_v3 = vsub.f32 %v3856_v38, %v3856_v38  ;;  %v638_v38 = vld [vmem:[%s6281_s29 + $0x30] sm:$0xff] }
 0x164   : > { %v7597_v45 = vpop.f32.mrf.mxu0  ;;  %6048 = vmatprep.subr.mxu0 %v9064_v18 }
 0x165   : > { %v7604_v26 = vpop.f32.mrf.mxu1  ;;  %5985 = vmatmul.mubr.msk.f32.gmra.mxu1 %vm1200_vm0, %v7449_v54  ;;  %671 = vperm.xlu1 %6127, %v636_v44   ;;  %v7621_v44 = vsub.f32 %v3859_v19, %v3859_v19  ;;  %v4036_v19 = vsub.f32 %v7559_v46, %v9019_v49  ;;  %v641_v49 = vld [vmem:[%s6281_s29 + $0x48] sm:$0xff] }
 0x166   : > { %v7614_v13 = vpop.f32.mrf.mxu0  ;;  %5953 = vmatmul.mubr.f32.gmra.mxu0 %v3987_v23  ;;  %5987 = vmatprep.mubr.msk.f32.mxu1 %vm1200_vm0, %v7491_v14  ;;  %v4026_v23 = vsub.f32 %v7532_v41, %v9018_v40 }
 0x167   : > { %v7619_v8 = vpop.f32.mrf.mxu1  ;;  %5955 = vmatprep.mubr.f32.mxu0 %v3997_v42  ;;  %676 = vperm.xlu0 %6126, %v637_v63   ;;  %v9068_v63 = vand.u32 4294901760, %v7587_v25 }
 0x168   : > { %9065 = vst [vmem:[#allocation2_spill] sm:$0xff] %v7619_v8  ;;  %v7625_v34 = vpop.f32.mrf.mxu0  ;;  %v4027_v39 = vand.u32 4294901760, %v4026_v23 }
 0x169   : > { %v7634_v42 = vpop.f32.mrf.mxu1  ;;  %5988 = vmatmul.mubr.msk.f32.gmra.mxu1 %vm1200_vm0, %v7501_v20  ;;  %681 = vperm.xlu1 %6127, %v638_v38   ;;  %v7649_v38 = vsub.f32 %v3865_v59, %v3865_v59  ;;  %v9070_v59 = vand.u32 4294901760, %v7602_v3 }
 0x16a   : > { %9066 = vst [vmem:[#allocation8_spill] sm:$0xff] %v7634_v42  ;;  %v7642_v61 = vpop.f32.mrf.mxu0  ;;  %5956 = vmatmul.mubr.f32.gmra.mxu0 %v4007_v62  ;;  %5990 = vmatprep.mubr.msk.f32.mxu1 %vm1200_vm0, %v7540_v52  ;;  %v4046_v42 = vsub.f32 %v7587_v25, %v9068_v63  ;;  %v642_v63 = vld [vmem:[%s6281_s29 + $0x50] sm:$0xff] }
 0x16b   : > { %v7647_v40 = vpop.f32.mrf.mxu1  ;;  %5958 = vmatprep.mubr.f32.mxu0 %v4017_v37  ;;  %686 = vperm.xlu0 %6126, %v639_v4   ;;  %v4037_v4 = vand.u32 4294901760, %v4036_v19  ;;  %v4056_v37 = vsub.f32 %v7602_v3, %v9070_v59  ;;  %v9072_v59 = vand.u32 4294901760, %v7621_v44 }
 0x16c   : > { %9067 = vst [vmem:[#allocation9_spill] sm:$0xff] %v7647_v40  ;;  %v7651_v5 = vpop.f32.mrf.mxu0  ;;  %v4047_v19 = vand.u32 4294901760, %v4046_v42 }
 0x16d   : > { %v7658_v52 = vpop.f32.mrf.mxu1  ;;  %5991 = vmatmul.mubr.msk.f32.gmra.mxu1 %vm1200_vm0, %v7549_v28  ;;  %691 = vperm.xlu1 %6127, %v640_v22   ;;  %v4066_v23 = vsub.f32 %v7621_v44, %v9072_v59  ;;  %v644_v59 = vld [vmem:[%s6281_s29 + $0x60] sm:$0xff] }
 0x16e   : > { %9069 = vst [vmem:[#allocation10_spill] sm:$0xff] %v7658_v52  ;;  %v7666_v40 = vpop.f32.mrf.mxu0  ;;  %5959 = vmatmul.mubr.f32.gmra.mxu0 %v4027_v39  ;;  %5993 = vmatprep.mubr.msk.f32.mxu1 %vm1200_vm0, %v7580_v12  ;;  %v643_v52 = vld [vmem:[%s6281_s29 + $0x58] sm:$0xff]  ;;  %v9075_v12 = vand.u32 4294901760, %v7340_v30 }
 0x16f   : > { %v7671_v62 = vpop.f32.mrf.mxu1  ;;  %5961 = vmatprep.mubr.f32.mxu0 %v4037_v4  ;;  %696 = vperm.xlu0 %6126, %v641_v49   ;;  %v9074_v49 = vand.u32 4294901760, %v7632_v29 }
 0x170   : > { %9071 = vst [vmem:[#allocation11_spill] sm:$0xff] %v7671_v62  ;;  %v7673_v22 = vpop.f32.mrf.mxu0  ;;  %v4057_v62 = vand.u32 4294901760, %v4056_v37  ;;  %v645_v37 = vld [vmem:[%s6281_s29 + $0x68] sm:$0xff] }
 0x171   : > { %v7680_v28 = vpop.f32.mrf.mxu1  ;;  %5994 = vmatmul.mubr.msk.f32.gmra.mxu1 %vm1200_vm0, %v7595_v6  ;;  %701 = vperm.xlu1 %6127, %v642_v63   ;;  %v4076_v4 = vsub.f32 %v7632_v29, %v9074_v49  ;;  %v4067_v63 = vand.u32 4294901760, %v4066_v23  ;;  %v9078_v6 = vand.u32 4294901760, %v7649_v38 }
 0x172   : > { %9073 = vst [vmem:[#allocation12_spill] sm:$0xff] %v7680_v28  ;;  %v7687_v42 = vpop.f32.mrf.mxu0  ;;  %5962 = vmatmul.mubr.f32.gmra.mxu0 %v4047_v19  ;;  %6024 = vmatprep.mubr.f32.mxu1 %v9075_v12  ;;  %v9079_v19 = vand.u32 4294901760, %v7374_v0 }
 0x173   : > { %v7692_v39 = vpop.f32.mrf.mxu1  ;;  %5964 = vmatprep.mubr.f32.mxu0 %v4057_v62  ;;  %706 = vperm.xlu0 %6126, %v643_v52   ;;  %v4086_v49 = vsub.f32 %v7649_v38, %v9078_v6  ;;  %v4077_v12 = vand.u32 4294901760, %v4076_v4  ;;  %v9080_v52 = vand.u32 4294901760, %v7344_v43  ;;  %v646_v62 = vld [vmem:[%s6281_s29 + $0x70] sm:$0xff]  ;;  %v9082_v4 = vand.u32 4294901760, %v7413_v56 }
 0x174   : > { %9076 = vst [vmem:[#allocation13_spill] sm:$0xff] %v7692_v39  ;;  %v7694_v28 = vpop.f32.mrf.mxu0 }
 0x175   : > { %9077 = vst [vmem:[#allocation14_spill] sm:$0xff] %v7694_v28  ;;  %v7700_v20 = vpop.f32.mrf.mxu1  ;;  %6025 = vmatmul.mubr.f32.vlgmr.msra.gmra.mxu1 %v9079_v19  ;;  %711 = vperm.xlu1 %6127, %v644_v59   ;;  %v4087_v6 = vand.u32 4294901760, %v4086_v49  ;;  %v7714_v28 = vld [vmem:[%s6281_s29 + $0x78] sm:$0xff]  ;;  %v9084_v19 = vand.u32 4294901760, %v7418_v10 }
 0x176   : > { %v7704_v8 = vpop.f32.mrf.mxu0  ;;  %5965 = vmatmul.mubr.f32.gmra.mxu0 %v4067_v63  ;;  %6027 = vmatprep.mubr.f32.mxu1 %v9080_v52  ;;  %9081 = vst [vmem:[#allocation15_spill] sm:$0xff] %v7714_v28  ;;  %v9087_v52 = vand.u32 4294901760, %v7428_v16 }
 0x177   : > { %v7709_v23 = vpop.f32.mrf.mxu1  ;;  %5967 = vmatprep.mubr.f32.mxu0 %v4077_v12  ;;  %716 = vperm.xlu0 %6126, %v645_v37   ;;  %v7728_v37 = vld [vmem:[%s8979_s4] ss:$0 sm:$0xff] }
 0x178   : > { %v7711_v39 = vpop.f32.mrf.mxu0  ;;  %6075 = vmatpush3.msra.mxu1 %v7083_v35  ;;  %9085 = vst [vmem:[#allocation17_spill] sm:$0xff] %v7728_v37 }
 0x179   : > { %v7717_v59 = vpop.f32.mrf.mxu1  ;;  %6028 = vmatmul.mubr.f32.gmra.mxu1 %v9082_v4  ;;  %721 = vperm.xlu1 %6127, %v646_v62  }
 0x17a   : > { %v7721_v63 = vpop.f32.mrf.mxu0  ;;  %5968 = vmatmul.mubr.f32.gmra.mxu0 %v4087_v6  ;;  %6030 = vmatprep.mubr.f32.mxu1 %v9084_v19  ;;  %v9088_v6 = vand.u32 4294901760, %v7466_v31 }
 0x17b   : > { %9083 = vst [vmem:[#allocation16_spill] sm:$0xff] %v7721_v63  ;;  %v7730_v49 = vpop.f32.mrf.mxu1  ;;  %5998 = vmatprep.mubr.f32.mxu0 %v7340_v30  ;;  %726 = vperm.xlu0 %6126, %v7714_v28   ;;  %v9092_v28 = vand.u32 4294901760, %v7532_v41  ;;  %v9096_v63 = vand.u32 4294901760, %v7587_v25 }
 0x17c   : > { %v7734_v35 = vpop.f32.mrf.mxu0 }
 0x17d   : > { %9086 = vst [vmem:[#allocation18_spill] sm:$0xff] %v7734_v35  ;;  %v7736_v12 = vpop.f32.mrf.mxu1  ;;  %6031 = vmatmul.mubr.f32.gmra.mxu1 %v9087_v52  ;;  %755 = vrot.lane.b32.xlu1 %v7728_v37, %s6145_s24  ;;  %v9089_v52 = vand.u32 4294901760, %v7483_v32 }
 0x17e   : > { %v5688_v62 = vpop.f32.mrf.mxu0  ;;  %5999 = vmatmul.mubr.f32.vlgmr.msra.gmra.mxu0 %v7374_v0  ;;  %6033 = vmatprep.mubr.f32.mxu1 %v9088_v6  ;;  %v9090_v0 = vand.u32 4294901760, %v7510_v1 }
 0x17f   : > { %v7745_v30 = vpop.f32.mrf.mxu1  ;;  %6001 = vmatprep.mubr.f32.mxu0 %v7344_v43  ;;  %6049 = vmatpush3.msra.mxu0 %v9064_v18 }
 0x180   : > { %v7749_v4 = vpop.f32.mrf.mxu0 }
 0x181   : > { %v7751_v19 = vpop.f32.mrf.mxu1  ;;  %6034 = vmatmul.mubr.f32.gmra.mxu1 %v9089_v52 }
 0x182   : > { %v7755_v37 = vpop.f32.mrf.mxu0  ;;  %6002 = vmatmul.mubr.f32.gmra.mxu0 %v7413_v56  ;;  %6036 = vmatprep.mubr.f32.mxu1 %v9090_v0  ;;  %v9093_v56 = vand.u32 4294901760, %v7559_v46 }
 0x183   : > { %v7760_v6 = vpop.f32.mrf.mxu1  ;;  %6004 = vmatprep.mubr.f32.mxu0 %v7418_v10 }
 0x184   : > { %v7763_v43 = vpop.f32.mrf.mxu0 }
 0x185   : > { %v7765_v18 = vpop.f32.mrf.mxu1  ;;  %6037 = vmatmul.mubr.f32.gmra.mxu1 %v9092_v28 }
 0x186   : > { %9091 = vst [vmem:[#allocation19_spill] sm:$0xff] %v7765_v18  ;;  %v7769_v35 = vpop.f32.mrf.mxu0  ;;  %6005 = vmatmul.mubr.f32.gmra.mxu0 %v7428_v16  ;;  %6039 = vmatprep.mubr.f32.mxu1 %v9093_v56  ;;  %v9097_v16 = vand.u32 4294901760, %v7602_v3 }
 0x187   : > { %v7774_v52 = vpop.f32.mrf.mxu1  ;;  %6007 = vmatprep.mubr.f32.mxu0 %v7466_v31 }
 0x188   : > { %9094 = vst [vmem:[#allocation20_spill] sm:$0xff] %v7774_v52  ;;  %v7777_v0 = vpop.f32.mrf.mxu0 }
 0x189   : > { %v7779_v10 = vpop.f32.mrf.mxu1  ;;  %6040 = vmatmul.mubr.f32.gmra.mxu1 %v9096_v63 }
 0x18a   : > { %9095 = vst [vmem:[#allocation21_spill] sm:$0xff] %v7779_v10  ;;  %v7783_v18 = vpop.f32.mrf.mxu0  ;;  %6008 = vmatmul.mubr.f32.gmra.mxu0 %v7483_v32  ;;  %6042 = vmatprep.mubr.f32.mxu1 %v9097_v16  ;;  %v9100_v10 = vand.u32 4294901760, %v7621_v44  ;;  %v9101_v32 = vand.u32 4294901760, %v7632_v29 }
 0x18b   : > { %v7788_v28 = vpop.f32.mrf.mxu1  ;;  %6010 = vmatprep.mubr.f32.mxu0 %v7510_v1  ;;  %v7808_v1 = vld [vmem:[%s8979_s4 + $0x1] ss:$0 sm:$0xff] }
 0x18c   : > { %9098 = vst [vmem:[#allocation22_spill] sm:$0xff] %v7788_v28  ;;  %v7791_v56 = vpop.f32.mrf.mxu0 }
 0x18d   : > { %v7793_v31 = vpop.f32.mrf.mxu1  ;;  %6043 = vmatmul.mubr.f32.gmra.mxu1 %v9100_v10  ;;  %v1332_v10 = vadd.f32 %v7524_v50, %v7808_v1 }
 0x18e   : > { %9099 = vst [vmem:[#allocation23_spill] sm:$0xff] %v7793_v31  ;;  %v7797_v52 = vpop.f32.mrf.mxu0  ;;  %6011 = vmatmul.mubr.f32.gmra.mxu0 %v7532_v41  ;;  %6045 = vmatprep.mubr.f32.mxu1 %v9101_v32  ;;  %v9104_v41 = vand.u32 4294901760, %v7649_v38 }
 0x18f   : > { %v7802_v63 = vpop.f32.mrf.mxu1  ;;  %6013 = vmatprep.mubr.f32.mxu0 %v7559_v46  ;;  %v1322_v46 = vadd.f32 %v7808_v1, %v7555_v24  ;;  %v1352_v24 = vadd.f32 %v7571_v15, %v7808_v1 }
 0x190   : > { %9102 = vst [vmem:[#allocation24_spill] sm:$0xff] %v7802_v63  ;;  %v7810_v16 = vpop.f32.mrf.mxu0 }
 0x191   : > { %v7814_v31 = vpop.f32.mrf.mxu1  ;;  %6046 = vmatmul.mubr.f32.gmra.mxu1 %v9104_v41  ;;  %v1566_v15 = vadd.f32 %v7470_v51, %v1352_v24 }
 0x192   : > { %9103 = vst [vmem:[#allocation25_spill] sm:$0xff] %v7814_v31  ;;  %v7818_v32 = vpop.f32.mrf.mxu0  ;;  %6014 = vmatmul.mubr.f32.gmra.mxu0 %v7587_v25  ;;  %6076 = vmatprep.mubr.msk.f32.mxu1 %vm1200_vm0, %v7301_v9  ;;  %v1554_v31 = vadd.f32 %v7420_v47, %v1332_v10  ;;  %v1548_v25 = vadd.f32 %v7453_v36, %v1322_v46 }
 0x193   : > { %v7825_v63 = vpop.f32.mrf.mxu1  ;;  %6016 = vmatprep.mubr.f32.mxu0 %v7602_v3  ;;  %v1342_v10 = vadd.f32 %v7808_v1, %v7597_v45  ;;  %v1733_v46 = vadd.f32 %v7755_v37, %v1566_v15 }
 0x194   : > { %9105 = vst [vmem:[#allocation26_spill] sm:$0xff] %v7825_v63  ;;  %v7828_v50 = vpop.f32.mrf.mxu0  ;;  %v1719_v63 = vadd.f32 %v5688_v62, %v1554_v31  ;;  %v1712_v36 = vadd.f32 %v7749_v4, %v1548_v25  ;;  %v6146_v62 = vmov 3   ;;  %v1362_v31 = vadd.f32 %v7808_v1, %v7625_v34 }
 0x195   : > { %v5766_v28 = vpop.f32.mrf.mxu1  ;;  %6077 = vmatmul.mubr.msk.f32.vlgmr.msra.gmra.mxu1 %vm1200_vm0, %v7320_v48  ;;  %6128 = vset.pattern.permute.xlu0 %v6146_v62 }
 0x196   : > { %v7833_v41 = vpop.f32.mrf.mxu0  ;;  %6017 = vmatmul.mubr.f32.gmra.mxu0 %v7621_v44  ;;  %6079 = vmatprep.mubr.msk.f32.mxu1 %vm1200_vm0, %v7293_v57  ;;  %v1899_v51 = vadd.f32 %v7700_v20, %v1719_v63  ;;  %v1891_v20 = vadd.f32 %v7709_v23, %v1712_v36  ;;  %v1412_v23 = vadd.f32 %v7666_v40, %v7808_v1 }
 0x197   : > { %9106 = vst [vmem:[#allocation27_spill] sm:$0xff] %v7833_v41  ;;  %v2246_v3 = vpop.f32.mrf.mxu1  ;;  %6019 = vmatprep.mubr.f32.mxu0 %v7632_v29  ;;  %v1372_v29 = vadd.f32 %v7614_v13, %v7808_v1  ;;  %6129 = vset.pattern.permute.xlu1 %v6146_v62  ;;  %v1560_v13 = vadd.f32 %v7495_v2, %v1342_v10 }
 0x198   : > { %v7842_v47 = vpop.f32.mrf.mxu0  ;;  %v1402_v40 = vadd.f32 %v7808_v1, %v7673_v22  ;;  %v1432_v22 = vadd.f32 %v7687_v42, %v7808_v1  ;;  %v9108_v42 = vld [vmem:[#allocation14_spill] sm:$0xff] }
 0x199   : > { %v5769_v41 = vpop.f32.mrf.mxu1  ;;  %6080 = vmatmul.mubr.msk.f32.gmra.mxu1 %vm1200_vm0, %v7350_v33  ;;  %v1726_v34 = vadd.f32 %v7763_v43, %v1560_v13  ;;  %v1578_v2 = vadd.f32 %v7514_v58, %v1372_v29 }
 0x19a   : > { %v7848_v44 = vpop.f32.mrf.mxu0  ;;  %6020 = vmatmul.mubr.f32.gmra.mxu0 %v7649_v38  ;;  %6082 = vmatprep.mubr.msk.f32.mxu1 %vm1200_vm0, %v7364_v55 }
 0x19b   : > { %9107 = vst [vmem:[#allocation28_spill] sm:$0xff] %v7848_v44  ;;  %v2258_v45 = vpop.f32.mrf.mxu1  ;;  %6050 = vmatprep.mubr.msk.f32.mxu0 %vm1200_vm0, %v7301_v9  ;;  %v1392_v9 = vadd.f32 %v7642_v61, %v7808_v1  ;;  %v1382_v61 = vadd.f32 %v7808_v1, %v7651_v5  ;;  %v1747_v25 = vadd.f32 %v7769_v35, %v1578_v2  ;;  %v9111_v2 = vld [vmem:[#allocation8_spill] sm:$0xff] }
 0x19c   : > { %v7861_v38 = vpop.f32.mrf.mxu0 }
 0x19d   : > { %v5772_v44 = vpop.f32.mrf.mxu1  ;;  %6083 = vmatmul.mubr.msk.f32.gmra.mxu1 %vm1200_vm0, %v7356_v17  ;;  %v1590_v5 = vadd.f32 %v7561_v60, %v1392_v9  ;;  %v1907_v60 = vadd.f32 %v7730_v49, %v1726_v34  ;;  %v9110_v34 = vld [vmem:[#allocation3_spill] sm:$0xff] }
 0x19e   : > { %v5740_v4 = vpop.f32.mrf.mxu0  ;;  %6051 = vmatmul.mubr.msk.f32.vlgmr.msra.gmra.mxu0 %vm1200_vm0, %v7320_v48  ;;  %6085 = vmatprep.mubr.msk.f32.mxu1 %vm1200_vm0, %v7402_v27  ;;  %v1572_v48 = vadd.f32 %v7542_v11, %v1362_v31 }
 0x19f   : > { %v2091_v37 = vadd.f32 %v5740_v4, %v1899_v51  ;;  %v7876_v24 = vpop.f32.mrf.mxu1  ;;  %6053 = vmatprep.mubr.msk.f32.mxu0 %vm1200_vm0, %v7293_v57  ;;  %v1915_v57 = vadd.f32 %v7717_v59, %v1733_v46  ;;  %v1422_v46 = vadd.f32 %v7808_v1, %v9108_v42 }
 0x1a0   : > { %v2084_v63 = vpop.f32.mrf.mxu0  ;;  %v1740_v11 = vadd.f32 %v7777_v0, %v1572_v48  ;;  %v1761_v0 = vadd.f32 %v7783_v18, %v1590_v5 }
 0x1a1   : > { %v2253_v43 = vadd.f32 %v5766_v28, %v2091_v37  ;;  %v2085_v10 = vadd.f32 %v2084_v63, %v1891_v20  ;;  %v7885_v58 = vpop.f32.mrf.mxu1  ;;  %6086 = vmatmul.mubr.msk.f32.gmra.mxu1 %vm1200_vm0, %v7394_v53  ;;  %v1614_v37 = vadd.f32 %v9111_v2, %v1432_v22  ;;  %v9113_v63 = vld [vmem:[#allocation9_spill] sm:$0xff] }
 0x1a2   : > { %v5743_v29 = vpop.f32.mrf.mxu0  ;;  %6054 = vmatmul.mubr.msk.f32.gmra.mxu0 %vm1200_vm0, %v7350_v33  ;;  %6088 = vmatprep.mubr.msk.f32.mxu1 %vm1200_vm0, %v7443_v7  ;;  %v1584_v33 = vadd.f32 %v7582_v21, %v1382_v61  ;;  %v1602_v21 = vadd.f32 %v7604_v26, %v1412_v23  ;;  %v1923_v26 = vadd.f32 %v7745_v30, %v1740_v11 }
 0x1a3   : > { %2341 = vst.msk [vmem:[%s6643_s14 + $0x18] sm:$0xff] %vm392_vm2, %v2253_v43  ;;  %v2247_v35 = vadd.f32 %v2246_v3, %v2085_v10  ;;  %v2103_v28 = vadd.f32 %v5743_v29, %v1915_v57  ;;  %v7900_v59 = vpop.f32.mrf.mxu1  ;;  %6056 = vmatprep.mubr.msk.f32.mxu0 %vm1200_vm0, %v7364_v55  ;;  %v1931_v55 = vadd.f32 %v7736_v12, %v1747_v25  ;;  %v9117_v29 = vld [vmem:[#allocation10_spill] sm:$0xff] }
 0x1a4   : > { %v2096_v36 = vpop.f32.mrf.mxu0  ;;  %v1754_v18 = vadd.f32 %v7791_v56, %v1584_v33  ;;  %v1775_v56 = vadd.f32 %v7797_v52, %v1602_v21  ;;  %v1452_v30 = vadd.f32 %v7704_v8, %v7808_v1  ;;  %v9112_v52 = vld [vmem:[#allocation4_spill] sm:$0xff]  ;;  %v1608_v25 = vadd.f32 %v9113_v63, %v1422_v46  ;;  %v9122_v21 = vld [vmem:[#allocation27_spill] sm:$0xff] }
 0x1a5   : > { %2340 = vst.msk [vmem:[%s6643_s14 + $0x8] sm:$0xff] %vm392_vm2, %v2247_v35  ;;  %v2265_v3 = vadd.f32 %v5769_v41, %v2103_v28  ;;  %v2097_v15 = vadd.f32 %v2096_v36, %v1907_v60  ;;  %v7911_v62 = vpop.f32.mrf.mxu1  ;;  %6089 = vmatmul.mubr.msk.f32.gmra.mxu1 %vm1200_vm0, %v7449_v54  ;;  %v9119_v36 = vld [vmem:[#allocation20_spill] sm:$0xff] }
 0x1a6   : > { %v5746_v49 = vpop.f32.mrf.mxu0  ;;  %6057 = vmatmul.mubr.msk.f32.gmra.mxu0 %vm1200_vm0, %v7356_v17  ;;  %6091 = vmatprep.mubr.msk.f32.mxu1 %vm1200_vm0, %v7491_v14  ;;  %v9109_v17 = vld [vmem:[#allocation2_spill] sm:$0xff]  ;;  %v1939_v8 = vadd.f32 %v7760_v6, %v1754_v18  ;;  %v9115_v6 = vld [vmem:[#allocation19_spill] sm:$0xff]  ;;  %v1626_v11 = vadd.f32 %v9117_v29, %v1452_v30 }
 0x1a7   : > { %2343 = vst.msk [vmem:[%s6643_s14 + $0x38] sm:$0xff] %vm392_vm2, %v2265_v3  ;;  %v2259_v41 = vadd.f32 %v2258_v45, %v2097_v15  ;;  %v2115_v31 = vadd.f32 %v5746_v49, %v1931_v55  ;;  %v7926_v12 = vpop.f32.mrf.mxu1  ;;  %6059 = vmatprep.mubr.msk.f32.mxu0 %vm1200_vm0, %v7402_v27  ;;  %v1596_v13 = vadd.f32 %v9109_v17, %v1402_v40  ;;  %v9121_v15 = vld [vmem:[#allocation11_spill] sm:$0xff] }
 0x1a8   : > { %v2108_v51 = vpop.f32.mrf.mxu0  ;;  %v1947_v27 = vadd.f32 %v7751_v19, %v1761_v0  ;;  %v1963_v23 = vadd.f32 %v9115_v6, %v1775_v56  ;;  %v9133_v6 = vld [vmem:[#allocation25_spill] sm:$0xff] }
 0x1a9   : > { %2342 = vst.msk [vmem:[%s6643_s14 + $0x28] sm:$0xff] %vm392_vm2, %v2259_v41  ;;  %v2277_v45 = vadd.f32 %v5772_v44, %v2115_v31  ;;  %v2109_v9 = vadd.f32 %v2108_v51, %v1923_v26  ;;  %v7937_v4 = vpop.f32.mrf.mxu1  ;;  %6092 = vmatmul.mubr.msk.f32.gmra.mxu1 %vm1200_vm0, %v9110_v34  ;;  %v1768_v44 = vadd.f32 %v7810_v16, %v1596_v13  ;;  %v9123_v41 = vld [vmem:[#allocation7_spill] sm:$0xff]  ;;  %v9125_v26 = vld [vmem:[#allocation12_spill] sm:$0xff] }
 0x1aa   : > { %v5749_v20 = vpop.f32.mrf.mxu0  ;;  %6060 = vmatmul.mubr.msk.f32.gmra.mxu0 %vm1200_vm0, %v7394_v53  ;;  %6094 = vmatprep.mubr.msk.f32.mxu1 %vm1200_vm0, %v9112_v52  ;;  %v1442_v53 = vadd.f32 %v7808_v1, %v7711_v39  ;;  %v1789_v16 = vadd.f32 %v7818_v32, %v1614_v37  ;;  %v9116_v39 = vld [vmem:[#allocation16_spill] sm:$0xff]  ;;  %v9118_v32 = vld [vmem:[#allocation6_spill] sm:$0xff] }
 0x1ab   : > { %2345 = vst.msk [vmem:[%s6643_s14 + $0x58] sm:$0xff] %vm392_vm2, %v2277_v45  ;;  %v2271_v61 = vadd.f32 %v7876_v24, %v2109_v9  ;;  %v2127_v19 = vadd.f32 %v5749_v20, %v1947_v27  ;;  %v7953_v48 = vpop.f32.mrf.mxu1  ;;  %6062 = vmatprep.mubr.msk.f32.mxu0 %vm1200_vm0, %v7443_v7  ;;  %v9114_v7 = vld [vmem:[#allocation5_spill] sm:$0xff]  ;;  %v1472_v5 = vadd.f32 %v9116_v39, %v7808_v1  ;;  %v9126_v45 = vld [vmem:[#allocation22_spill] sm:$0xff] }
 0x1ac   : > { %v2120_v43 = vpop.f32.mrf.mxu0  ;;  %v1955_v0 = vadd.f32 %v9119_v36, %v1768_v44  ;;  %v1620_v55 = vadd.f32 %v9121_v15, %v1442_v53  ;;  %v9127_v27 = vld [vmem:[#allocation13_spill] sm:$0xff]  ;;  %v9130_v44 = vld [vmem:[#allocation23_spill] sm:$0xff] }
 0x1ad   : > { %2344 = vst.msk [vmem:[%s6643_s14 + $0x48] sm:$0xff] %vm392_vm2, %v2271_v61  ;;  %v2289_v24 = vadd.f32 %v7885_v58, %v2127_v19  ;;  %v2121_v10 = vadd.f32 %v2120_v43, %v1939_v8  ;;  %v7965_v57 = vpop.f32.mrf.mxu1  ;;  %6095 = vmatmul.mubr.msk.f32.gmra.mxu1 %vm1200_vm0, %v9114_v7  ;;  %v1782_v58 = vadd.f32 %v7828_v50, %v1608_v25  ;;  %v9131_v43 = vld [vmem:[#allocation24_spill] sm:$0xff] }
 0x1ae   : > { %v5752_v35 = vpop.f32.mrf.mxu0  ;;  %6063 = vmatmul.mubr.msk.f32.gmra.mxu0 %vm1200_vm0, %v7449_v54  ;;  %6097 = vmatprep.mubr.msk.f32.mxu1 %vm1200_vm0, %v9118_v32  ;;  %v9120_v54 = vld [vmem:[#allocation18_spill] sm:$0xff]  ;;  %v1638_v42 = vadd.f32 %v9125_v26, %v1472_v5 }
 0x1af   : > { %2347 = vst.msk [vmem:[%s6643_s14 + $0x78] sm:$0xff] %vm392_vm2, %v2289_v24  ;;  %v2283_v28 = vadd.f32 %v7900_v59, %v2121_v10  ;;  %v2139_v60 = vadd.f32 %v5752_v35, %v1963_v23  ;;  %v2318_v40 = vpop.f32.mrf.mxu1  ;;  %v570_v33 = vpop.permute.xlu1 %569  ;;  %6065 = vmatprep.mubr.msk.f32.mxu0 %vm1200_vm0, %v7491_v14  ;;  %v1462_v3 = vadd.f32 %v7808_v1, %v9120_v54  ;;  %v9124_v1 = vld [vmem:[#allocation21_spill] sm:$0xff]  ;;  %v9134_v35 = vld [vmem:[#allocation26_spill] sm:$0xff] }
 0x1b0   : > { %617 = vst.msk [vmem:[%s6643_s14 + $0x10] sm:$0xff] %vm615_vm7, %v570_v33  ;;  %v568_v50 = vpop.permute.xlu0 %567  ;;  %v2132_v22 = vpop.f32.mrf.mxu0  ;;  %v1803_v59 = vadd.f32 %v9122_v21, %v1626_v11  ;;  %v1979_v31 = vadd.f32 %v9124_v1, %v1789_v16  ;;  %v1971_v9 = vadd.f32 %v9126_v45, %v1782_v58 }
 0x1b1   : > { %2346 = vst.msk [vmem:[%s6643_s14 + $0x68] sm:$0xff] %vm392_vm2, %v2283_v28  ;;  %v2301_v49 = vadd.f32 %v7911_v62, %v2139_v60  ;;  %v2133_v14 = vadd.f32 %v2132_v22, %v1955_v0  ;;  %v5787_v18 = vpop.f32.mrf.mxu1  ;;  %6098 = vmatmul.mubr.msk.f32.gmra.mxu1 %vm1200_vm0, %v9123_v41  ;;  %v1796_v62 = vadd.f32 %v7842_v47, %v1620_v55  ;;  %v9128_v47 = vld [vmem:[#allocation28_spill] sm:$0xff] }
 0x1b2   : > { %616 = vst.msk [vmem:[%s6643_s14] sm:$0xff] %vm615_vm7, %v568_v50  ;;  %v5755_v46 = vpop.f32.mrf.mxu0  ;;  %6066 = vmatmul.mubr.msk.f32.gmra.mxu0 %vm1200_vm0, %v9110_v34  ;;  %v1632_v30 = vadd.f32 %v9127_v27, %v1462_v3  ;;  %v1817_v37 = vadd.f32 %v9128_v47, %v1638_v42  ;;  %v1995_v61 = vadd.f32 %v9130_v44, %v1803_v59 }
 0x1b3   : > { %2349 = vst.msk [vmem:[%s6643_s14 + $0x98] sm:$0xff] %vm392_vm2, %v2301_v49  ;;  %v2295_v17 = vadd.f32 %v7926_v12, %v2133_v14  ;;  %v2151_v13 = vadd.f32 %v5755_v46, %v1979_v31  ;;  %v2330_v51 = vpop.f32.mrf.mxu1  ;;  %v574_v56 = vpop.permute.xlu1 %573  ;;  %6068 = vmatprep.mubr.msk.f32.mxu0 %vm1200_vm0, %v9112_v52  ;;  %v1987_v16 = vadd.f32 %v9131_v43, %v1796_v62 }
 0x1b4   : > { %619 = vst.msk [vmem:[%s6643_s14 + $0x30] sm:$0xff] %vm615_vm7, %v574_v56  ;;  %v572_v34 = vpop.permute.xlu0 %571  ;;  %v2144_v2 = vpop.f32.mrf.mxu0  ;;  %v1810_v8 = vadd.f32 %v7861_v38, %v1632_v30  ;;  %v2011_v23 = vadd.f32 %v9133_v6, %v1817_v37 }
 0x1b5   : > { %2348 = vst.msk [vmem:[%s6643_s14 + $0x88] sm:$0xff] %vm392_vm2, %v2295_v17  ;;  %v2313_v12 = vadd.f32 %v7937_v4, %v2151_v13  ;;  %v2145_v20 = vadd.f32 %v2144_v2, %v1971_v9  ;;  %v8017_v52 = vpop.f32.mrf.mxu1 }
 0x1b6   : > { %618 = vst.msk [vmem:[%s6643_s14 + $0x20] sm:$0xff] %vm615_vm7, %v572_v34  ;;  %9129 = vst [vmem:[#allocation14_spill] sm:$0xff] %v8017_v52  ;;  %v5758_v19 = vpop.f32.mrf.mxu0  ;;  %6069 = vmatmul.mubr.msk.f32.gmra.mxu0 %vm1200_vm0, %v9114_v7 }
 0x1b7   : > { %2351 = vst.msk [vmem:[%s6643_s14 + $0xb8] sm:$0xff] %vm392_vm2, %v2313_v12  ;;  %v2307_v53 = vadd.f32 %v7953_v48, %v2145_v20  ;;  %v2163_v4 = vadd.f32 %v5758_v19, %v1995_v61  ;;  %v8026_v63 = vpop.f32.mrf.mxu1  ;;  %6071 = vmatprep.mubr.msk.f32.mxu0 %vm1200_vm0, %v9118_v32  ;;  %v578_v25 = vpop.permute.xlu1 %577  ;;  %v2003_v32 = vadd.f32 %v9134_v35, %v1810_v8 }
 0x1b8   : > { %621 = vst.msk [vmem:[%s6643_s14 + $0x50] sm:$0xff] %vm615_vm7, %v578_v25  ;;  %v576_v24 = vpop.permute.xlu0 %575  ;;  %v2156_v10 = vpop.f32.mrf.mxu0 }
 0x1b9   : > { %2350 = vst.msk [vmem:[%s6643_s14 + $0xa8] sm:$0xff] %vm392_vm2, %v2307_v53  ;;  %v2325_v38 = vadd.f32 %v7965_v57, %v2163_v4  ;;  %v2157_v48 = vadd.f32 %v2156_v10, %v1987_v16  ;;  %v8038_v7 = vpop.f32.mrf.mxu1 }
 0x1ba   : > { %620 = vst.msk [vmem:[%s6643_s14 + $0x40] sm:$0xff] %vm615_vm7, %v576_v24  ;;  %9132 = vst [vmem:[#allocation2_spill] sm:$0xff] %v8038_v7  ;;  %v5761_v39 = vpop.f32.mrf.mxu0  ;;  %6072 = vmatmul.mubr.msk.f32.gmra.mxu0 %vm1200_vm0, %v9123_v41  ;;  %vm838_vm0 = vcmask 785920  }
 0x1bb   : > { %2353 = vst.msk [vmem:[%s6643_s14 + $0xd8] sm:$0xff] %vm392_vm2, %v2325_v38  ;;  %v2319_v5 = vadd.f32 %v2318_v40, %v2157_v48  ;;  %v2175_v29 = vadd.f32 %v5761_v39, %v2011_v23  ;;  %v8045_v11 = vpop.f32.mrf.mxu1  ;;  %v582_v57 = vpop.permute.xlu1 %581 }
 0x1bc   : > { %623 = vst.msk [vmem:[%s6643_s14 + $0x70] sm:$0xff] %vm615_vm7, %v582_v57  ;;  %v580_v58 = vpop.permute.xlu0 %579  ;;  %v2168_v28 = vpop.f32.mrf.mxu0 }
 0x1bd   : > { %2352 = vst.msk [vmem:[%s6643_s14 + $0xc8] sm:$0xff] %vm392_vm2, %v2319_v5  ;;  %v2337_v60 = vadd.f32 %v5787_v18, %v2175_v29  ;;  %v2169_v33 = vadd.f32 %v2168_v28, %v2003_v32  ;;  %v8054_v40 = vpop.f32.mrf.mxu1 }
 0x1be   : > { %622 = vst.msk [vmem:[%s6643_s14 + $0x60] sm:$0xff] %vm615_vm7, %v580_v58  ;;  %9135 = vst [vmem:[#allocation3_spill] sm:$0xff] %v8054_v40  ;;  %v8056_v36 = vpop.f32.mrf.mxu0 }
 0x1bf   : > { %2355 = vst.msk [vmem:[%s6643_s14 + $0xf8] sm:$0xff] %vm392_vm2, %v2337_v60  ;;  %v2331_v0 = vadd.f32 %v2330_v51, %v2169_v33  ;;  %v8060_v54 = vpop.f32.mrf.mxu1  ;;  %v586_v3 = vpop.permute.xlu1 %585 }
 0x1c0   : > { %625 = vst.msk [vmem:[%s6643_s14 + $0x90] sm:$0xff] %vm615_vm7, %v586_v3  ;;  %v584_v15 = vpop.permute.xlu0 %583  ;;  %v8064_v55 = vpop.f32.mrf.mxu0 }
 0x1c1   : > { %2354 = vst.msk [vmem:[%s6643_s14 + $0xe8] sm:$0xff] %vm392_vm2, %v2331_v0  ;;  %v8070_v50 = vpop.f32.mrf.mxu1  ;;  %vm1061_vm2 = vcmask 1048320  }
 0x1c2   : > { %624 = vst.msk [vmem:[%s6643_s14 + $0x80] sm:$0xff] %vm615_vm7, %v584_v15  ;;  %9136 = vst [vmem:[#allocation8_spill] sm:$0xff] %v8070_v50  ;;  %v8072_v22 = vpop.f32.mrf.mxu0  ;;  %v8163_v15 = vld [vmem:[%s8976_s1 + $0x2] ss:$0 sm:$0xff] }
 0x1c3   : > { %9137 = vst [vmem:[#allocation4_spill] sm:$0xff] %v8072_v22  ;;  %v8074_v21 = vpop.f32.mrf.mxu1  ;;  %v590_v59 = vpop.permute.xlu1 %589 }
 0x1c4   : > { %627 = vst.msk [vmem:[%s6643_s14 + $0xb0] sm:$0xff] %vm615_vm7, %v590_v59  ;;  %v588_v49 = vpop.permute.xlu0 %587  ;;  %v8078_v14 = vpop.f32.mrf.mxu0 }
 0x1c5   : > { %626 = vst.msk [vmem:[%s6643_s14 + $0xa0] sm:$0xff] %vm615_vm7, %v588_v49  ;;  %v8082_v18 = vpop.f32.mrf.mxu1 }
 0x1c6   : > { %9138 = vst [vmem:[#allocation9_spill] sm:$0xff] %v8082_v18  ;;  %v8084_v41 = vpop.f32.mrf.mxu0 }
 0x1c7   : > { %9139 = vst [vmem:[#allocation5_spill] sm:$0xff] %v8084_v41  ;;  %v8086_v1 = vpop.f32.mrf.mxu1  ;;  %v594_v31 = vpop.permute.xlu1 %593 }
 0x1c8   : > { %629 = vst.msk [vmem:[%s6643_s14 + $0xd0] sm:$0xff] %vm615_vm7, %v594_v31  ;;  %v592_v26 = vpop.permute.xlu0 %591  ;;  %v8090_v42 = vpop.f32.mrf.mxu0 }
 0x1c9   : > { %628 = vst.msk [vmem:[%s6643_s14 + $0xc0] sm:$0xff] %vm615_vm7, %v592_v26  ;;  %v8094_v46 = vpop.f32.mrf.mxu1 }
 0x1ca   : > { %9140 = vst [vmem:[#allocation19_spill] sm:$0xff] %v8094_v46  ;;  %v8096_v62 = vpop.f32.mrf.mxu0 }
 0x1cb   : > { %9141 = vst [vmem:[#allocation16_spill] sm:$0xff] %v8096_v62  ;;  %v8098_v17 = vpop.f32.mrf.mxu1  ;;  %v598_v13 = vpop.permute.xlu1 %597 }
 0x1cc   : > { %631 = vst.msk [vmem:[%s6643_s14 + $0xf0] sm:$0xff] %vm615_vm7, %v598_v13  ;;  %v596_v51 = vpop.permute.xlu0 %595  ;;  %v8102_v56 = vpop.f32.mrf.mxu0 }
 0x1cd   : > { %630 = vst.msk [vmem:[%s6643_s14 + $0xe0] sm:$0xff] %vm615_vm7, %v596_v51  ;;  %v8106_v45 = vpop.f32.mrf.mxu1 }
 0x1ce   : > { %9142 = vst [vmem:[#allocation10_spill] sm:$0xff] %v8106_v45  ;;  %v8108_v9 = vpop.f32.mrf.mxu0 }
 0x1cf   : > { %9143 = vst [vmem:[#allocation6_spill] sm:$0xff] %v8108_v9  ;;  %v8110_v27 = vpop.f32.mrf.mxu1 }
 0x1d0   : > { %v8112_v30 = vpop.f32.mrf.mxu0 }
 0x1d1   : > { %v8114_v34 = vpop.f32.mrf.mxu1 }
 0x1d2   : > { %9144 = vst [vmem:[#allocation20_spill] sm:$0xff] %v8114_v34  ;;  %v8116_v2 = vpop.f32.mrf.mxu0 }
 0x1d3   : > { %9145 = vst [vmem:[#allocation18_spill] sm:$0xff] %v8116_v2  ;;  %v8118_v47 = vpop.f32.mrf.mxu1 }
 0x1d4   : > { %v8120_v37 = vpop.f32.mrf.mxu0 }
 0x1d5   : > { %v8124_v20 = vpop.f32.mrf.mxu1 }
 0x1d6   : > { %v8122_v12 = vpop.f32.mrf.mxu0  ;;  %9147 = vst [vmem:[#allocation27_spill] sm:$0xff] %v8124_v20 }
 0x1d7   : > { %9146 = vst [vmem:[#allocation11_spill] sm:$0xff] %v8122_v12  ;;  %v8130_v8 = vpop.f32.mrf.mxu1 }
 0x1d8   : > { %v8126_v44 = vpop.f32.mrf.mxu0  ;;  %v657_v61 = vpop.permute.xlu1 %656 }
 0x1d9   : > { %v8136_v43 = vpop.f32.mrf.mxu1  ;;  %v734_v51 = vmul.f32 %v8163_v15, %v657_v61 }
 0x1da   : > { %v8128_v19 = vpop.f32.mrf.mxu0  ;;  %9150 = vst [vmem:[#allocation12_spill] sm:$0xff] %v8136_v43  ;;  %v652_v38 = vpop.permute.xlu0 %651 }
 0x1db   : > { %9148 = vst [vmem:[#allocation7_spill] sm:$0xff] %v8128_v19  ;;  %v8142_v48 = vpop.f32.mrf.mxu1  ;;  %v733_v31 = vmul.f32 %v8163_v15, %v652_v38 }
 0x1dc   : > { %v8132_v53 = vpop.f32.mrf.mxu0  ;;  %v662_v4 = vpop.permute.xlu1 %661 }
 0x1dd   : > { %v8148_v5 = vpop.f32.mrf.mxu1  ;;  %v735_v18 = vmul.f32 %v8163_v15, %v662_v4 }
 0x1de   : > { %v8134_v25 = vpop.f32.mrf.mxu0  ;;  %9153 = vst [vmem:[#allocation28_spill] sm:$0xff] %v8148_v5  ;;  %v667_v35 = vpop.permute.xlu0 %666 }
 0x1df   : > { %9149 = vst [vmem:[#allocation21_spill] sm:$0xff] %v8134_v25  ;;  %v8152_v32 = vpop.f32.mrf.mxu1  ;;  %v736_v45 = vmul.f32 %v8163_v15, %v667_v35 }
 0x1e0   : > { %v8138_v16 = vpop.f32.mrf.mxu0  ;;  %v672_v24 = vpop.permute.xlu1 %671 }
 0x1e1   : > { %v8156_v60 = vpop.f32.mrf.mxu1 }
 0x1e2   : > { %v8140_v10 = vpop.f32.mrf.mxu0  ;;  %9155 = vst [vmem:[#allocation24_spill] sm:$0xff] %v8156_v60  ;;  %v677_v33 = vpop.permute.xlu0 %676 }
 0x1e3   : > { %9151 = vst [vmem:[#allocation22_spill] sm:$0xff] %v8140_v10  ;;  %v8165_v59 = vpop.f32.mrf.mxu1 }
 0x1e4   : > { %v8144_v6 = vpop.f32.mrf.mxu0  ;;  %v682_v23 = vpop.permute.xlu1 %681 }
 0x1e5   : > { %v8173_v34 = vpop.f32.mrf.mxu1 }
 0x1e6   : > { %v8146_v39 = vpop.f32.mrf.mxu0  ;;  %v687_v13 = vpop.permute.xlu0 %686  ;;  %9157 = vst [vmem:[#allocation26_spill] sm:$0xff] %v8173_v34  ;;  %v738_v34 = vmul.f32 %v8163_v15, %v677_v33 }
 0x1e7   : > { %9152 = vst [vmem:[#allocation13_spill] sm:$0xff] %v8146_v39  ;;  %v8185_v38 = vpop.f32.mrf.mxu1  ;;  %v740_v4 = vmul.f32 %v8163_v15, %v687_v13 }
 0x1e8   : > { %v692_v29 = vpop.permute.xlu1 %691  ;;  %v8150_v57 = vpop.f32.mrf.mxu0 }
 0x1ea   : > { %v8154_v28 = vpop.f32.mrf.mxu0  ;;  %v697_v61 = vpop.permute.xlu0 %696 }
 0x1eb   : > { %9154 = vst [vmem:[#allocation23_spill] sm:$0xff] %v8154_v28  ;;  %v869_v28 = vld [vmem:[%s6281_s29 + $0x70] sm:$0xff] }
 0x1ec   : > { %v702_v58 = vpop.permute.xlu1 %701  ;;  %v8158_v3 = vpop.f32.mrf.mxu0 }
 0x1ee   : > { %v8170_v26 = vpop.f32.mrf.mxu0 }
 0x1ef   : > { %9156 = vst [vmem:[#allocation25_spill] sm:$0xff] %v8170_v26 }
 0x1f0   : > { %v712_v0 = vpop.permute.xlu1 %711  ;;  %v8178_v12 = vpop.f32.mrf.mxu0 }
 0x1f2   : > { %v8188_v26 = vpop.f32.mrf.mxu0 }
 0x1f3   : > { %9158 = vst [vmem:[#allocation29_spill] sm:$0xff] %v8188_v26  ;;  %v707_v26 = vpop.permute.xlu0 %706 }
 0x1f4   : > { %v8167_v49 = vpop.permute.xlu1 %721 }
 0x1f8   : > { %v8175_v19 = vpop.permute.xlu1 %755 }
 0x1f9   : > { %v759_v46 = vadd.f32 %v8175_v19, %v734_v51  ;;  %v758_v60 = vadd.f32 %v8175_v19, %v733_v31  ;;  %v760_v35 = vadd.f32 %v8175_v19, %v735_v18  ;;  %v761_v5 = vadd.f32 %v8175_v19, %v736_v45 }
 0x1fa   : > { %v737_v51 = vmul.f32 %v8163_v15, %v672_v24  ;;  %v763_v31 = vadd.f32 %v8175_v19, %v738_v34  ;;  %v739_v18 = vmul.f32 %v8163_v15, %v682_v23  ;;  %v742_v24 = vmul.f32 %v8163_v15, %v697_v61  ;;  %v717_v23 = vpop.permute.xlu0 %716 }
 0x1fb   : > { %792 = vrot.lane.b32.xlu1 %v759_v46, %s6145_s24  ;;  %790 = vrot.lane.b32.xlu0 %v758_v60, %s6145_s24  ;;  %v8195_v46 = vpop.f32.mrf.mxu1  ;;  %v8198_v60 = vpop.f32.mrf.mxu0 }
 0x1fc   : > { %9159 = vst [vmem:[#allocation30_spill] sm:$0xff] %v8195_v46  ;;  %v762_v33 = vadd.f32 %v8175_v19, %v737_v51  ;;  %v764_v13 = vadd.f32 %v8175_v19, %v739_v18  ;;  %v741_v51 = vmul.f32 %v8163_v15, %v692_v29  ;;  %v743_v18 = vmul.f32 %v8163_v15, %v702_v58  ;;  %v863_v46 = vld [vmem:[%s6281_s29 + $0x40] sm:$0xff] }
 0x1fd   : > { %v8205_v45 = vpop.f32.mrf.mxu1 }
 0x1fe   : > { %v766_v61 = vadd.f32 %v8175_v19, %v741_v51  ;;  %v745_v51 = vmul.f32 %v8163_v15, %v712_v0 }
 0x1ff   : > { %794 = vrot.lane.b32.xlu0 %v760_v35, %s6145_s24  ;;  %796 = vrot.lane.b32.xlu1 %v761_v5, %s6145_s24  ;;  %v8208_v5 = vpop.f32.mrf.mxu0  ;;  %v765_v35 = vadd.f32 %v8175_v19, %v740_v4  ;;  %v8215_v34 = vpop.f32.mrf.mxu1  ;;  %v746_v4 = vmul.f32 %v8163_v15, %v717_v23 }
 0x200   : > { %9160 = vst [vmem:[#allocation31_spill] sm:$0xff] %v8208_v5  ;;  %9161 = vst [vmem:[#allocation32_spill] sm:$0xff] %v8215_v34  ;;  %v767_v5 = vadd.f32 %v8175_v19, %v742_v24  ;;  %v727_v34 = vpop.permute.xlu0 %726  ;;  %v770_v23 = vadd.f32 %v8175_v19, %v745_v51 }
 0x201   : > { %v8225_v29 = vpop.f32.mrf.mxu1  ;;  %v748_v24 = vmul.f32 %v8163_v15, %v727_v34 }
 0x203   : > { %798 = vrot.lane.b32.xlu0 %v762_v33, %s6145_s24  ;;  %800 = vrot.lane.b32.xlu1 %v763_v31, %s6145_s24  ;;  %v744_v33 = vmul.f32 %v8163_v15, %v707_v26  ;;  %v8218_v31 = vpop.f32.mrf.mxu0  ;;  %v768_v26 = vadd.f32 %v8175_v19, %v743_v18  ;;  %v8235_v58 = vpop.f32.mrf.mxu1 }
 0x204   : > { %9163 = vst [vmem:[#allocation34_spill] sm:$0xff] %v8235_v58  ;;  %v861_v58 = vld [vmem:[%s6281_s29 + $0x30] sm:$0xff] }
 0x205   : > { %v8246_v0 = vpop.f32.mrf.mxu1 }
 0x207   : > { %802 = vrot.lane.b32.xlu0 %v764_v13, %s6145_s24  ;;  %804 = vrot.lane.b32.xlu1 %v765_v35, %s6145_s24  ;;  %v8228_v13 = vpop.f32.mrf.mxu0  ;;  %v769_v35 = vadd.f32 %v8175_v19, %v744_v33  ;;  %v747_v33 = vmul.f32 %v8163_v15, %v8167_v49  ;;  %v8254_v15 = vpop.f32.mrf.mxu1  ;;  %v855_v49 = vld [vmem:[%s6281_s29] sm:$0xff] }
 0x208   : > { %9162 = vst [vmem:[#allocation33_spill] sm:$0xff] %v8228_v13  ;;  %9165 = vst [vmem:[#allocation36_spill] sm:$0xff] %v8254_v15  ;;  %v867_v15 = vld [vmem:[%s6281_s29 + $0x60] sm:$0xff] }
 0x209   : > { %v772_v34 = vadd.f32 %v8175_v19, %v747_v33  ;;  %v8260_v51 = vpop.f32.mrf.mxu1  ;;  %v860_v33 = vld [vmem:[%s6281_s29 + $0x28] sm:$0xff] }
 0x20b   : > { %806 = vrot.lane.b32.xlu0 %v766_v61, %s6145_s24  ;;  %808 = vrot.lane.b32.xlu1 %v767_v5, %s6145_s24  ;;  %v8238_v5 = vpop.f32.mrf.mxu0  ;;  %v771_v61 = vadd.f32 %v8175_v19, %v746_v4  ;;  %v856_v4 = vld [vmem:[%s6281_s29 + $0x8] sm:$0xff] }
 0x20d   : > { %v8248_v18 = vpop.f32.mrf.mxu0 }
 0x20e   : > { %9164 = vst [vmem:[#allocation35_spill] sm:$0xff] %v8248_v18  ;;  %v9177_v18 = vmov 2  }
 0x20f   : > { %810 = vrot.lane.b32.xlu0 %v768_v26, %s6145_s24  ;;  %812 = vrot.lane.b32.xlu1 %v769_v35, %s6145_s24  ;;  %v773_v26 = vadd.f32 %v8175_v19, %v748_v24  ;;  %v8258_v35 = vpop.f32.mrf.mxu0  ;;  %v857_v19 = vld [vmem:[%s6281_s29 + $0x10] sm:$0xff] }
 0x211   : > { %v8264_v24 = vpop.f32.mrf.mxu0 }
 0x212   : > { %9166 = vst [vmem:[#allocation37_spill] sm:$0xff] %v8264_v24 }
 0x213   : > { %814 = vrot.lane.b32.xlu0 %v770_v23, %s6145_s24  ;;  %816 = vrot.lane.b32.xlu1 %v771_v61, %s6145_s24  ;;  %v858_v23 = vld [vmem:[%s6281_s29 + $0x18] sm:$0xff]  ;;  %v8266_v61 = vpop.f32.mrf.mxu1 }
 0x214   : > { %9167 = vst [vmem:[#allocation38_spill] sm:$0xff] %v8266_v61 }
 0x217   : > { %818 = vrot.lane.b32.xlu0 %v772_v34, %s6145_s24  ;;  %820 = vrot.lane.b32.xlu1 %v773_v26, %s6145_s24  ;;  %v859_v34 = vld [vmem:[%s6281_s29 + $0x20] sm:$0xff]  ;;  %v8270_v26 = vpop.f32.mrf.mxu0 }
 0x219   : > { %v8276_v13 = vpop.f32.mrf.mxu0 }
 0x21a   : > { %9168 = vst [vmem:[#allocation39_spill] sm:$0xff] %v8276_v13 }
 0x21b   : > { %874 = vperm.xlu0 %6128, %v855_v49   ;;  %879 = vperm.xlu1 %6129, %v856_v4   ;;  %v8272_v49 = vpop.f32.mrf.mxu1  ;;  %v862_v4 = vld [vmem:[%s6281_s29 + $0x38] sm:$0xff]  ;;  %v8282_v61 = vpop.f32.mrf.mxu0 }
 0x21d   : > { %v8289_v13 = vpop.f32.mrf.mxu0 }
 0x21e   : > { %9170 = vst [vmem:[#allocation41_spill] sm:$0xff] %v8289_v13 }
 0x21f   : > { %889 = vperm.xlu0 %6128, %v858_v23   ;;  %884 = vperm.xlu1 %6129, %v857_v19   ;;  %v8278_v23 = vpop.f32.mrf.mxu1  ;;  %v864_v19 = vld [vmem:[%s6281_s29 + $0x48] sm:$0xff]  ;;  %v8297_v24 = vpop.f32.mrf.mxu0 }
 0x220   : > { %9169 = vst [vmem:[#allocation40_spill] sm:$0xff] %v8278_v23  ;;  %v865_v23 = vld [vmem:[%s6281_s29 + $0x50] sm:$0xff] }
 0x221   : > { %v8303_v2 = vpop.f32.mrf.mxu0 }
 0x222   : > { %9172 = vst [vmem:[#allocation43_spill] sm:$0xff] %v8303_v2 }
 0x223   : > { %899 = vperm.xlu0 %6128, %v860_v33   ;;  %894 = vperm.xlu1 %6129, %v859_v34   ;;  %v8284_v33 = vpop.f32.mrf.mxu1  ;;  %v5274_v34 = vld [vmem:[%s8979_s4 + $0x1] ss:$0 sm:$0xff] }
 0x227   : > { %909 = vperm.xlu0 %6128, %v862_v4   ;;  %904 = vperm.xlu1 %6129, %v861_v58   ;;  %v8293_v58 = vpop.f32.mrf.mxu1  ;;  %v866_v4 = vld [vmem:[%s6281_s29 + $0x58] sm:$0xff] }
 0x228   : > { %9171 = vst [vmem:[#allocation42_spill] sm:$0xff] %v8293_v58  ;;  %v9174_v58 = vld [vmem:[#allocation15_spill] sm:$0xff] }
 0x22b   : > { %919 = vperm.xlu0 %6128, %v864_v19   ;;  %914 = vperm.xlu1 %6129, %v863_v46   ;;  %v8299_v46 = vpop.f32.mrf.mxu1  ;;  %v868_v19 = vld [vmem:[%s6281_s29 + $0x68] sm:$0xff] }
 0x22d   : > { %v8305_v13 = vpop.f32.mrf.mxu1 }
 0x22e   : > { %9173 = vst [vmem:[#allocation44_spill] sm:$0xff] %v8305_v13 }
 0x22f   : > { %3816 = vrot.lane.b32.xlu0 %v5274_v34, %s6145_s24  ;;  %2475 = vrot.lane.b32.xlu1 %v5274_v34, %s6143_s15  ;;  %v8308_v34 = vpop.f32.mrf.mxu0  ;;  %v8311_v9 = vpop.f32.mrf.mxu1 }
 0x231   : > { %v8318_v2 = vpop.f32.mrf.mxu1 }
 0x233   : > { %929 = vperm.xlu0 %6128, %v866_v4   ;;  %924 = vperm.xlu1 %6129, %v865_v23   ;;  %v8313_v4 = vpop.f32.mrf.mxu0  ;;  %v9176_v23 = vld [vmem:[#allocation17_spill] sm:$0xff] }
 0x234   : > { %9175 = vst [vmem:[#allocation15_spill] sm:$0xff] %v8313_v4  ;;  %9178 = vst [vmem:[#allocation17_spill] sm:$0xff] %v8318_v2 }
 0x237   : > { %939 = vperm.xlu0 %6128, %v868_v19   ;;  %934 = vperm.xlu1 %6129, %v867_v15   ;;  %v8320_v15 = vpop.f32.mrf.mxu0  ;;  %v8322_v19 = vpop.f32.mrf.mxu1 }
 0x239   : > { %v8324_v13 = vpop.f32.mrf.mxu0  ;;  %v8326_v50 = vpop.f32.mrf.mxu1 }
 0x23a   : > { %9179 = vst [vmem:[#allocation45_spill] sm:$0xff] %v8324_v13  ;;  %9180 = vst [vmem:[#allocation46_spill] sm:$0xff] %v8326_v50 }
 0x23b   : > { %949 = vperm.xlu0 %6128, %v9174_v58   ;;  %944 = vperm.xlu1 %6129, %v869_v28   ;;  %v8328_v28 = vpop.f32.mrf.mxu0  ;;  %v8330_v58 = vpop.f32.mrf.mxu1 }
 0x23c   : > { %9181 = vst [vmem:[#allocation47_spill] sm:$0xff] %v8330_v58 }
 0x23d   : > { %v8332_v4 = vpop.f32.mrf.mxu0  ;;  %v8334_v39 = vpop.f32.mrf.mxu1 }
 0x23e   : > { %9182 = vst [vmem:[#allocation48_spill] sm:$0xff] %v8332_v4  ;;  %9183 = vst [vmem:[#allocation49_spill] sm:$0xff] %v8334_v39 }
 0x23f   : > { %978 = vrot.lane.b32.xlu1 %v9176_v23, %s6144_s21  ;;  %6130 = vset.pattern.permute.xlu0 %v9177_v18  ;;  %v8336_v23 = vpop.f32.mrf.mxu0  ;;  %v8338_v18 = vpop.f32.mrf.mxu1 }
 0x240   : > { %9184 = vst [vmem:[#allocation50_spill] sm:$0xff] %v8336_v23  ;;  %9185 = vst [vmem:[#allocation51_spill] sm:$0xff] %v8338_v18 }
 0x241   : > { %v8340_v2 = vpop.f32.mrf.mxu0  ;;  %v8342_v43 = vpop.f32.mrf.mxu1 }
 0x242   : > { %9186 = vst [vmem:[#allocation52_spill] sm:$0xff] %v8340_v2  ;;  %9187 = vst [vmem:[#allocation53_spill] sm:$0xff] %v8342_v43 }
 0x243   : > { %v8344_v13 = vpop.f32.mrf.mxu0  ;;  %v8346_v50 = vpop.f32.mrf.mxu1 }
 0x244   : > { %9188 = vst [vmem:[#allocation54_spill] sm:$0xff] %v8344_v13  ;;  %9189 = vst [vmem:[#allocation55_spill] sm:$0xff] %v8346_v50 }
 0x245   : > { %v8348_v20 = vpop.f32.mrf.mxu0  ;;  %v8350_v62 = vpop.f32.mrf.mxu1 }
 0x246   : > { %9190 = vst [vmem:[#allocation56_spill] sm:$0xff] %v8348_v20  ;;  %9191 = vst [vmem:[#allocation57_spill] sm:$0xff] %v8350_v62 }
 0x247   : > { %v8352_v39 = vpop.f32.mrf.mxu0  ;;  %v8354_v4 = vpop.f32.mrf.mxu1 }
 0x248   : > { %9192 = vst [vmem:[#allocation58_spill] sm:$0xff] %v8352_v39  ;;  %9193 = vst [vmem:[#allocation59_spill] sm:$0xff] %v8354_v4 }
 0x249   : > { %v8356_v40 = vpop.f32.mrf.mxu0  ;;  %v8358_v2 = vpop.f32.mrf.mxu1 }
 0x24a   : > { %9194 = vst [vmem:[#allocation60_spill] sm:$0xff] %v8356_v40  ;;  %9195 = vst [vmem:[#allocation61_spill] sm:$0xff] %v8358_v2 }
 0x24b   : > { %v8360_v43 = vpop.f32.mrf.mxu0  ;;  %v8362_v13 = vpop.f32.mrf.mxu1 }
 0x24c   : > { %9196 = vst [vmem:[#allocation62_spill] sm:$0xff] %v8360_v43  ;;  %9197 = vst [vmem:[#allocation63_spill] sm:$0xff] %v8362_v13 }
 0x24d   : > { %v8364_v50 = vpop.f32.mrf.mxu0  ;;  %v8370_v4 = vpop.f32.mrf.mxu1 }
 0x24e   : > { %9198 = vst [vmem:[#allocation64_spill] sm:$0xff] %v8364_v50  ;;  %9199 = vst [vmem:[#allocation65_spill] sm:$0xff] %v8370_v4 }
 0x24f   : > { %v8372_v40 = vpop.f32.mrf.mxu0  ;;  %v8378_v50 = vpop.f32.mrf.mxu1 }
 0x250   : > { %9200 = vst [vmem:[#allocation66_spill] sm:$0xff] %v8372_v40  ;;  %9201 = vst [vmem:[#allocation67_spill] sm:$0xff] %v8378_v50 }
 0x251   : > { %v8380_v13 = vpop.f32.mrf.mxu0  ;;  %v8386_v4 = vpop.f32.mrf.mxu1 }
 0x252   : > { %9202 = vst [vmem:[#allocation68_spill] sm:$0xff] %v8380_v13  ;;  %9203 = vst [vmem:[#allocation69_spill] sm:$0xff] %v8386_v4 }
 0x253   : > { %v8388_v40 = vpop.f32.mrf.mxu0  ;;  %v8394_v13 = vpop.f32.mrf.mxu1 }
 0x254   : > { %9204 = vst [vmem:[#allocation70_spill] sm:$0xff] %v8388_v40  ;;  %9205 = vst [vmem:[#allocation71_spill] sm:$0xff] %v8394_v13 }
 0x255   : > { %v8396_v50 = vpop.f32.mrf.mxu0  ;;  %v8402_v4 = vpop.f32.mrf.mxu1 }
 0x256   : > { %9206 = vst [vmem:[#allocation72_spill] sm:$0xff] %v8396_v50  ;;  %9207 = vst [vmem:[#allocation73_spill] sm:$0xff] %v8402_v4 }
 0x257   : > { %v8404_v40 = vpop.f32.mrf.mxu0  ;;  %v8410_v50 = vpop.f32.mrf.mxu1 }
 0x258   : > { %9208 = vst [vmem:[#allocation74_spill] sm:$0xff] %v8404_v40  ;;  %9209 = vst [vmem:[#allocation75_spill] sm:$0xff] %v8410_v50 }
 0x259   : > { %v8412_v13 = vpop.f32.mrf.mxu0  ;;  %v8418_v4 = vpop.f32.mrf.mxu1 }
 0x25a   : > { %9210 = vst [vmem:[#allocation76_spill] sm:$0xff] %v8412_v13  ;;  %9211 = vst [vmem:[#allocation77_spill] sm:$0xff] %v8418_v4 }
 0x25b   : > { %v8420_v40 = vpop.f32.mrf.mxu0 }
 0x25c   : > { %9212 = vst [vmem:[#allocation78_spill] sm:$0xff] %v8420_v40 }
 0x25d   : > { %v8428_v50 = vpop.f32.mrf.mxu0 }
 0x25e   : > { %9214 = vst [vmem:[#allocation80_spill] sm:$0xff] %v8428_v50 }
 0x26d   : > { %v793_v62 = vpop.permute.xlu1 %792  ;;  %v791_v20 = vpop.permute.xlu0 %790 }
 0x26e   : > { %840 = vst.msk [vmem:[%s6643_s14 + $0x10] sm:$0xff] %vm838_vm0, %v793_v62  ;;  %839 = vst.msk [vmem:[%s6643_s14] sm:$0xff] %vm838_vm0, %v791_v20 }
 0x271   : > { %v797_v2 = vpop.permute.xlu1 %796  ;;  %v795_v43 = vpop.permute.xlu0 %794 }
 0x272   : > { %842 = vst.msk [vmem:[%s6643_s14 + $0x30] sm:$0xff] %vm838_vm0, %v797_v2  ;;  %841 = vst.msk [vmem:[%s6643_s14 + $0x20] sm:$0xff] %vm838_vm0, %v795_v43 }
 0x275   : > { %v801_v62 = vpop.permute.xlu1 %800  ;;  %v799_v20 = vpop.permute.xlu0 %798 }
 0x276   : > { %844 = vst.msk [vmem:[%s6643_s14 + $0x50] sm:$0xff] %vm838_vm0, %v801_v62  ;;  %843 = vst.msk [vmem:[%s6643_s14 + $0x40] sm:$0xff] %vm838_vm0, %v799_v20 }
 0x279   : > { %v805_v2 = vpop.permute.xlu1 %804  ;;  %v803_v43 = vpop.permute.xlu0 %802 }
 0x27a   : > { %846 = vst.msk [vmem:[%s6643_s14 + $0x70] sm:$0xff] %vm838_vm0, %v805_v2  ;;  %845 = vst.msk [vmem:[%s6643_s14 + $0x60] sm:$0xff] %vm838_vm0, %v803_v43 }
 0x27d   : > { %v809_v62 = vpop.permute.xlu1 %808  ;;  %v807_v20 = vpop.permute.xlu0 %806 }
 0x27e   : > { %848 = vst.msk [vmem:[%s6643_s14 + $0x90] sm:$0xff] %vm838_vm0, %v809_v62  ;;  %847 = vst.msk [vmem:[%s6643_s14 + $0x80] sm:$0xff] %vm838_vm0, %v807_v20 }
 0x281   : > { %v813_v2 = vpop.permute.xlu1 %812  ;;  %v811_v43 = vpop.permute.xlu0 %810 }
 0x282   : > { %850 = vst.msk [vmem:[%s6643_s14 + $0xb0] sm:$0xff] %vm838_vm0, %v813_v2  ;;  %849 = vst.msk [vmem:[%s6643_s14 + $0xa0] sm:$0xff] %vm838_vm0, %v811_v43  ;;  %v8426_v43 = vpop.f32.mrf.mxu1 }
 0x283   : > { %9213 = vst [vmem:[#allocation79_spill] sm:$0xff] %v8426_v43 }
 0x284   : > { %v8430_v13 = vpop.f32.mrf.mxu1 }
 0x285   : > { %v817_v62 = vpop.permute.xlu1 %816  ;;  %v815_v20 = vpop.permute.xlu0 %814  ;;  %9215 = vst [vmem:[#allocation81_spill] sm:$0xff] %v8430_v13 }
 0x286   : > { %852 = vst.msk [vmem:[%s6643_s14 + $0xd0] sm:$0xff] %vm838_vm0, %v817_v62  ;;  %851 = vst.msk [vmem:[%s6643_s14 + $0xc0] sm:$0xff] %vm838_vm0, %v815_v20  ;;  %v8432_v62 = vpop.f32.mrf.mxu0  ;;  %v8434_v10 = vpop.f32.mrf.mxu1 }
 0x287   : > { %9216 = vst [vmem:[#allocation82_spill] sm:$0xff] %v8432_v62  ;;  %9217 = vst [vmem:[#allocation83_spill] sm:$0xff] %v8434_v10 }
 0x288   : > { %v8436_v20 = vpop.f32.mrf.mxu0  ;;  %v8438_v40 = vpop.f32.mrf.mxu1 }
 0x289   : > { %v821_v39 = vpop.permute.xlu1 %820  ;;  %v819_v2 = vpop.permute.xlu0 %818  ;;  %9218 = vst [vmem:[#allocation84_spill] sm:$0xff] %v8436_v20  ;;  %9219 = vst [vmem:[#allocation85_spill] sm:$0xff] %v8438_v40 }
 0x28a   : > { %854 = vst.msk [vmem:[%s6643_s14 + $0xf0] sm:$0xff] %vm838_vm0, %v821_v39  ;;  %853 = vst.msk [vmem:[%s6643_s14 + $0xe0] sm:$0xff] %vm838_vm0, %v819_v2  ;;  %v8440_v25 = vpop.f32.mrf.mxu0  ;;  %v8444_v2 = vpop.f32.mrf.mxu1 }
 0x28b   : > { %9220 = vst [vmem:[#allocation86_spill] sm:$0xff] %v8440_v25  ;;  %9221 = vst [vmem:[#allocation87_spill] sm:$0xff] %v8444_v2 }
 0x28c   : > { %v8446_v43 = vpop.f32.mrf.mxu0  ;;  %v8450_v13 = vpop.f32.mrf.mxu1 }
 0x28d   : > { %9222 = vst [vmem:[#allocation88_spill] sm:$0xff] %v8446_v43  ;;  %9223 = vst [vmem:[#allocation89_spill] sm:$0xff] %v8450_v13 }
 0x28e   : > { %v8452_v62 = vpop.f32.mrf.mxu0  ;;  %v8456_v20 = vpop.f32.mrf.mxu1 }
 0x28f   : > { %9224 = vst [vmem:[#allocation90_spill] sm:$0xff] %v8452_v62  ;;  %9225 = vst [vmem:[#allocation91_spill] sm:$0xff] %v8456_v20 }
 0x290   : > { %v8458_v40 = vpop.f32.mrf.mxu0  ;;  %v8462_v52 = vpop.f32.mrf.mxu1 }
 0x291   : > { %9226 = vst [vmem:[#allocation92_spill] sm:$0xff] %v8458_v40  ;;  %9228 = vst [vmem:[#allocation94_spill] sm:$0xff] %v8462_v52 }
 0x292   : > { %v8464_v2 = vpop.f32.mrf.mxu0  ;;  %v8476_v18 = vpop.f32.mrf.mxu1 }
 0x293   : > { %9229 = vst [vmem:[#allocation95_spill] sm:$0xff] %v8464_v2  ;;  %9230 = vst [vmem:[#allocation96_spill] sm:$0xff] %v8476_v18 }
 0x294   : > { %v8478_v22 = vpop.f32.mrf.mxu0  ;;  %v8489_v18 = vpop.f32.mrf.mxu1 }
 0x295   : > { %9231 = vst [vmem:[#allocation97_spill] sm:$0xff] %v8478_v22 }
 0x296   : > { %v880_v4 = vpop.permute.xlu1 %879  ;;  %v875_v10 = vpop.permute.xlu0 %874 }
 0x297   : > { %v8491_v22 = vpop.f32.mrf.mxu0 }
 0x29a   : > { %v8442_v39 = vpop.permute.xlu1 %884  ;;  %v890_v7 = vpop.permute.xlu0 %889 }
 0x29e   : > { %v8448_v50 = vpop.permute.xlu1 %894 }
 0x2a2   : > { %v8454_v41 = vpop.permute.xlu1 %904 }
 0x2a6   : > { %v8460_v25 = vpop.permute.xlu1 %914 }
 0x2a7   : > { %9227 = vst [vmem:[#allocation93_spill] sm:$0xff] %v8460_v25  ;;  %v900_v25 = vpop.permute.xlu0 %899 }
 0x2aa   : > { %v8466_v43 = vpop.permute.xlu1 %2475 }
 0x2ab   : > { %v2599_v13 = vadd.f32 %v8064_v55, %v8466_v43  ;;  %v2619_v62 = vadd.f32 %v8078_v14, %v8466_v43  ;;  %v2639_v20 = vadd.f32 %v8090_v42, %v8466_v43  ;;  %v2659_v40 = vadd.f32 %v8102_v56, %v8466_v43 }
 0x2ad   : > { %v2825_v52 = vadd.f32 %v8026_v63, %v2599_v13  ;;  %v2837_v2 = vadd.f32 %v8045_v11, %v2619_v62  ;;  %v2849_v55 = vadd.f32 %v8060_v54, %v2639_v20  ;;  %v2861_v14 = vadd.f32 %v8074_v21, %v2659_v40  ;;  %v910_v21 = vpop.permute.xlu0 %909  ;;  %v8504_v62 = vpop.f32.mrf.mxu0 }
 0x2ae   : > { %v8482_v23 = vpop.permute.xlu1 %924 }
 0x2af   : > { %v2989_v42 = vadd.f32 %v8138_v16, %v2825_v52  ;;  %v3003_v58 = vadd.f32 %v8144_v6, %v2837_v2  ;;  %v3017_v56 = vadd.f32 %v8150_v57, %v2849_v55  ;;  %v3031_v11 = vadd.f32 %v8158_v3, %v2861_v14  ;;  %v8502_v57 = vpop.f32.mrf.mxu1  ;;  %v8530_v20 = vpop.f32.mrf.mxu0 }
 0x2b1   : > { %v3168_v63 = vadd.f32 %v8130_v8, %v2989_v42  ;;  %v3184_v54 = vadd.f32 %v8142_v48, %v3003_v58  ;;  %v3200_v40 = vadd.f32 %v8152_v32, %v3017_v56  ;;  %v3216_v3 = vadd.f32 %v8165_v59, %v3031_v11  ;;  %v8513_v48 = vld [vmem:[%s8976_s1 + $0x3] ss:$0 sm:$0xff]  ;;  %v8528_v58 = vpop.f32.mrf.mxu1 }
 0x2b2   : > { %v8495_v13 = vpop.permute.xlu1 %934  ;;  %v2699_v59 = vadd.f32 %v8120_v37, %v8466_v43  ;;  %v957_v2 = vmul.f32 %v8513_v48, %v880_v4  ;;  %v2719_v56 = vadd.f32 %v8126_v44, %v8466_v43 }
 0x2b3   : > { %v3362_v52 = vadd.f32 %v8258_v35, %v3168_v63  ;;  %v3374_v16 = vadd.f32 %v8270_v26, %v3184_v54  ;;  %v3386_v6 = vadd.f32 %v8282_v61, %v3200_v40  ;;  %v3398_v26 = vadd.f32 %v8297_v24, %v3216_v3  ;;  %v8545_v4 = vpop.f32.mrf.mxu1  ;;  %v8552_v63 = vpop.f32.mrf.mxu0 }
 0x2b4   : > { %v2885_v42 = vadd.f32 %v8098_v17, %v2699_v59  ;;  %v960_v54 = vmul.f32 %v8513_v48, %v8448_v50  ;;  %v2739_v40 = vadd.f32 %v8132_v53, %v8466_v43 }
 0x2b5   : > { %v8507_v8 = vadd.f32 %v8260_v51, %v3362_v52  ;;  %v8518_v35 = vadd.f32 %v8272_v49, %v3374_v16  ;;  %v8521_v61 = vadd.f32 %v8284_v33, %v3386_v6  ;;  %v2679_v51 = vadd.f32 %v8112_v30, %v8466_v43  ;;  %v920_v33 = vpop.permute.xlu0 %919  ;;  %v8565_v52 = vpop.f32.mrf.mxu1 }
 0x2b6   : > { %v8515_v32 = vpop.permute.xlu1 %944  ;;  %v956_v49 = vmul.f32 %v8513_v48, %v875_v10  ;;  %v8535_v55 = vadd.f32 %v8299_v46, %v3398_v26  ;;  %v958_v10 = vmul.f32 %v8513_v48, %v8442_v39  ;;  %v959_v46 = vmul.f32 %v8513_v48, %v890_v7  ;;  %v8572_v50 = vpop.f32.mrf.mxu0 }
 0x2b7   : > { %v2873_v37 = vadd.f32 %v8086_v1, %v2679_v51  ;;  %v3059_v44 = vadd.f32 %v8198_v60, %v2885_v42  ;;  %v2897_v7 = vadd.f32 %v8110_v27, %v2719_v56  ;;  %v961_v16 = vmul.f32 %v8513_v48, %v900_v25  ;;  %v8584_v59 = vpop.f32.mrf.mxu1  ;;  %v9234_v42 = vld [vmem:[#allocation93_spill] sm:$0xff] }
 0x2b8   : > { %v2909_v27 = vadd.f32 %v8118_v47, %v2739_v40  ;;  %v962_v51 = vmul.f32 %v8513_v48, %v8454_v41  ;;  %v964_v56 = vmul.f32 %v8513_v48, %v9234_v42  ;;  %v966_v40 = vmul.f32 %v8513_v48, %v8482_v23 }
 0x2b9   : > { %v3045_v11 = vadd.f32 %v8178_v12, %v2873_v37  ;;  %v8560_v39 = vpop.permute.xlu0 %3816  ;;  %v3248_v60 = vadd.f32 %v8205_v45, %v3059_v44  ;;  %v3073_v6 = vadd.f32 %v8218_v31, %v2897_v7  ;;  %v963_v31 = vmul.f32 %v8513_v48, %v910_v21  ;;  %v8607_v37 = vpop.f32.mrf.mxu1  ;;  %v9237_v44 = vld [vmem:[#allocation14_spill] sm:$0xff] }
 0x2ba   : > { %v8537_v14 = vpop.permute.xlu1 %978  ;;  %v3087_v45 = vadd.f32 %v8238_v5, %v2909_v27  ;;  %v9239_v27 = vld [vmem:[#allocation5_spill] sm:$0xff] }
 0x2bb   : > { %v982_v24 = vadd.f32 %v8537_v14, %v957_v2  ;;  %v981_v30 = vadd.f32 %v8537_v14, %v956_v49  ;;  %v983_v1 = vadd.f32 %v8537_v14, %v958_v10  ;;  %v984_v17 = vadd.f32 %v8537_v14, %v959_v46  ;;  %v9236_v46 = vld [vmem:[#allocation51_spill] sm:$0xff] }
 0x2bc   : > { %v3232_v12 = vadd.f32 %v8185_v38, %v3045_v11  ;;  %v985_v53 = vadd.f32 %v8537_v14, %v960_v54  ;;  %v986_v3 = vadd.f32 %v8537_v14, %v961_v16  ;;  %v3422_v26 = vadd.f32 %v8320_v15, %v3248_v60  ;;  %v8595_v15 = vpop.f32.mrf.mxu0  ;;  %v9238_v60 = vld [vmem:[#allocation2_spill] sm:$0xff] }
 0x2bd   : > { %1015 = vrot.lane.b32.xlu1 %v982_v24, %s6143_s15  ;;  %1013 = vrot.lane.b32.xlu0 %v981_v30, %s6143_s15  ;;  %v3264_v38 = vadd.f32 %v8225_v29, %v3073_v6  ;;  %v930_v41 = vpop.permute.xlu0 %929  ;;  %v3280_v5 = vadd.f32 %v8246_v0, %v3087_v45  ;;  %v987_v2 = vadd.f32 %v8537_v14, %v962_v51  ;;  %v9232_v24 = vld [vmem:[#allocation47_spill] sm:$0xff]  ;;  %v9233_v30 = vld [vmem:[#allocation50_spill] sm:$0xff] }
 0x2be   : > { %v3410_v25 = vadd.f32 %v8308_v34, %v3232_v12  ;;  %v8593_v34 = vadd.f32 %v8322_v19, %v3422_v26  ;;  %v988_v21 = vadd.f32 %v8537_v14, %v963_v31  ;;  %v2609_v49 = vadd.f32 %v8056_v36, %v8466_v43  ;;  %v8614_v0 = vpop.f32.mrf.mxu0  ;;  %v9235_v36 = vld [vmem:[#allocation4_spill] sm:$0xff]  ;;  %v9240_v26 = vld [vmem:[#allocation21_spill] sm:$0xff] }
 0x2bf   : > { %v3434_v29 = vadd.f32 %v8328_v28, %v3264_v38  ;;  %v3446_v19 = vadd.f32 %v9233_v30, %v3280_v5  ;;  %v965_v28 = vmul.f32 %v8513_v48, %v920_v33  ;;  %v2629_v10 = vadd.f32 %v9235_v36, %v8466_v43  ;;  %v8624_v33 = vpop.f32.mrf.mxu1 }
 0x2c0   : > { %v8590_v47 = vadd.f32 %v8311_v9, %v3410_v25  ;;  %v2831_v54 = vadd.f32 %v9237_v44, %v2609_v49  ;;  %v967_v16 = vmul.f32 %v8513_v48, %v930_v41  ;;  %v8631_v12 = vpop.f32.mrf.mxu0  ;;  %v968_v38 = vmul.f32 %v8513_v48, %v8495_v13  ;;  %v9243_v49 = vld [vmem:[#allocation16_spill] sm:$0xff] }
 0x2c1   : > { %1017 = vrot.lane.b32.xlu0 %v983_v1, %s6143_s15  ;;  %1019 = vrot.lane.b32.xlu1 %v984_v17, %s6143_s15  ;;  %v8604_v9 = vadd.f32 %v9232_v24, %v3434_v29  ;;  %v8619_v1 = vadd.f32 %v9236_v46, %v3446_v19  ;;  %v989_v17 = vadd.f32 %v8537_v14, %v964_v56  ;;  %v940_v7 = vpop.permute.xlu0 %939  ;;  %v8639_v23 = vpop.f32.mrf.mxu1  ;;  %v9241_v29 = vld [vmem:[#allocation22_spill] sm:$0xff]  ;;  %v9244_v19 = vld [vmem:[#allocation27_spill] sm:$0xff]  ;;  %v9245_v46 = vld [vmem:[#allocation12_spill] sm:$0xff] }
 0x2c2   : > { %v990_v11 = vadd.f32 %v8537_v14, %v965_v28  ;;  %v2843_v6 = vadd.f32 %v9238_v60, %v2629_v10  ;;  %v992_v25 = vadd.f32 %v8537_v14, %v967_v16  ;;  %v2996_v51 = vadd.f32 %v9240_v26, %v2831_v54  ;;  %v8646_v31 = vpop.f32.mrf.mxu0  ;;  %v9247_v54 = vld [vmem:[#allocation8_spill] sm:$0xff]  ;;  %v9248_v16 = vld [vmem:[#allocation35_spill] sm:$0xff]  ;;  %v9249_v60 = vld [vmem:[#allocation6_spill] sm:$0xff] }
 0x2c3   : > { %v969_v45 = vmul.f32 %v8513_v48, %v940_v7  ;;  %v2669_v24 = vadd.f32 %v9243_v49, %v8466_v43  ;;  %v993_v30 = vadd.f32 %v8537_v14, %v968_v38  ;;  %v970_v56 = vmul.f32 %v8513_v48, %v8515_v32  ;;  %v8660_v36 = vpop.f32.mrf.mxu1  ;;  %v9251_v26 = vld [vmem:[#allocation18_spill] sm:$0xff]  ;;  %v9252_v38 = vld [vmem:[#allocation36_spill] sm:$0xff] }
 0x2c4   : > { %v3010_v5 = vadd.f32 %v9241_v29, %v2843_v6  ;;  %v3176_v42 = vadd.f32 %v9244_v19, %v2996_v51  ;;  %v8662_v10 = vpop.f32.mrf.mxu0  ;;  %v2689_v6 = vadd.f32 %v9249_v60, %v8466_v43  ;;  %v2709_v51 = vadd.f32 %v9251_v26, %v8466_v43  ;;  %v9254_v29 = vld [vmem:[#allocation28_spill] sm:$0xff]  ;;  %v9257_v19 = vld [vmem:[#allocation19_spill] sm:$0xff] }
 0x2c5   : > { %1021 = vrot.lane.b32.xlu0 %v985_v53, %s6143_s15  ;;  %1023 = vrot.lane.b32.xlu1 %v986_v3, %s6143_s15  ;;  %v2649_v53 = vadd.f32 %v9239_v27, %v8466_v43  ;;  %v991_v3 = vadd.f32 %v8537_v14, %v966_v40  ;;  %v950_v41 = vpop.permute.xlu0 %949  ;;  %v994_v13 = vadd.f32 %v8537_v14, %v969_v45  ;;  %v8674_v27 = vpop.f32.mrf.mxu1  ;;  %v9253_v45 = vld [vmem:[#allocation37_spill] sm:$0xff] }
 0x2c6   : > { %v971_v28 = vmul.f32 %v8513_v48, %v950_v41  ;;  %v2867_v7 = vadd.f32 %v9247_v54, %v2669_v24  ;;  %v995_v40 = vadd.f32 %v8537_v14, %v970_v56  ;;  %v3368_v48 = vadd.f32 %v9248_v16, %v3176_v42  ;;  %v9258_v56 = vld [vmem:[#allocation11_spill] sm:$0xff]  ;;  %v9261_v54 = vld [vmem:[#allocation25_spill] sm:$0xff] }
 0x2c7   : > { %v8688_v49 = vpop.f32.mrf.mxu1  ;;  %v2891_v42 = vadd.f32 %v9257_v19, %v2709_v51  ;;  %v9266_v51 = vld [vmem:[#allocation26_spill] sm:$0xff]  ;;  %v9271_v19 = vld [vmem:[#allocation43_spill] sm:$0xff] }
 0x2c8   : > { %v996_v32 = vadd.f32 %v8537_v14, %v971_v28  ;;  %v3530_v14 = vadd.f32 %v9252_v38, %v3368_v48  ;;  %v2729_v28 = vadd.f32 %v9258_v56, %v8466_v43  ;;  %v9263_v48 = vld [vmem:[#allocation29_spill] sm:$0xff]  ;;  %v9272_v56 = vld [vmem:[#allocation20_spill] sm:$0xff] }
 0x2c9   : > { %1025 = vrot.lane.b32.xlu0 %v987_v2, %s6143_s15  ;;  %1027 = vrot.lane.b32.xlu1 %v988_v21, %s6143_s15  ;;  %v9242_v2 = vld [vmem:[#allocation3_spill] sm:$0xff]  ;;  %v3066_v60 = vadd.f32 %v9263_v48, %v2891_v42  ;;  %v9277_v48 = vld [vmem:[#allocation58_spill] sm:$0xff] }
 0x2ca   : > { %v2855_v21 = vadd.f32 %v9242_v2, %v2649_v53  ;;  %v8676_v53 = vpop.f32.mrf.mxu0  ;;  %v9255_v2 = vld [vmem:[#allocation9_spill] sm:$0xff] }
 0x2cc   : > { %v8690_v24 = vpop.f32.mrf.mxu0 }
 0x2cd   : > { %1029 = vrot.lane.b32.xlu0 %v989_v17, %s6143_s15  ;;  %1031 = vrot.lane.b32.xlu1 %v990_v11, %s6143_s15  ;;  %v3192_v17 = vadd.f32 %v9245_v46, %v3010_v5  ;;  %v9246_v11 = vld [vmem:[#allocation13_spill] sm:$0xff]  ;;  %v9259_v46 = vld [vmem:[#allocation38_spill] sm:$0xff] }
 0x2ce   : > { %v3024_v44 = vadd.f32 %v9246_v11, %v2855_v21  ;;  %v2879_v21 = vadd.f32 %v9255_v2, %v2689_v6  ;;  %v9260_v11 = vld [vmem:[#allocation39_spill] sm:$0xff]  ;;  %v9264_v6 = vld [vmem:[#allocation10_spill] sm:$0xff] }
 0x2cf   : > { %v3380_v41 = vadd.f32 %v9253_v45, %v3192_v17  ;;  %v9269_v2 = vld [vmem:[#allocation30_spill] sm:$0xff] }
 0x2d0   : > { %v3208_v5 = vadd.f32 %v9254_v29, %v3024_v44  ;;  %v9268_v29 = vld [vmem:[#allocation42_spill] sm:$0xff] }
 0x2d1   : > { %1033 = vrot.lane.b32.xlu0 %v991_v3, %s6143_s15  ;;  %1035 = vrot.lane.b32.xlu1 %v992_v25, %s6143_s15  ;;  %v9250_v3 = vld [vmem:[#allocation23_spill] sm:$0xff]  ;;  %v3542_v17 = vadd.f32 %v9259_v46, %v3380_v41 }
 0x2d2   : > { %v3038_v25 = vadd.f32 %v9250_v3, %v2867_v7  ;;  %v3392_v44 = vadd.f32 %v9260_v11, %v3208_v5  ;;  %v3052_v7 = vadd.f32 %v9261_v54, %v2879_v21  ;;  %v2903_v3 = vadd.f32 %v9264_v6, %v2729_v28  ;;  %v9275_v54 = vld [vmem:[#allocation15_spill] sm:$0xff]  ;;  %v9278_v6 = vld [vmem:[#allocation56_spill] sm:$0xff] }
 0x2d3   : > { %v3256_v21 = vadd.f32 %v9269_v2, %v3066_v60  ;;  %v3960_v60 = vadd.f32 %v9277_v48, %v8560_v39 }
 0x2d4   : > { %v3240_v38 = vadd.f32 %v9266_v51, %v3052_v7  ;;  %v9280_v51 = vld [vmem:[#allocation33_spill] sm:$0xff] }
 0x2d5   : > { %1037 = vrot.lane.b32.xlu0 %v993_v30, %s6143_s15  ;;  %1039 = vrot.lane.b32.xlu1 %v994_v13, %s6143_s15  ;;  %v9256_v30 = vld [vmem:[#allocation24_spill] sm:$0xff]  ;;  %v3428_v7 = vadd.f32 %v9275_v54, %v3256_v21 }
 0x2d6   : > { %v3224_v13 = vadd.f32 %v9256_v30, %v3038_v25  ;;  %v9265_v25 = vld [vmem:[#allocation40_spill] sm:$0xff]  ;;  %v9270_v30 = vld [vmem:[#allocation31_spill] sm:$0xff]  ;;  %v3416_v42 = vadd.f32 %v9271_v19, %v3240_v38 }
 0x2d7   : > { %v3554_v26 = vadd.f32 %v9265_v25, %v3392_v44  ;;  %v9279_v25 = vld [vmem:[#allocation44_spill] sm:$0xff]  ;;  %v9281_v38 = vld [vmem:[#allocation55_spill] sm:$0xff] }
 0x2d8   : > { %v9284_v21 = vld [vmem:[#allocation60_spill] sm:$0xff] }
 0x2d9   : > { %1041 = vrot.lane.b32.xlu0 %v995_v40, %s6143_s15  ;;  %1043 = vrot.lane.b32.xlu1 %v996_v32, %s6143_s15  ;;  %v8704_v40 = vpop.f32.mrf.mxu0  ;;  %v9262_v32 = vld [vmem:[#allocation41_spill] sm:$0xff] }
 0x2da   : > { %v3404_v16 = vadd.f32 %v9262_v32, %v3224_v13  ;;  %v3080_v13 = vadd.f32 %v9270_v30, %v2903_v3  ;;  %v9276_v32 = vld [vmem:[#allocation32_spill] sm:$0xff]  ;;  %v3970_v3 = vadd.f32 %v9278_v6, %v8560_v39  ;;  %v3990_v30 = vadd.f32 %v9284_v21, %v8560_v39 }
 0x2db   : > { %v8718_v41 = vpop.f32.mrf.mxu0 }
 0x2dc   : > { %v3566_v5 = vadd.f32 %v9268_v29, %v3404_v16  ;;  %v3272_v16 = vadd.f32 %v9276_v32, %v3080_v13  ;;  %v9289_v32 = vld [vmem:[#allocation34_spill] sm:$0xff] }
 0x2dd   : > { %3633 = vrot.lane.b32.xlu0 %v8507_v8, %s6144_s21  ;;  %3635 = vrot.lane.b32.xlu1 %v3530_v14, %s6144_s21  ;;  %v8702_v8 = vpop.f32.mrf.mxu1  ;;  %v9267_v14 = vld [vmem:[#allocation7_spill] sm:$0xff]  ;;  %v8734_v44 = vpop.f32.mrf.mxu0 }
 0x2de   : > { %v2749_v45 = vadd.f32 %v9267_v14, %v8466_v43  ;;  %v9273_v43 = vld [vmem:[#allocation54_spill] sm:$0xff] }
 0x2df   : > { %v3940_v46 = vadd.f32 %v9273_v43, %v8560_v39  ;;  %v8755_v19 = vpop.f32.mrf.mxu0 }
 0x2e0   : > { %v2915_v28 = vadd.f32 %v9272_v56, %v2749_v45  ;;  %v9282_v45 = vld [vmem:[#allocation53_spill] sm:$0xff] }
 0x2e1   : > { %3637 = vrot.lane.b32.xlu0 %v8518_v35, %s6144_s21  ;;  %3639 = vrot.lane.b32.xlu1 %v3542_v17, %s6144_s21  ;;  %v8716_v35 = vpop.f32.mrf.mxu1  ;;  %v4166_v14 = vadd.f32 %v9281_v38, %v3940_v46  ;;  %v9287_v46 = vld [vmem:[#allocation57_spill] sm:$0xff] }
 0x2e3   : > { %v8732_v11 = vpop.f32.mrf.mxu1 }
 0x2e5   : > { %3641 = vrot.lane.b32.xlu0 %v8521_v61, %s6144_s21  ;;  %3643 = vrot.lane.b32.xlu1 %v3554_v26, %s6144_s21  ;;  %v9274_v61 = vld [vmem:[#allocation52_spill] sm:$0xff]  ;;  %v3578_v26 = vadd.f32 %v9279_v25, %v3416_v42  ;;  %v8753_v13 = vpop.f32.mrf.mxu1  ;;  %v9285_v42 = vld [vmem:[#allocation45_spill] sm:$0xff] }
 0x2e6   : > { %v3950_v17 = vadd.f32 %v9274_v61, %v8560_v39  ;;  %v3440_v56 = vadd.f32 %v9285_v42, %v3272_v16  ;;  %v4184_v61 = vadd.f32 %v9287_v46, %v3970_v3  ;;  %v9291_v25 = vld [vmem:[#allocation84_spill] sm:$0xff]  ;;  %v9293_v16 = vld [vmem:[#allocation61_spill] sm:$0xff] }
 0x2e8   : > { %v4172_v29 = vadd.f32 %v9282_v45, %v3950_v17  ;;  %v9288_v17 = vld [vmem:[#allocation17_spill] sm:$0xff]  ;;  %v4196_v45 = vadd.f32 %v9293_v16, %v3990_v30  ;;  %v9301_v30 = vld [vmem:[#allocation64_spill] sm:$0xff]  ;;  %v9304_v16 = vld [vmem:[#allocation67_spill] sm:$0xff] }
 0x2e9   : > { %3645 = vrot.lane.b32.xlu0 %v8535_v55, %s6144_s21  ;;  %3647 = vrot.lane.b32.xlu1 %v3566_v5, %s6144_s21  ;;  %v3094_v55 = vadd.f32 %v9280_v51, %v2915_v28  ;;  %v9283_v5 = vld [vmem:[#allocation62_spill] sm:$0xff]  ;;  %v9286_v28 = vld [vmem:[#allocation59_spill] sm:$0xff]  ;;  %v3590_v54 = vadd.f32 %v9288_v17, %v3428_v7  ;;  %v4738_v7 = vpop.f32.mrf.mxu0 }
 0x2ea   : > { %v3980_v2 = vadd.f32 %v9283_v5, %v8560_v39  ;;  %v4178_v43 = vadd.f32 %v9286_v28, %v3960_v60  ;;  %v9292_v51 = vld [vmem:[#allocation63_spill] sm:$0xff]  ;;  %v9294_v60 = vld [vmem:[#allocation66_spill] sm:$0xff]  ;;  %v8771_v5 = vpop.f32.mrf.mxu1 }
 0x2eb   : > { %v3288_v48 = vadd.f32 %v9289_v32, %v3094_v55  ;;  %v4000_v3 = vadd.f32 %v9294_v60, %v8560_v39  ;;  %v9295_v55 = vld [vmem:[#allocation46_spill] sm:$0xff]  ;;  %v9299_v17 = vld [vmem:[#allocation87_spill] sm:$0xff]  ;;  %v9300_v32 = vld [vmem:[#allocation85_spill] sm:$0xff] }
 0x2ec   : > { %v4190_v38 = vadd.f32 %v9292_v51, %v3980_v2  ;;  %v3602_v21 = vadd.f32 %v9295_v55, %v3440_v56  ;;  %v9298_v2 = vld [vmem:[#allocation48_spill] sm:$0xff]  ;;  %v4900_v60 = vpop.f32.mrf.mxu1 }
 0x2ed   : > { %3649 = vrot.lane.b32.xlu0 %v8590_v47, %s6144_s21  ;;  %3651 = vrot.lane.b32.xlu1 %v3578_v26, %s6144_s21  ;;  %v9290_v47 = vld [vmem:[#allocation86_spill] sm:$0xff]  ;;  %v4337_v26 = vadd.f32 %v9291_v25, %v4172_v29  ;;  %v9297_v29 = vld [vmem:[#allocation88_spill] sm:$0xff]  ;;  %v3452_v46 = vadd.f32 %v9298_v2, %v3288_v48  ;;  %v9302_v25 = vld [vmem:[#allocation95_spill] sm:$0xff]  ;;  %v8787_v48 = vpop.f32.mrf.mxu0 }
 0x2ee   : > { %v4330_v6 = vadd.f32 %v9290_v47, %v4166_v14  ;;  %v9296_v14 = vld [vmem:[#allocation90_spill] sm:$0xff]  ;;  %v4351_v28 = vadd.f32 %v9297_v29, %v4184_v61  ;;  %v4010_v47 = vadd.f32 %v9301_v30, %v8560_v39  ;;  %v4358_v51 = vadd.f32 %v9302_v25, %v4190_v38  ;;  %v9303_v56 = vld [vmem:[#allocation92_spill] sm:$0xff] }
 0x2ef   : > { %v4344_v42 = vadd.f32 %v9296_v14, %v4178_v43  ;;  %v4365_v43 = vadd.f32 %v9303_v56, %v4196_v45  ;;  %v4202_v61 = vadd.f32 %v9304_v16, %v4000_v3  ;;  %v9307_v29 = vld [vmem:[#allocation70_spill] sm:$0xff]  ;;  %v9308_v38 = vld [vmem:[#allocation68_spill] sm:$0xff]  ;;  %v9310_v3 = vld [vmem:[#allocation65_spill] sm:$0xff] }
 0x2f0   : > { %v4020_v2 = vadd.f32 %v9307_v29, %v8560_v39  ;;  %v4208_v30 = vadd.f32 %v9310_v3, %v4010_v47  ;;  %v9311_v25 = vld [vmem:[#allocation96_spill] sm:$0xff]  ;;  %v9315_v47 = vld [vmem:[#allocation69_spill] sm:$0xff] }
 0x2f1   : > { %3653 = vrot.lane.b32.xlu0 %v8593_v34, %s6144_s21  ;;  %3655 = vrot.lane.b32.xlu1 %v3590_v54, %s6144_s21  ;;  %v4509_v34 = vadd.f32 %v9299_v17, %v4330_v6  ;;  %v4517_v54 = vadd.f32 %v9300_v32, %v4337_v26  ;;  %v9305_v6 = vld [vmem:[#allocation91_spill] sm:$0xff]  ;;  %v9306_v26 = vld [vmem:[#allocation89_spill] sm:$0xff]  ;;  %v4030_v17 = vadd.f32 %v9308_v38, %v8560_v39 }
 0x2f2   : > { %v4525_v55 = vadd.f32 %v9305_v6, %v4344_v42  ;;  %v4533_v14 = vadd.f32 %v9306_v26, %v4351_v28  ;;  %v4541_v56 = vadd.f32 %v9311_v25, %v4358_v51  ;;  %v9312_v42 = vld [vmem:[#allocation94_spill] sm:$0xff]  ;;  %v4372_v16 = vadd.f32 %v8491_v22, %v4202_v61  ;;  %v8807_v26 = vpop.f32.mrf.mxu1  ;;  %v9317_v61 = vld [vmem:[#allocation97_spill] sm:$0xff] }
 0x2f3   : > { %v4709_v45 = vadd.f32 %v8662_v10, %v4517_v54  ;;  %v4549_v28 = vadd.f32 %v9312_v42, %v4365_v43  ;;  %v9313_v6 = vld [vmem:[#allocation74_spill] sm:$0xff]  ;;  %v4220_v51 = vadd.f32 %v9315_v47, %v4030_v17 }
 0x2f4   : > { %v4715_v10 = vadd.f32 %v8704_v40, %v4525_v55  ;;  %v4721_v22 = vadd.f32 %v8690_v24, %v4533_v14  ;;  %v4557_v55 = vadd.f32 %v8502_v57, %v4372_v16  ;;  %v4912_v3 = vpop.f32.mrf.mxu1  ;;  %v9319_v14 = vld [vmem:[#allocation73_spill] sm:$0xff]  ;;  %v9321_v57 = vld [vmem:[#allocation76_spill] sm:$0xff]  ;;  %v9324_v47 = vld [vmem:[#allocation82_spill] sm:$0xff] }
 0x2f5   : > { %3657 = vrot.lane.b32.xlu0 %v8604_v9, %s6144_s21  ;;  %3659 = vrot.lane.b32.xlu1 %v3602_v21, %s6144_s21  ;;  %v9309_v9 = vld [vmem:[#allocation49_spill] sm:$0xff]  ;;  %v4703_v21 = vadd.f32 %v8676_v53, %v4509_v34  ;;  %v4750_v53 = vpop.f32.mrf.mxu0  ;;  %v9314_v34 = vld [vmem:[#allocation71_spill] sm:$0xff]  ;;  %v4871_v43 = vadd.f32 %v8674_v27, %v4709_v45  ;;  %v4733_v40 = vadd.f32 %v8718_v41, %v4549_v28 }
 0x2f6   : > { %v3614_v32 = vadd.f32 %v9309_v9, %v3452_v46  ;;  %v4040_v46 = vadd.f32 %v9313_v6, %v8560_v39  ;;  %v4214_v54 = vadd.f32 %v9314_v34, %v4020_v2  ;;  %v4379_v9 = vadd.f32 %v9317_v61, %v4208_v30  ;;  %v9318_v2 = vld [vmem:[#allocation75_spill] sm:$0xff]  ;;  %v6093_v16 = vpop.f32.mrf.mxu1  ;;  %v9323_v34 = vld [vmem:[#allocation77_spill] sm:$0xff] }
 0x2f7   : > { %v4865_v38 = vadd.f32 %v8688_v49, %v4703_v21  ;;  %v6067_v49 = vpop.f32.mrf.mxu0  ;;  %v4393_v24 = vadd.f32 %v8504_v62, %v4220_v51  ;;  %v4877_v30 = vadd.f32 %v8716_v35, %v4715_v10  ;;  %v4883_v25 = vadd.f32 %v8702_v8, %v4721_v22  ;;  %v9326_v22 = vld [vmem:[#allocation83_spill] sm:$0xff] }
 0x2f8   : > { %v4226_v17 = vadd.f32 %v9318_v2, %v4040_v46  ;;  %v4386_v27 = vadd.f32 %v8530_v20, %v4214_v54  ;;  %v4565_v41 = vadd.f32 %v8489_v18, %v4379_v9  ;;  %v4895_v62 = vadd.f32 %v8732_v11, %v4733_v40  ;;  %v9322_v46 = vld [vmem:[#allocation79_spill] sm:$0xff]  ;;  %v9327_v9 = vld [vmem:[#allocation81_spill] sm:$0xff] }
 0x2f9   : > { %3661 = vrot.lane.b32.xlu0 %v8619_v1, %s6144_s21  ;;  %3663 = vrot.lane.b32.xlu1 %v3614_v32, %s6144_s21  ;;  %v9316_v1 = vld [vmem:[#allocation72_spill] sm:$0xff]  ;;  %v4727_v32 = vadd.f32 %v8734_v44, %v4541_v56  ;;  %v9320_v44 = vld [vmem:[#allocation78_spill] sm:$0xff]  ;;  %v4070_v56 = vadd.f32 %v9321_v57, %v8560_v39  ;;  %v4739_v20 = vadd.f32 %v4738_v7, %v4557_v55  ;;  %v4762_v35 = vpop.f32.mrf.mxu0 }
 0x2fa   : > { %v4050_v29 = vadd.f32 %v9316_v1, %v8560_v39  ;;  %v4060_v45 = vadd.f32 %v9320_v44, %v8560_v39  ;;  %v4400_v28 = vadd.f32 %v8572_v50, %v4226_v17  ;;  %v4573_v8 = vadd.f32 %v8545_v4, %v4386_v27  ;;  %v9325_v7 = vld [vmem:[#allocation80_spill] sm:$0xff] }
 0x2fb   : > { %v4889_v42 = vadd.f32 %v8753_v13, %v4727_v32  ;;  %v4581_v18 = vadd.f32 %v8528_v58, %v4393_v24  ;;  %v4745_v13 = vadd.f32 %v8755_v19, %v4565_v41  ;;  %v4244_v54 = vadd.f32 %v9323_v34, %v4070_v56  ;;  %v6070_v51 = vpop.f32.mrf.mxu0 }
 0x2fc   : > { %v4232_v21 = vadd.f32 %v9319_v14, %v4050_v29  ;;  %v4238_v10 = vadd.f32 %v9322_v46, %v4060_v45  ;;  %v4080_v11 = vadd.f32 %v9324_v47, %v8560_v39  ;;  %v4090_v50 = vadd.f32 %v9325_v7, %v8560_v39 }
 0x2fd   : > { %4974 = vrot.lane.b32.xlu0 %v4865_v38, %s6145_s24  ;;  %4976 = vrot.lane.b32.xlu1 %v4871_v43, %s6145_s24  ;;  %v4901_v4 = vadd.f32 %v4900_v60, %v4739_v20  ;;  %v4589_v58 = vadd.f32 %v8584_v59, %v4400_v28  ;;  %v4751_v1 = vadd.f32 %v4750_v53, %v4573_v8  ;;  %v4774_v60 = vpop.f32.mrf.mxu0 }
 0x2fe   : > { %v4407_v6 = vadd.f32 %v8552_v63, %v4232_v21  ;;  %v4924_v63 = vpop.f32.mrf.mxu1  ;;  %v4757_v19 = vadd.f32 %v8787_v48, %v4581_v18  ;;  %v4414_v38 = vadd.f32 %v8614_v0, %v4238_v10  ;;  %v4907_v43 = vadd.f32 %v8771_v5, %v4745_v13 }
 0x2ff   : > { %v4421_v39 = vadd.f32 %v8595_v15, %v4244_v54  ;;  %v4250_v61 = vadd.f32 %v9326_v22, %v4080_v11  ;;  %v4256_v32 = vadd.f32 %v9327_v9, %v4090_v50  ;;  %v4913_v53 = vadd.f32 %v4912_v3, %v4751_v1  ;;  %v6073_v17 = vpop.f32.mrf.mxu0 }
 0x300   : > { %v4597_v29 = vadd.f32 %v8565_v52, %v4407_v6  ;;  %v6096_v59 = vpop.f32.mrf.mxu1  ;;  %v4763_v48 = vadd.f32 %v4762_v35, %v4589_v58  ;;  %v4605_v52 = vadd.f32 %v8624_v33, %v4414_v38  ;;  %v4919_v0 = vadd.f32 %v8807_v26, %v4757_v19 }
 0x301   : > { %4978 = vrot.lane.b32.xlu0 %v4877_v30, %s6145_s24  ;;  %4980 = vrot.lane.b32.xlu1 %v4883_v25, %s6145_s24  ;;  %v4613_v5 = vadd.f32 %v8607_v37, %v4421_v39  ;;  %v4428_v15 = vadd.f32 %v8646_v31, %v4250_v61  ;;  %v4435_v55 = vadd.f32 %v8631_v12, %v4256_v32  ;;  %v4786_v12 = vpop.f32.mrf.mxu0 }
 0x302   : > { %v4769_v40 = vadd.f32 %v6067_v49, %v4597_v29  ;;  %v4936_v2 = vpop.f32.mrf.mxu1  ;;  %v4925_v27 = vadd.f32 %v4924_v63, %v4763_v48  ;;  %v4775_v24 = vadd.f32 %v4774_v60, %v4605_v52 }
 0x303   : > { %v4781_v49 = vadd.f32 %v6070_v51, %v4613_v5  ;;  %v4621_v33 = vadd.f32 %v8660_v36, %v4428_v15  ;;  %v4629_v26 = vadd.f32 %v8639_v23, %v4435_v55 }
 0x304   : > { %v4931_v3 = vadd.f32 %v6093_v16, %v4769_v40  ;;  %v6099_v37 = vpop.f32.mrf.mxu1  ;;  %v4937_v31 = vadd.f32 %v4936_v2, %v4775_v24 }
 0x305   : > { %4982 = vrot.lane.b32.xlu0 %v4889_v42, %s6145_s24  ;;  %4984 = vrot.lane.b32.xlu1 %v4895_v62, %s6145_s24  ;;  %v4943_v14 = vadd.f32 %v6096_v59, %v4781_v49  ;;  %v4787_v21 = vadd.f32 %v4786_v12, %v4621_v33  ;;  %v4793_v44 = vadd.f32 %v6073_v17, %v4629_v26 }
 0x306   : > { %v4948_v36 = vpop.f32.mrf.mxu1 }
 0x307   : > { %v4949_v23 = vadd.f32 %v4948_v36, %v4787_v21  ;;  %v4955_v45 = vadd.f32 %v6099_v37, %v4793_v44 }
 0x309   : > { %4986 = vrot.lane.b32.xlu0 %v4901_v4, %s6145_s24  ;;  %4988 = vrot.lane.b32.xlu1 %v4907_v43, %s6145_s24 }
 0x30d   : > { %4990 = vrot.lane.b32.xlu0 %v4913_v53, %s6145_s24  ;;  %4992 = vrot.lane.b32.xlu1 %v4919_v0, %s6145_s24 }
 0x311   : > { %4994 = vrot.lane.b32.xlu0 %v4925_v27, %s6145_s24  ;;  %4996 = vrot.lane.b32.xlu1 %v4931_v3, %s6145_s24 }
 0x315   : > { %4998 = vrot.lane.b32.xlu0 %v4937_v31, %s6145_s24  ;;  %5000 = vrot.lane.b32.xlu1 %v4943_v14, %s6145_s24 }
 0x319   : > { %5002 = vrot.lane.b32.xlu0 %v4949_v23, %s6145_s24  ;;  %5004 = vrot.lane.b32.xlu1 %v4955_v45, %s6145_s24 }
 0x32f   : > { %v1016_v30 = vpop.permute.xlu1 %1015  ;;  %v1014_v25 = vpop.permute.xlu0 %1013 }
 0x330   : > { %1063 = vst.msk [vmem:[%s6643_s14 + $0x10] sm:$0xff] %vm1061_vm2, %v1016_v30  ;;  %1062 = vst.msk [vmem:[%s6643_s14] sm:$0xff] %vm1061_vm2, %v1014_v25 }
 0x333   : > { %v1020_v41 = vpop.permute.xlu1 %1019  ;;  %v1018_v57 = vpop.permute.xlu0 %1017 }
 0x334   : > { %1065 = vst.msk [vmem:[%s6643_s14 + $0x30] sm:$0xff] %vm1061_vm2, %v1020_v41  ;;  %1064 = vst.msk [vmem:[%s6643_s14 + $0x20] sm:$0xff] %vm1061_vm2, %v1018_v57 }
 0x337   : > { %v1024_v56 = vpop.permute.xlu1 %1023  ;;  %v1022_v42 = vpop.permute.xlu0 %1021 }
 0x338   : > { %1067 = vst.msk [vmem:[%s6643_s14 + $0x50] sm:$0xff] %vm1061_vm2, %v1024_v56  ;;  %1066 = vst.msk [vmem:[%s6643_s14 + $0x40] sm:$0xff] %vm1061_vm2, %v1022_v42 }
 0x33b   : > { %v1028_v62 = vpop.permute.xlu1 %1027  ;;  %v1026_v20 = vpop.permute.xlu0 %1025 }
 0x33c   : > { %1069 = vst.msk [vmem:[%s6643_s14 + $0x70] sm:$0xff] %vm1061_vm2, %v1028_v62  ;;  %1068 = vst.msk [vmem:[%s6643_s14 + $0x60] sm:$0xff] %vm1061_vm2, %v1026_v20 }
 0x33f   : > { %v1032_v28 = vpop.permute.xlu1 %1031  ;;  %v1030_v16 = vpop.permute.xlu0 %1029 }
 0x340   : > { %1071 = vst.msk [vmem:[%s6643_s14 + $0x90] sm:$0xff] %vm1061_vm2, %v1032_v28  ;;  %1070 = vst.msk [vmem:[%s6643_s14 + $0x80] sm:$0xff] %vm1061_vm2, %v1030_v16 }
 0x343   : > { %v1036_v35 = vpop.permute.xlu1 %1035  ;;  %v1034_v8 = vpop.permute.xlu0 %1033 }
 0x344   : > { %1073 = vst.msk [vmem:[%s6643_s14 + $0xb0] sm:$0xff] %vm1061_vm2, %v1036_v35  ;;  %1072 = vst.msk [vmem:[%s6643_s14 + $0xa0] sm:$0xff] %vm1061_vm2, %v1034_v8 }
 0x347   : > { %v1040_v18 = vpop.permute.xlu1 %1039  ;;  %v1038_v6 = vpop.permute.xlu0 %1037 }
 0x348   : > { %1075 = vst.msk [vmem:[%s6643_s14 + $0xd0] sm:$0xff] %vm1061_vm2, %v1040_v18  ;;  %1074 = vst.msk [vmem:[%s6643_s14 + $0xc0] sm:$0xff] %vm1061_vm2, %v1038_v6 }
 0x34b   : > { %v1044_v46 = vpop.permute.xlu1 %1043  ;;  %v1042_v10 = vpop.permute.xlu0 %1041 }
 0x34c   : > { %1077 = vst.msk [vmem:[%s6643_s14 + $0xf0] sm:$0xff] %vm1061_vm2, %v1044_v46  ;;  %1076 = vst.msk [vmem:[%s6643_s14 + $0xe0] sm:$0xff] %vm1061_vm2, %v1042_v10 }
 0x34f   : > { %v3636_v13 = vpop.permute.xlu1 %3635  ;;  %v3634_v34 = vpop.permute.xlu0 %3633 }
 0x350   : > { %3682 = vst.msk [vmem:[%s6643_s14 + $0x18] sm:$0xff] %vm615_vm7, %v3636_v13  ;;  %3681 = vst.msk [vmem:[%s6643_s14 + $0x8] sm:$0xff] %vm615_vm7, %v3634_v34 }
 0x353   : > { %v3640_v54 = vpop.permute.xlu1 %3639  ;;  %v3638_v47 = vpop.permute.xlu0 %3637 }
 0x354   : > { %3684 = vst.msk [vmem:[%s6643_s14 + $0x38] sm:$0xff] %vm615_vm7, %v3640_v54  ;;  %3683 = vst.msk [vmem:[%s6643_s14 + $0x28] sm:$0xff] %vm615_vm7, %v3638_v47 }
 0x357   : > { %v3644_v11 = vpop.permute.xlu1 %3643  ;;  %v3642_v7 = vpop.permute.xlu0 %3641 }
 0x358   : > { %3686 = vst.msk [vmem:[%s6643_s14 + $0x58] sm:$0xff] %vm615_vm7, %v3644_v11  ;;  %3685 = vst.msk [vmem:[%s6643_s14 + $0x48] sm:$0xff] %vm615_vm7, %v3642_v7 }
 0x35b   : > { %v3648_v50 = vpop.permute.xlu1 %3647  ;;  %v3646_v4 = vpop.permute.xlu0 %3645 }
 0x35c   : > { %3688 = vst.msk [vmem:[%s6643_s14 + $0x78] sm:$0xff] %vm615_vm7, %v3648_v50  ;;  %3687 = vst.msk [vmem:[%s6643_s14 + $0x68] sm:$0xff] %vm615_vm7, %v3646_v4 }
 0x35f   : > { %v3652_v58 = vpop.permute.xlu1 %3651  ;;  %v3650_v63 = vpop.permute.xlu0 %3649 }
 0x360   : > { %3690 = vst.msk [vmem:[%s6643_s14 + $0x98] sm:$0xff] %vm615_vm7, %v3652_v58  ;;  %3689 = vst.msk [vmem:[%s6643_s14 + $0x88] sm:$0xff] %vm615_vm7, %v3650_v63 }
 0x363   : > { %v3656_v51 = vpop.permute.xlu1 %3655  ;;  %v3654_v1 = vpop.permute.xlu0 %3653 }
 0x364   : > { %3692 = vst.msk [vmem:[%s6643_s14 + $0xb8] sm:$0xff] %vm615_vm7, %v3656_v51  ;;  %3691 = vst.msk [vmem:[%s6643_s14 + $0xa8] sm:$0xff] %vm615_vm7, %v3654_v1 }
 0x367   : > { %v3660_v19 = vpop.permute.xlu1 %3659  ;;  %v3658_v29 = vpop.permute.xlu0 %3657 }
 0x368   : > { %3694 = vst.msk [vmem:[%s6643_s14 + $0xd8] sm:$0xff] %vm615_vm7, %v3660_v19  ;;  %3693 = vst.msk [vmem:[%s6643_s14 + $0xc8] sm:$0xff] %vm615_vm7, %v3658_v29 }
 0x36b   : > { %v3664_v38 = vpop.permute.xlu1 %3663  ;;  %v3662_v43 = vpop.permute.xlu0 %3661 }
 0x36c   : > { %3696 = vst.msk [vmem:[%s6643_s14 + $0xf8] sm:$0xff] %vm615_vm7, %v3664_v38  ;;  %3695 = vst.msk [vmem:[%s6643_s14 + $0xe8] sm:$0xff] %vm615_vm7, %v3662_v43 }
 0x36f   : > { %v4977_v39 = vpop.permute.xlu1 %4976  ;;  %v4975_v22 = vpop.permute.xlu0 %4974 }
 0x370   : > { %5023 = vst.msk [vmem:[%s6643_s14 + $0x18] sm:$0xff] %vm838_vm0, %v4977_v39  ;;  %5022 = vst.msk [vmem:[%s6643_s14 + $0x8] sm:$0xff] %vm838_vm0, %v4975_v22 }
 0x373   : > { %v4981_v61 = vpop.permute.xlu1 %4980  ;;  %v4979_v9 = vpop.permute.xlu0 %4978 }
 0x374   : > { %5025 = vst.msk [vmem:[%s6643_s14 + $0x38] sm:$0xff] %vm838_vm0, %v4981_v61  ;;  %5024 = vst.msk [vmem:[%s6643_s14 + $0x28] sm:$0xff] %vm838_vm0, %v4979_v9 }
 0x377   : > { %v4985_v32 = vpop.permute.xlu1 %4984  ;;  %v4983_v59 = vpop.permute.xlu0 %4982 }
 0x378   : > { %5027 = vst.msk [vmem:[%s6643_s14 + $0x58] sm:$0xff] %vm838_vm0, %v4985_v32  ;;  %5026 = vst.msk [vmem:[%s6643_s14 + $0x48] sm:$0xff] %vm838_vm0, %v4983_v59 }
 0x37b   : > { %v4989_v60 = vpop.permute.xlu1 %4988  ;;  %v4987_v53 = vpop.permute.xlu0 %4986 }
 0x37c   : > { %5029 = vst.msk [vmem:[%s6643_s14 + $0x78] sm:$0xff] %vm838_vm0, %v4989_v60  ;;  %5028 = vst.msk [vmem:[%s6643_s14 + $0x68] sm:$0xff] %vm838_vm0, %v4987_v53 }
 0x37f   : > { %v4993_v48 = vpop.permute.xlu1 %4992  ;;  %v4991_v40 = vpop.permute.xlu0 %4990 }
 0x380   : > { %5031 = vst.msk [vmem:[%s6643_s14 + $0x98] sm:$0xff] %vm838_vm0, %v4993_v48  ;;  %5030 = vst.msk [vmem:[%s6643_s14 + $0x88] sm:$0xff] %vm838_vm0, %v4991_v40 }
 0x383   : > { %v4997_v52 = vpop.permute.xlu1 %4996  ;;  %v4995_v0 = vpop.permute.xlu0 %4994 }
 0x384   : > { %5033 = vst.msk [vmem:[%s6643_s14 + $0xb8] sm:$0xff] %vm838_vm0, %v4997_v52  ;;  %5032 = vst.msk [vmem:[%s6643_s14 + $0xa8] sm:$0xff] %vm838_vm0, %v4995_v0 }
 0x387   : > { %v5001_v5 = vpop.permute.xlu1 %5000  ;;  %v4999_v15 = vpop.permute.xlu0 %4998 }
 0x388   : > { %5035 = vst.msk [vmem:[%s6643_s14 + $0xd8] sm:$0xff] %vm838_vm0, %v5001_v5  ;;  %5034 = vst.msk [vmem:[%s6643_s14 + $0xc8] sm:$0xff] %vm838_vm0, %v4999_v15 }
 0x38b   : > { %v5005_v55 = vpop.permute.xlu1 %5004  ;;  %v5003_v2 = vpop.permute.xlu0 %5002 }
 0x38c   : > { %5037 = vst.msk [vmem:[%s6643_s14 + $0xf8] sm:$0xff] %vm838_vm0, %v5005_v55  ;;  %5036 = vst.msk [vmem:[%s6643_s14 + $0xe8] sm:$0xff] %vm838_vm0, %v5003_v2 }
 0x38d PF: > { %s15_s18 = sadd.s32 1, %s6137_s18  }
 0x38e   : > { %p12_p4 = scmp.ge.s32.totalorder %s15_s18, 4  }
 0x390   :  { %14 = sbr.rel (!%p12_p4) target bundleno = 1 (0x1), region = 73 }

</bundles_post_ra>
